<compile_context>
chip_gen: v6e
topology: v6e:2x2x1
jax: 0.10.0
libtpu: 0.0.40
codegen_flags: <defaults>
</compile_context>

<pallas_src>
import functools
import math

import jax
import jax.numpy as jnp
from jax.experimental import pallas as pl
from jax.experimental.pallas import tpu as pltpu


# ----------------------------------------------------------------------------
# Kernel A: 1-D encoder (conv1d stack + BN + ReLU + 4 ResNet1d blocks).
# Conv order: [conv1d1, conv1d2, blk0.conv1, blk0.conv2, ..., blk3.conv2]
# BN order  : [bn1,     bn2,     blk0.bn1,   blk0.bn2,   ..., blk3.bn2 ]
# ----------------------------------------------------------------------------
def _encoder_kernel(wcat_ref, bconv_ref, bns_ref, bnb_ref, x_ref, emb_ref,
                    xp_ref, slab_ref, *, d, L):
    # Zero the padded activation scratch once; only [:, 8:8+L] is rewritten, so
    # the 8-wide zero borders implement the conv padding for every layer.
    xp_ref[...] = jnp.zeros((d, L + 16), jnp.float32)

    def conv(idx, h):
        # Dilated conv1d (k=9, pad=8, dil=2) as a single (d, 9d) @ (9d, L)
        # matmul: stack the 9 lane-shifted views of the padded input.
        xp_ref[:, 8:8 + L] = h
        for k in range(9):
            slab_ref[k * d:(k + 1) * d, :] = xp_ref[:, 2 * k:2 * k + L]
        y = jnp.dot(wcat_ref[idx], slab_ref[...],
                    precision=jax.lax.Precision.HIGHEST,
                    preferred_element_type=jnp.float32)
        return y + bconv_ref[idx]                 # (d, L) + (d, 1)

    def bn(idx, h):
        return h * bns_ref[idx] + bnb_ref[idx]

    y = x_ref[0].astype(jnp.float32)                       # (d, L)
    y = jnp.maximum(bn(0, conv(0, y)), 0.0)                # conv1d1 + bn1 + relu
    y = jnp.maximum(bn(1, conv(1, y)), 0.0)                # conv1d2 + bn2 + relu
    for blk in range(4):                                   # resnet1d (4 blocks)
        h = jnp.maximum(bn(2 + 2 * blk, y), 0.0)
        h = conv(2 + 2 * blk, h)
        h = jnp.maximum(bn(3 + 2 * blk, h), 0.0)
        h = conv(3 + 2 * blk, h)
        y = y + h
    emb_ref[0] = y.astype(emb_ref.dtype)


# ----------------------------------------------------------------------------
# Kernel B: matrix_rep + LocallyConnected2d(2d, 1, L, k=1), with symmetrization
# already folded into the (pre-symmetrized) weights:
#   out[i, j] = sum_c  Wsym[c,   i, j] * emb[c, min(i, j)]
#             + sum_c  Wsym[d+c, i, j] * emb[c, max(i, j)]
# The (B, 2d, L, L) intermediate of the PyTorch code is never materialized.
# ----------------------------------------------------------------------------
def _lc_kernel(embT_ref, emb_ref, w_ref, out_ref, *, d, ti, tj):
    er = embT_ref[0].astype(jnp.float32)     # (ti, d): emb[c, i] at [i_local, c]
    ec = emb_ref[0].astype(jnp.float32)      # (d, tj): emb[c, j] at [c, j_local]
    i0 = pl.program_id(0) * ti
    j0 = pl.program_id(1) * tj

    def accumulate(select):
        acc = jnp.zeros((ti, tj), jnp.float32)
        # TODO(synk): switch to lax.fori_loop(..., unroll=4) if d is configured
        # large (>~32) to avoid trace blowup / vreg spill.
        for c in range(d):
            col = jnp.broadcast_to(ec[c:c + 1, :], (ti, tj))   # emb[c, j]
            row = jnp.broadcast_to(er[:, c:c + 1], (ti, tj))   # emb[c, i]
            lo, hi = select(row, col)
            acc = acc + w_ref[c] * lo + w_ref[d + c] * hi
        return acc

    all_lower = i0 >= j0 + (tj - 1)     # every (i, j) in the tile has i >= j
    all_upper = j0 >= i0 + ti           # every (i, j) in the tile has i <  j

    @pl.when(all_lower)
    def _():                            # min = j (col), max = i (row)
        out_ref[0] = accumulate(lambda row, col: (col, row)).astype(out_ref.dtype)

    @pl.when(all_upper)
    def _():                            # min = i (row), max = j (col)
        out_ref[0] = accumulate(lambda row, col: (row, col)).astype(out_ref.dtype)

    @pl.when(jnp.logical_not(jnp.logical_or(all_lower, all_upper)))
    def _():                            # diagonal-straddling tile
        ii = i0 + jax.lax.broadcasted_iota(jnp.int32, (ti, tj), 0)
        jj = j0 + jax.lax.broadcasted_iota(jnp.int32, (ti, tj), 1)
        lower = ii >= jj
        out_ref[0] = accumulate(
            lambda row, col: (jnp.where(lower, col, row),
                              jnp.where(lower, row, col))).astype(out_ref.dtype)


# ----------------------------------------------------------------------------
# Tiling for kernel B.
# ----------------------------------------------------------------------------
def _tiling(L, d):
    """Return (Lp, ti, tj): padded length and tile sizes for kernel B."""
    # Lane-odd but tiny weight tile: a single full-extent block is legal & cheap.
    if L % 128 != 0 and 2 * (2 * d) * L * L * 4 <= (6 << 20):
        return L, L, L
    # Otherwise pad L up to a multiple of 128 and use lane-aligned tiles.
    Lp = ((L + 127) // 128) * 128
    ti = 128
    tj = 128
    # Widen the lane (j) tile while the double-buffered weight block stays
    # comfortably inside the default scoped-VMEM limit on all chips.
    while (tj * 2 <= Lp and Lp % (tj * 2) == 0
           and 2 * (2 * d) * ti * (tj * 2) * 4 <= (8 << 20)):
        tj *= 2
    return Lp, ti, tj


# ----------------------------------------------------------------------------
# Wrapper
# ----------------------------------------------------------------------------
def contact_network_test_forward(prior, seq, state, params, *, d, L):
    """Pallas forward of ContactNetwork_test. Returns (B, L, L) contact maps."""
    del prior, state   # unused by ContactNetwork_test.forward (signature parity)
    assert d >= 4
    B = seq.shape[0]

    conv_w = params["conv_w"]          # (10, d, d, 9)  (conv1d1 Cin zero-padded)
    conv_b = params["conv_b"]          # (10, d)
    bn_s = params["bn_scale"]          # (10, d)
    bn_b = params["bn_shift"]          # (10, d)
    lc_w = params["lc_w"]              # (2d, L, L)

    # Fold the final (C + C^T)/2 into the LC weights (exact: min/max features
    # are symmetric in (i, j)), so kernel B directly emits the contact map.
    lc_sym = 0.5 * (lc_w + jnp.swapaxes(lc_w, -1, -2))

    # Kernel-friendly layouts (tiny, one-time layout prep).
    # wcat[l][o, k*d + i] = conv_w[l, o, i, k]  -> one K=9d matmul per layer.
    wcat = jnp.transpose(conv_w, (0, 1, 3, 2)).reshape(10, d, 9 * d)
    bconv = conv_b[:, :, None]
    bns = bn_s[:, :, None]
    bnb = bn_b[:, :, None]

    # seq (B, L, 4) -> channels-first, zero-padded to d channels.
    x = jnp.transpose(seq, (0, 2, 1))
    x = jnp.pad(x, ((0, 0), (0, d - 4), (0, 0)))          # (B, d, L)

    # --- Kernel A: sequence encoder -> emb (B, d, L) -------------------------
    emb = pl.pallas_call(
        functools.partial(_encoder_kernel, d=d, L=L),
        out_shape=jax.ShapeDtypeStruct((B, d, L), jnp.float32),
        grid=(B,),
        in_specs=[
            pl.BlockSpec((10, d, 9 * d), lambda b: (0, 0, 0)),   # fused tap weights
            pl.BlockSpec((10, d, 1), lambda b: (0, 0, 0)),       # conv biases
            pl.BlockSpec((10, d, 1), lambda b: (0, 0, 0)),       # bn scale
            pl.BlockSpec((10, d, 1), lambda b: (0, 0, 0)),       # bn shift
            pl.BlockSpec((1, d, L), lambda b: (b, 0, 0)),        # input sequence
        ],
        out_specs=pl.BlockSpec((1, d, L), lambda b: (b, 0, 0)),
        scratch_shapes=[pltpu.VMEM((d, L + 16), jnp.float32),
                        pltpu.VMEM((9 * d, L), jnp.float32)],
        compiler_params=pltpu.CompilerParams(dimension_semantics=("parallel",)),
    )(wcat, bconv, bns, bnb, x)

    # --- Kernel B: matrix_rep + LC, tiled over (i, j, batch) -----------------
    Lp, ti, tj = _tiling(L, d)
    if Lp != L:
        emb_p = jnp.pad(emb, ((0, 0), (0, 0), (0, Lp - L)))
        lcw_p = jnp.pad(lc_sym, ((0, 0), (0, Lp - L), (0, Lp - L)))
    else:
        emb_p, lcw_p = emb, lc_sym
    embT_p = jnp.transpose(emb_p, (0, 2, 1))               # (B, Lp, d), tiny
    nti, ntj = Lp // ti, Lp // tj

    # Batch is the innermost ("arbitrary") axis and the weight index_map is
    # b-independent, so each (2d, ti, tj) weight tile stays VMEM-resident and
    # is re-used across the whole batch.
    # (Further option, not taken: compute only j >= i tiles + mirror pass.)
    contact = pl.pallas_call(
        functools.partial(_lc_kernel, d=d, ti=ti, tj=tj),
        out_shape=jax.ShapeDtypeStruct((B, Lp, Lp), jnp.float32),
        grid=(nti, ntj, B),
        in_specs=[
            pl.BlockSpec((1, ti, d), lambda i, j, b: (b, i, 0)),       # emb rows
            pl.BlockSpec((1, d, tj), lambda i, j, b: (b, 0, j)),       # emb cols
            pl.BlockSpec((2 * d, ti, tj), lambda i, j, b: (0, i, j)),  # LC weight
        ],
        out_specs=pl.BlockSpec((1, ti, tj), lambda i, j, b: (b, i, j)),
        compiler_params=pltpu.CompilerParams(
            dimension_semantics=("parallel", "parallel", "arbitrary")),
    )(embT_p, emb_p, lcw_p)

    if Lp != L:
        contact = contact[:, :L, :L]
    return contact


# ----------------------------------------------------------------------------
# Synthetic deterministic parameters (PyTorch-style inits, BN folded to affine)
# ----------------------------------------------------------------------------
def init_params(key, d, L):
    assert d >= 4, "d must be >= 4 (first conv has 4 input channels)"
    keys = jax.random.split(key, 32)
    it = iter(keys)

    def uniform(k, shape, fan_in):
        bound = 1.0 / math.sqrt(fan_in)
        return jax.random.uniform(k, shape, jnp.float32, -bound, bound)

    conv_ws, conv_bs = [], []
    w0 = uniform(next(it), (d, 4, 9), 4 * 9)                 # conv1d1 (4 -> d)
    conv_ws.append(jnp.pad(w0, ((0, 0), (0, d - 4), (0, 0))))
    conv_bs.append(uniform(next(it), (d,), 4 * 9))
    for _ in range(9):                                       # conv1d2 + 8 resnet convs
        conv_ws.append(uniform(next(it), (d, d, 9), d * 9))
        conv_bs.append(uniform(next(it), (d,), d * 9))
    conv_w = jnp.stack(conv_ws)                              # (10, d, d, 9)
    conv_b = jnp.stack(conv_bs)                              # (10, d)

    gamma = 1.0 + 0.1 * jax.random.normal(next(it), (10, d), jnp.float32)
    beta = 0.1 * jax.random.normal(next(it), (10, d), jnp.float32)
    mean = 0.1 * jax.random.normal(next(it), (10, d), jnp.float32)
    var = (1.0 + 0.1 * jax.random.normal(next(it), (10, d), jnp.float32)) ** 2
    scale = gamma * jax.lax.rsqrt(var + 1e-5)
    shift = beta - mean * scale

    lc_w = jax.random.normal(next(it), (2 * d, L, L), jnp.float32)  # torch.randn
    return dict(conv_w=conv_w, conv_b=conv_b, bn_scale=scale, bn_shift=shift,
                lc_w=lc_w)


# ----------------------------------------------------------------------------
# Pure-JAX reference (mirrors the PyTorch forward, BN in inference form)
# ----------------------------------------------------------------------------
def contact_network_test_ref(seq, params, *, d, L):
    conv_w, conv_b = params["conv_w"], params["conv_b"]
    bn_s, bn_b = params["bn_scale"], params["bn_shift"]
    lc_w = params["lc_w"]

    x = jnp.transpose(seq, (0, 2, 1))
    x = jnp.pad(x, ((0, 0), (0, d - 4), (0, 0)))

    def conv(i, h):
        y = jax.lax.conv_general_dilated(
            h, conv_w[i], window_strides=(1,), padding=[(8, 8)],
            rhs_dilation=(2,), dimension_numbers=("NCH", "OIH", "NCH"),
            precision=jax.lax.Precision.HIGHEST)
        return y + conv_b[i][None, :, None]

    def bn(i, h):
        return h * bn_s[i][None, :, None] + bn_b[i][None, :, None]

    y = jax.nn.relu(bn(0, conv(0, x)))
    y = jax.nn.relu(bn(1, conv(1, y)))
    for blk in range(4):
        h = jax.nn.relu(bn(2 + 2 * blk, y))
        h = conv(2 + 2 * blk, h)
        h = jax.nn.relu(bn(3 + 2 * blk, h))
        h = conv(3 + 2 * blk, h)
        y = y + h
    emb = y                                                  # (B, d, L)

    idx = jnp.arange(L)
    mn = jnp.minimum(idx[:, None], idx[None, :])
    mx = jnp.maximum(idx[:, None], idx[None, :])
    feat = jnp.concatenate([emb[:, :, mn], emb[:, :, mx]], axis=1)  # (B, 2d, L, L)
    contact = jnp.sum(feat * lc_w[None], axis=1)
    return 0.5 * (contact + jnp.swapaxes(contact, -1, -2))


if __name__ == "__main__":
    key = jax.random.PRNGKey(0)
    B, d, L = 2, 8, 16
    kseq, kparam = jax.random.split(key)

    # sequence encoding (B, L, 4), plus the unused prior / state inputs.
    seq = jax.nn.softmax(jax.random.normal(kseq, (B, L, 4), jnp.float32) * 2.0, -1)
    prior = jnp.zeros((B, L, L, 1), jnp.float32)
    state = jnp.zeros((B, L, L), jnp.int32)
    params = init_params(kparam, d, L)

    out = contact_network_test_forward(prior, seq, state, params, d=d, L=L)
    jax.block_until_ready(out)
    assert out.shape == (B, L, L)

    ref = contact_network_test_ref(seq, params, d=d, L=L)
    err = float(jnp.max(jnp.abs(out - ref)))
    assert jnp.allclose(out, ref, atol=1e-3, rtol=1e-3), err

    print("KERNEL_OK")
</pallas_src>

<mosaic_0001>
module attributes {stable_mosaic.version = 11 : i64} {
  func.func @_encoder_kernel(%arg0: i32, %arg1: memref<10x8x72xf32, #tpu.memory_space<vmem>>, %arg2: memref<10x8x1xf32, #tpu.memory_space<vmem>>, %arg3: memref<10x8x1xf32, #tpu.memory_space<vmem>>, %arg4: memref<10x8x1xf32, #tpu.memory_space<vmem>>, %arg5: memref<1x8x16xf32, #tpu.memory_space<vmem>>, %arg6: memref<1x8x16xf32, #tpu.memory_space<vmem>>, %arg7: memref<8x32xf32, #tpu.memory_space<vmem>>, %arg8: memref<72x16xf32, #tpu.memory_space<vmem>>) attributes {dimension_semantics = [#tpu.dimension_semantics<parallel>], iteration_bounds = array<i64: 2>, scalar_prefetch = 0 : i64, scratch_operands = 2 : i64, tpu.core_type = #tpu.core_type<tc>, window_params = [{pipeline_mode = #tpu.pipeline_mode<synchronous>, transform_indices = @transform_0, window_bounds = array<i64: 10, 8, 72>}, {pipeline_mode = #tpu.pipeline_mode<synchronous>, transform_indices = @transform_1, window_bounds = array<i64: 10, 8, 1>}, {pipeline_mode = #tpu.pipeline_mode<synchronous>, transform_indices = @transform_2, window_bounds = array<i64: 10, 8, 1>}, {pipeline_mode = #tpu.pipeline_mode<synchronous>, transform_indices = @transform_3, window_bounds = array<i64: 10, 8, 1>}, {transform_indices = @transform_4, window_bounds = array<i64: 1, 8, 16>}, {transform_indices = @transform_5, window_bounds = array<i64: 1, 8, 16>}]} {
    %cst = arith.constant 0.000000e+00 : f32
    %0 = vector.broadcast %cst : f32 to vector<8x32xf32>
    %c0 = arith.constant 0 : index
    %c0_0 = arith.constant 0 : index
    %1 = vector.load %arg7[%c0, %c0_0] : memref<8x32xf32, #tpu.memory_space<vmem>>, vector<8x32xf32>
    tpu.vector_store %arg7[%c0, %c0_0], %0 {strides = array<i32>} : memref<8x32xf32, #tpu.memory_space<vmem>>, vector<8x32xf32>,
    %c0_1 = arith.constant 0 : index
    %c0_2 = arith.constant 0 : index
    %c0_3 = arith.constant 0 : index
    %2 = vector.load %arg5[%c0_1, %c0_2, %c0_3] : memref<1x8x16xf32, #tpu.memory_space<vmem>>, vector<1x8x16xf32>
    %3 = vector.shape_cast %2 : vector<1x8x16xf32> to vector<8x16xf32>
    %c0_4 = arith.constant 0 : index
    %c8 = arith.constant 8 : index
    %4 = vector.load %arg7[%c0_4, %c8] : memref<8x32xf32, #tpu.memory_space<vmem>>, vector<8x16xf32>
    tpu.vector_store %arg7[%c0_4, %c8], %3 {strides = array<i32>} : memref<8x32xf32, #tpu.memory_space<vmem>>, vector<8x16xf32>,
    %c0_5 = arith.constant 0 : index
    %c0_6 = arith.constant 0 : index
    %5 = vector.load %arg7[%c0_5, %c0_6] : memref<8x32xf32, #tpu.memory_space<vmem>>, vector<8x16xf32>
    %c0_7 = arith.constant 0 : index
    %c0_8 = arith.constant 0 : index
    %6 = vector.load %arg8[%c0_7, %c0_8] : memref<72x16xf32, #tpu.memory_space<vmem>>, vector<8x16xf32>
    tpu.vector_store %arg8[%c0_7, %c0_8], %5 {strides = array<i32>} : memref<72x16xf32, #tpu.memory_space<vmem>>, vector<8x16xf32>,
    %c0_9 = arith.constant 0 : index
    %c2 = arith.constant 2 : index
    %7 = vector.load %arg7[%c0_9, %c2] : memref<8x32xf32, #tpu.memory_space<vmem>>, vector<8x16xf32>
    %c8_10 = arith.constant 8 : index
    %c0_11 = arith.constant 0 : index
    %8 = vector.load %arg8[%c8_10, %c0_11] : memref<72x16xf32, #tpu.memory_space<vmem>>, vector<8x16xf32>
    tpu.vector_store %arg8[%c8_10, %c0_11], %7 {strides = array<i32>} : memref<72x16xf32, #tpu.memory_space<vmem>>, vector<8x16xf32>,
    %c0_12 = arith.constant 0 : index
    %c4 = arith.constant 4 : index
    %9 = vector.load %arg7[%c0_12, %c4] : memref<8x32xf32, #tpu.memory_space<vmem>>, vector<8x16xf32>
    %c16 = arith.constant 16 : index
    %c0_13 = arith.constant 0 : index
    %10 = vector.load %arg8[%c16, %c0_13] : memref<72x16xf32, #tpu.memory_space<vmem>>, vector<8x16xf32>
    tpu.vector_store %arg8[%c16, %c0_13], %9 {strides = array<i32>} : memref<72x16xf32, #tpu.memory_space<vmem>>, vector<8x16xf32>,
    %c0_14 = arith.constant 0 : index
    %c6 = arith.constant 6 : index
    %11 = vector.load %arg7[%c0_14, %c6] : memref<8x32xf32, #tpu.memory_space<vmem>>, vector<8x16xf32>
    %c24 = arith.constant 24 : index
    %c0_15 = arith.constant 0 : index
    %12 = vector.load %arg8[%c24, %c0_15] : memref<72x16xf32, #tpu.memory_space<vmem>>, vector<8x16xf32>
    tpu.vector_store %arg8[%c24, %c0_15], %11 {strides = array<i32>} : memref<72x16xf32, #tpu.memory_space<vmem>>, vector<8x16xf32>,
    %c0_16 = arith.constant 0 : index
    %c8_17 = arith.constant 8 : index
    %13 = vector.load %arg7[%c0_16, %c8_17] : memref<8x32xf32, #tpu.memory_space<vmem>>, vector<8x16xf32>
    %c32 = arith.constant 32 : index
    %c0_18 = arith.constant 0 : index
    %14 = vector.load %arg8[%c32, %c0_18] : memref<72x16xf32, #tpu.memory_space<vmem>>, vector<8x16xf32>
    tpu.vector_store %arg8[%c32, %c0_18], %13 {strides = array<i32>} : memref<72x16xf32, #tpu.memory_space<vmem>>, vector<8x16xf32>,
    %c0_19 = arith.constant 0 : index
    %c10 = arith.constant 10 : index
    %15 = vector.load %arg7[%c0_19, %c10] : memref<8x32xf32, #tpu.memory_space<vmem>>, vector<8x16xf32>
    %c40 = arith.constant 40 : index
    %c0_20 = arith.constant 0 : index
    %16 = vector.load %arg8[%c40, %c0_20] : memref<72x16xf32, #tpu.memory_space<vmem>>, vector<8x16xf32>
    tpu.vector_store %arg8[%c40, %c0_20], %15 {strides = array<i32>} : memref<72x16xf32, #tpu.memory_space<vmem>>, vector<8x16xf32>,
    %c0_21 = arith.constant 0 : index
    %c12 = arith.constant 12 : index
    %17 = vector.load %arg7[%c0_21, %c12] : memref<8x32xf32, #tpu.memory_space<vmem>>, vector<8x16xf32>
    %c48 = arith.constant 48 : index
    %c0_22 = arith.constant 0 : index
    %18 = vector.load %arg8[%c48, %c0_22] : memref<72x16xf32, #tpu.memory_space<vmem>>, vector<8x16xf32>
    tpu.vector_store %arg8[%c48, %c0_22], %17 {strides = array<i32>} : memref<72x16xf32, #tpu.memory_space<vmem>>, vector<8x16xf32>,
    %c0_23 = arith.constant 0 : index
    %c14 = arith.constant 14 : index
    %19 = vector.load %arg7[%c0_23, %c14] : memref<8x32xf32, #tpu.memory_space<vmem>>, vector<8x16xf32>
    %c56 = arith.constant 56 : index
    %c0_24 = arith.constant 0 : index
    %20 = vector.load %arg8[%c56, %c0_24] : memref<72x16xf32, #tpu.memory_space<vmem>>, vector<8x16xf32>
    tpu.vector_store %arg8[%c56, %c0_24], %19 {strides = array<i32>} : memref<72x16xf32, #tpu.memory_space<vmem>>, vector<8x16xf32>,
    %c0_25 = arith.constant 0 : index
    %c16_26 = arith.constant 16 : index
    %21 = vector.load %arg7[%c0_25, %c16_26] : memref<8x32xf32, #tpu.memory_space<vmem>>, vector<8x16xf32>
    %c64 = arith.constant 64 : index
    %c0_27 = arith.constant 0 : index
    %22 = vector.load %arg8[%c64, %c0_27] : memref<72x16xf32, #tpu.memory_space<vmem>>, vector<8x16xf32>
    tpu.vector_store %arg8[%c64, %c0_27], %21 {strides = array<i32>} : memref<72x16xf32, #tpu.memory_space<vmem>>, vector<8x16xf32>,
    %c0_28 = arith.constant 0 : index
    %c0_29 = arith.constant 0 : index
    %c0_30 = arith.constant 0 : index
    %23 = vector.load %arg1[%c0_28, %c0_29, %c0_30] : memref<10x8x72xf32, #tpu.memory_space<vmem>>, vector<1x8x72xf32>
    %24 = vector.shape_cast %23 : vector<1x8x72xf32> to vector<8x72xf32>
    %c0_31 = arith.constant 0 : index
    %c0_32 = arith.constant 0 : index
    %25 = vector.load %arg8[%c0_31, %c0_32] : memref<72x16xf32, #tpu.memory_space<vmem>>, vector<72x16xf32>
    %cst_33 = arith.constant dense<0.000000e+00> : vector<8x16xf32>
    %26 = tpu.matmul %24, %25, %cst_33 {dimension_numbers = #tpu.dot_dimension_numbers<[1], [0], [0], [1], [0, 0, 1, 1], [], []>, precision = #tpu.contract_precision<fp32>} : vector<8x72xf32>, vector<72x16xf32>, vector<8x16xf32> -> vector<8x16xf32>
    %c0_34 = arith.constant 0 : index
    %c0_35 = arith.constant 0 : index
    %c0_36 = arith.constant 0 : index
    %27 = vector.load %arg2[%c0_34, %c0_35, %c0_36] : memref<10x8x1xf32, #tpu.memory_space<vmem>>, vector<1x8x1xf32>
    %28 = vector.shape_cast %27 : vector<1x8x1xf32> to vector<8x1xf32>
    %29 = vector.broadcast %28 : vector<8x1xf32> to vector<8x16xf32>
    %30 = arith.addf %26, %29 : vector<8x16xf32>
    %c0_37 = arith.constant 0 : index
    %c0_38 = arith.constant 0 : index
    %c0_39 = arith.constant 0 : index
    %31 = vector.load %arg3[%c0_37, %c0_38, %c0_39] : memref<10x8x1xf32, #tpu.memory_space<vmem>>, vector<1x8x1xf32>
    %32 = vector.shape_cast %31 : vector<1x8x1xf32> to vector<8x1xf32>
    %33 = vector.broadcast %32 : vector<8x1xf32> to vector<8x16xf32>
    %34 = arith.mulf %30, %33 : vector<8x16xf32>
    %c0_40 = arith.constant 0 : index
    %c0_41 = arith.constant 0 : index
    %c0_42 = arith.constant 0 : index
    %35 = vector.load %arg4[%c0_40, %c0_41, %c0_42] : memref<10x8x1xf32, #tpu.memory_space<vmem>>, vector<1x8x1xf32>
    %36 = vector.shape_cast %35 : vector<1x8x1xf32> to vector<8x1xf32>
    %37 = vector.broadcast %36 : vector<8x1xf32> to vector<8x16xf32>
    %38 = arith.addf %34, %37 : vector<8x16xf32>
    %cst_43 = arith.constant 0.000000e+00 : f32
    %39 = vector.broadcast %cst_43 : f32 to vector<8x16xf32>
    %40 = arith.maximumf %38, %39 : vector<8x16xf32>
    %c0_44 = arith.constant 0 : index
    %c8_45 = arith.constant 8 : index
    %41 = vector.load %arg7[%c0_44, %c8_45] : memref<8x32xf32, #tpu.memory_space<vmem>>, vector<8x16xf32>
    tpu.vector_store %arg7[%c0_44, %c8_45], %40 {strides = array<i32>} : memref<8x32xf32, #tpu.memory_space<vmem>>, vector<8x16xf32>,
    %c0_46 = arith.constant 0 : index
    %c0_47 = arith.constant 0 : index
    %42 = vector.load %arg7[%c0_46, %c0_47] : memref<8x32xf32, #tpu.memory_space<vmem>>, vector<8x16xf32>
    %c0_48 = arith.constant 0 : index
    %c0_49 = arith.constant 0 : index
    %43 = vector.load %arg8[%c0_48, %c0_49] : memref<72x16xf32, #tpu.memory_space<vmem>>, vector<8x16xf32>
    tpu.vector_store %arg8[%c0_48, %c0_49], %42 {strides = array<i32>} : memref<72x16xf32, #tpu.memory_space<vmem>>, vector<8x16xf32>,
    %c0_50 = arith.constant 0 : index
    %c2_51 = arith.constant 2 : index
    %44 = vector.load %arg7[%c0_50, %c2_51] : memref<8x32xf32, #tpu.memory_space<vmem>>, vector<8x16xf32>
    %c8_52 = arith.constant 8 : index
    %c0_53 = arith.constant 0 : index
    %45 = vector.load %arg8[%c8_52, %c0_53] : memref<72x16xf32, #tpu.memory_space<vmem>>, vector<8x16xf32>
    tpu.vector_store %arg8[%c8_52, %c0_53], %44 {strides = array<i32>} : memref<72x16xf32, #tpu.memory_space<vmem>>, vector<8x16xf32>,
    %c0_54 = arith.constant 0 : index
    %c4_55 = arith.constant 4 : index
    %46 = vector.load %arg7[%c0_54, %c4_55] : memref<8x32xf32, #tpu.memory_space<vmem>>, vector<8x16xf32>
    %c16_56 = arith.constant 16 : index
    %c0_57 = arith.constant 0 : index
    %47 = vector.load %arg8[%c16_56, %c0_57] : memref<72x16xf32, #tpu.memory_space<vmem>>, vector<8x16xf32>
    tpu.vector_store %arg8[%c16_56, %c0_57], %46 {strides = array<i32>} : memref<72x16xf32, #tpu.memory_space<vmem>>, vector<8x16xf32>,
    %c0_58 = arith.constant 0 : index
    %c6_59 = arith.constant 6 : index
    %48 = vector.load %arg7[%c0_58, %c6_59] : memref<8x32xf32, #tpu.memory_space<vmem>>, vector<8x16xf32>
    %c24_60 = arith.constant 24 : index
    %c0_61 = arith.constant 0 : index
    %49 = vector.load %arg8[%c24_60, %c0_61] : memref<72x16xf32, #tpu.memory_space<vmem>>, vector<8x16xf32>
    tpu.vector_store %arg8[%c24_60, %c0_61], %48 {strides = array<i32>} : memref<72x16xf32, #tpu.memory_space<vmem>>, vector<8x16xf32>,
    %c0_62 = arith.constant 0 : index
    %c8_63 = arith.constant 8 : index
    %50 = vector.load %arg7[%c0_62, %c8_63] : memref<8x32xf32, #tpu.memory_space<vmem>>, vector<8x16xf32>
    %c32_64 = arith.constant 32 : index
    %c0_65 = arith.constant 0 : index
    %51 = vector.load %arg8[%c32_64, %c0_65] : memref<72x16xf32, #tpu.memory_space<vmem>>, vector<8x16xf32>
    tpu.vector_store %arg8[%c32_64, %c0_65], %50 {strides = array<i32>} : memref<72x16xf32, #tpu.memory_space<vmem>>, vector<8x16xf32>,
    %c0_66 = arith.constant 0 : index
    %c10_67 = arith.constant 10 : index
    %52 = vector.load %arg7[%c0_66, %c10_67] : memref<8x32xf32, #tpu.memory_space<vmem>>, vector<8x16xf32>
    %c40_68 = arith.constant 40 : index
    %c0_69 = arith.constant 0 : index
    %53 = vector.load %arg8[%c40_68, %c0_69] : memref<72x16xf32, #tpu.memory_space<vmem>>, vector<8x16xf32>
    tpu.vector_store %arg8[%c40_68, %c0_69], %52 {strides = array<i32>} : memref<72x16xf32, #tpu.memory_space<vmem>>, vector<8x16xf32>,
    %c0_70 = arith.constant 0 : index
    %c12_71 = arith.constant 12 : index
    %54 = vector.load %arg7[%c0_70, %c12_71] : memref<8x32xf32, #tpu.memory_space<vmem>>, vector<8x16xf32>
    %c48_72 = arith.constant 48 : index
    %c0_73 = arith.constant 0 : index
    %55 = vector.load %arg8[%c48_72, %c0_73] : memref<72x16xf32, #tpu.memory_space<vmem>>, vector<8x16xf32>
    tpu.vector_store %arg8[%c48_72, %c0_73], %54 {strides = array<i32>} : memref<72x16xf32, #tpu.memory_space<vmem>>, vector<8x16xf32>,
    %c0_74 = arith.constant 0 : index
    %c14_75 = arith.constant 14 : index
    %56 = vector.load %arg7[%c0_74, %c14_75] : memref<8x32xf32, #tpu.memory_space<vmem>>, vector<8x16xf32>
    %c56_76 = arith.constant 56 : index
    %c0_77 = arith.constant 0 : index
    %57 = vector.load %arg8[%c56_76, %c0_77] : memref<72x16xf32, #tpu.memory_space<vmem>>, vector<8x16xf32>
    tpu.vector_store %arg8[%c56_76, %c0_77], %56 {strides = array<i32>} : memref<72x16xf32, #tpu.memory_space<vmem>>, vector<8x16xf32>,
    %c0_78 = arith.constant 0 : index
    %c16_79 = arith.constant 16 : index
    %58 = vector.load %arg7[%c0_78, %c16_79] : memref<8x32xf32, #tpu.memory_space<vmem>>, vector<8x16xf32>
    %c64_80 = arith.constant 64 : index
    %c0_81 = arith.constant 0 : index
    %59 = vector.load %arg8[%c64_80, %c0_81] : memref<72x16xf32, #tpu.memory_space<vmem>>, vector<8x16xf32>
    tpu.vector_store %arg8[%c64_80, %c0_81], %58 {strides = array<i32>} : memref<72x16xf32, #tpu.memory_space<vmem>>, vector<8x16xf32>,
    %c1 = arith.constant 1 : index
    %c0_82 = arith.constant 0 : index
    %c0_83 = arith.constant 0 : index
    %60 = vector.load %arg1[%c1, %c0_82, %c0_83] : memref<10x8x72xf32, #tpu.memory_space<vmem>>, vector<1x8x72xf32>
    %61 = vector.shape_cast %60 : vector<1x8x72xf32> to vector<8x72xf32>
    %c0_84 = arith.constant 0 : index
    %c0_85 = arith.constant 0 : index
    %62 = vector.load %arg8[%c0_84, %c0_85] : memref<72x16xf32, #tpu.memory_space<vmem>>, vector<72x16xf32>
    %cst_86 = arith.constant dense<0.000000e+00> : vector<8x16xf32>
    %63 = tpu.matmul %61, %62, %cst_86 {dimension_numbers = #tpu.dot_dimension_numbers<[1], [0], [0], [1], [0, 0, 1, 1], [], []>, precision = #tpu.contract_precision<fp32>} : vector<8x72xf32>, vector<72x16xf32>, vector<8x16xf32> -> vector<8x16xf32>
    %c1_87 = arith.constant 1 : index
    %c0_88 = arith.constant 0 : index
    %c0_89 = arith.constant 0 : index
    %64 = vector.load %arg2[%c1_87, %c0_88, %c0_89] : memref<10x8x1xf32, #tpu.memory_space<vmem>>, vector<1x8x1xf32>
    %65 = vector.shape_cast %64 : vector<1x8x1xf32> to vector<8x1xf32>
    %66 = vector.broadcast %65 : vector<8x1xf32> to vector<8x16xf32>
    %67 = arith.addf %63, %66 : vector<8x16xf32>
    %c1_90 = arith.constant 1 : index
    %c0_91 = arith.constant 0 : index
    %c0_92 = arith.constant 0 : index
    %68 = vector.load %arg3[%c1_90, %c0_91, %c0_92] : memref<10x8x1xf32, #tpu.memory_space<vmem>>, vector<1x8x1xf32>
    %69 = vector.shape_cast %68 : vector<1x8x1xf32> to vector<8x1xf32>
    %70 = vector.broadcast %69 : vector<8x1xf32> to vector<8x16xf32>
    %71 = arith.mulf %67, %70 : vector<8x16xf32>
    %c1_93 = arith.constant 1 : index
    %c0_94 = arith.constant 0 : index
    %c0_95 = arith.constant 0 : index
    %72 = vector.load %arg4[%c1_93, %c0_94, %c0_95] : memref<10x8x1xf32, #tpu.memory_space<vmem>>, vector<1x8x1xf32>
    %73 = vector.shape_cast %72 : vector<1x8x1xf32> to vector<8x1xf32>
    %74 = vector.broadcast %73 : vector<8x1xf32> to vector<8x16xf32>
    %75 = arith.addf %71, %74 : vector<8x16xf32>
    %cst_96 = arith.constant 0.000000e+00 : f32
    %76 = vector.broadcast %cst_96 : f32 to vector<8x16xf32>
    %77 = arith.maximumf %75, %76 : vector<8x16xf32>
    %c2_97 = arith.constant 2 : index
    %c0_98 = arith.constant 0 : index
    %c0_99 = arith.constant 0 : index
    %78 = vector.load %arg3[%c2_97, %c0_98, %c0_99] : memref<10x8x1xf32, #tpu.memory_space<vmem>>, vector<1x8x1xf32>
    %79 = vector.shape_cast %78 : vector<1x8x1xf32> to vector<8x1xf32>
    %80 = vector.broadcast %79 : vector<8x1xf32> to vector<8x16xf32>
    %81 = arith.mulf %77, %80 : vector<8x16xf32>
    %c2_100 = arith.constant 2 : index
    %c0_101 = arith.constant 0 : index
    %c0_102 = arith.constant 0 : index
    %82 = vector.load %arg4[%c2_100, %c0_101, %c0_102] : memref<10x8x1xf32, #tpu.memory_space<vmem>>, vector<1x8x1xf32>
    %83 = vector.shape_cast %82 : vector<1x8x1xf32> to vector<8x1xf32>
    %84 = vector.broadcast %83 : vector<8x1xf32> to vector<8x16xf32>
    %85 = arith.addf %81, %84 : vector<8x16xf32>
    %cst_103 = arith.constant 0.000000e+00 : f32
    %86 = vector.broadcast %cst_103 : f32 to vector<8x16xf32>
    %87 = arith.maximumf %85, %86 : vector<8x16xf32>
    %c0_104 = arith.constant 0 : index
    %c8_105 = arith.constant 8 : index
    %88 = vector.load %arg7[%c0_104, %c8_105] : memref<8x32xf32, #tpu.memory_space<vmem>>, vector<8x16xf32>
    tpu.vector_store %arg7[%c0_104, %c8_105], %87 {strides = array<i32>} : memref<8x32xf32, #tpu.memory_space<vmem>>, vector<8x16xf32>,
    %c0_106 = arith.constant 0 : index
    %c0_107 = arith.constant 0 : index
    %89 = vector.load %arg7[%c0_106, %c0_107] : memref<8x32xf32, #tpu.memory_space<vmem>>, vector<8x16xf32>
    %c0_108 = arith.constant 0 : index
    %c0_109 = arith.constant 0 : index
    %90 = vector.load %arg8[%c0_108, %c0_109] : memref<72x16xf32, #tpu.memory_space<vmem>>, vector<8x16xf32>
    tpu.vector_store %arg8[%c0_108, %c0_109], %89 {strides = array<i32>} : memref<72x16xf32, #tpu.memory_space<vmem>>, vector<8x16xf32>,
    %c0_110 = arith.constant 0 : index
    %c2_111 = arith.constant 2 : index
    %91 = vector.load %arg7[%c0_110, %c2_111] : memref<8x32xf32, #tpu.memory_space<vmem>>, vector<8x16xf32>
    %c8_112 = arith.constant 8 : index
    %c0_113 = arith.constant 0 : index
    %92 = vector.load %arg8[%c8_112, %c0_113] : memref<72x16xf32, #tpu.memory_space<vmem>>, vector<8x16xf32>
    tpu.vector_store %arg8[%c8_112, %c0_113], %91 {strides = array<i32>} : memref<72x16xf32, #tpu.memory_space<vmem>>, vector<8x16xf32>,
    %c0_114 = arith.constant 0 : index
    %c4_115 = arith.constant 4 : index
    %93 = vector.load %arg7[%c0_114, %c4_115] : memref<8x32xf32, #tpu.memory_space<vmem>>, vector<8x16xf32>
    %c16_116 = arith.constant 16 : index
    %c0_117 = arith.constant 0 : index
    %94 = vector.load %arg8[%c16_116, %c0_117] : memref<72x16xf32, #tpu.memory_space<vmem>>, vector<8x16xf32>
    tpu.vector_store %arg8[%c16_116, %c0_117], %93 {strides = array<i32>} : memref<72x16xf32, #tpu.memory_space<vmem>>, vector<8x16xf32>,
    %c0_118 = arith.constant 0 : index
    %c6_119 = arith.constant 6 : index
    %95 = vector.load %arg7[%c0_118, %c6_119] : memref<8x32xf32, #tpu.memory_space<vmem>>, vector<8x16xf32>
    %c24_120 = arith.constant 24 : index
    %c0_121 = arith.constant 0 : index
    %96 = vector.load %arg8[%c24_120, %c0_121] : memref<72x16xf32, #tpu.memory_space<vmem>>, vector<8x16xf32>
    tpu.vector_store %arg8[%c24_120, %c0_121], %95 {strides = array<i32>} : memref<72x16xf32, #tpu.memory_space<vmem>>, vector<8x16xf32>,
    %c0_122 = arith.constant 0 : index
    %c8_123 = arith.constant 8 : index
    %97 = vector.load %arg7[%c0_122, %c8_123] : memref<8x32xf32, #tpu.memory_space<vmem>>, vector<8x16xf32>
    %c32_124 = arith.constant 32 : index
    %c0_125 = arith.constant 0 : index
    %98 = vector.load %arg8[%c32_124, %c0_125] : memref<72x16xf32, #tpu.memory_space<vmem>>, vector<8x16xf32>
    tpu.vector_store %arg8[%c32_124, %c0_125], %97 {strides = array<i32>} : memref<72x16xf32, #tpu.memory_space<vmem>>, vector<8x16xf32>,
    %c0_126 = arith.constant 0 : index
    %c10_127 = arith.constant 10 : index
    %99 = vector.load %arg7[%c0_126, %c10_127] : memref<8x32xf32, #tpu.memory_space<vmem>>, vector<8x16xf32>
    %c40_128 = arith.constant 40 : index
    %c0_129 = arith.constant 0 : index
    %100 = vector.load %arg8[%c40_128, %c0_129] : memref<72x16xf32, #tpu.memory_space<vmem>>, vector<8x16xf32>
    tpu.vector_store %arg8[%c40_128, %c0_129], %99 {strides = array<i32>} : memref<72x16xf32, #tpu.memory_space<vmem>>, vector<8x16xf32>,
    %c0_130 = arith.constant 0 : index
    %c12_131 = arith.constant 12 : index
    %101 = vector.load %arg7[%c0_130, %c12_131] : memref<8x32xf32, #tpu.memory_space<vmem>>, vector<8x16xf32>
    %c48_132 = arith.constant 48 : index
    %c0_133 = arith.constant 0 : index
    %102 = vector.load %arg8[%c48_132, %c0_133] : memref<72x16xf32, #tpu.memory_space<vmem>>, vector<8x16xf32>
    tpu.vector_store %arg8[%c48_132, %c0_133], %101 {strides = array<i32>} : memref<72x16xf32, #tpu.memory_space<vmem>>, vector<8x16xf32>,
    %c0_134 = arith.constant 0 : index
    %c14_135 = arith.constant 14 : index
    %103 = vector.load %arg7[%c0_134, %c14_135] : memref<8x32xf32, #tpu.memory_space<vmem>>, vector<8x16xf32>
    %c56_136 = arith.constant 56 : index
    %c0_137 = arith.constant 0 : index
    %104 = vector.load %arg8[%c56_136, %c0_137] : memref<72x16xf32, #tpu.memory_space<vmem>>, vector<8x16xf32>
    tpu.vector_store %arg8[%c56_136, %c0_137], %103 {strides = array<i32>} : memref<72x16xf32, #tpu.memory_space<vmem>>, vector<8x16xf32>,
    %c0_138 = arith.constant 0 : index
    %c16_139 = arith.constant 16 : index
    %105 = vector.load %arg7[%c0_138, %c16_139] : memref<8x32xf32, #tpu.memory_space<vmem>>, vector<8x16xf32>
    %c64_140 = arith.constant 64 : index
    %c0_141 = arith.constant 0 : index
    %106 = vector.load %arg8[%c64_140, %c0_141] : memref<72x16xf32, #tpu.memory_space<vmem>>, vector<8x16xf32>
    tpu.vector_store %arg8[%c64_140, %c0_141], %105 {strides = array<i32>} : memref<72x16xf32, #tpu.memory_space<vmem>>, vector<8x16xf32>,
    %c2_142 = arith.constant 2 : index
    %c0_143 = arith.constant 0 : index
    %c0_144 = arith.constant 0 : index
    %107 = vector.load %arg1[%c2_142, %c0_143, %c0_144] : memref<10x8x72xf32, #tpu.memory_space<vmem>>, vector<1x8x72xf32>
    %108 = vector.shape_cast %107 : vector<1x8x72xf32> to vector<8x72xf32>
    %c0_145 = arith.constant 0 : index
    %c0_146 = arith.constant 0 : index
    %109 = vector.load %arg8[%c0_145, %c0_146] : memref<72x16xf32, #tpu.memory_space<vmem>>, vector<72x16xf32>
    %cst_147 = arith.constant dense<0.000000e+00> : vector<8x16xf32>
    %110 = tpu.matmul %108, %109, %cst_147 {dimension_numbers = #tpu.dot_dimension_numbers<[1], [0], [0], [1], [0, 0, 1, 1], [], []>, precision = #tpu.contract_precision<fp32>} : vector<8x72xf32>, vector<72x16xf32>, vector<8x16xf32> -> vector<8x16xf32>
    %c2_148 = arith.constant 2 : index
    %c0_149 = arith.constant 0 : index
    %c0_150 = arith.constant 0 : index
    %111 = vector.load %arg2[%c2_148, %c0_149, %c0_150] : memref<10x8x1xf32, #tpu.memory_space<vmem>>, vector<1x8x1xf32>
    %112 = vector.shape_cast %111 : vector<1x8x1xf32> to vector<8x1xf32>
    %113 = vector.broadcast %112 : vector<8x1xf32> to vector<8x16xf32>
    %114 = arith.addf %110, %113 : vector<8x16xf32>
    %c3 = arith.constant 3 : index
    %c0_151 = arith.constant 0 : index
    %c0_152 = arith.constant 0 : index
    %115 = vector.load %arg3[%c3, %c0_151, %c0_152] : memref<10x8x1xf32, #tpu.memory_space<vmem>>, vector<1x8x1xf32>
    %116 = vector.shape_cast %115 : vector<1x8x1xf32> to vector<8x1xf32>
    %117 = vector.broadcast %116 : vector<8x1xf32> to vector<8x16xf32>
    %118 = arith.mulf %114, %117 : vector<8x16xf32>
    %c3_153 = arith.constant 3 : index
    %c0_154 = arith.constant 0 : index
    %c0_155 = arith.constant 0 : index
    %119 = vector.load %arg4[%c3_153, %c0_154, %c0_155] : memref<10x8x1xf32, #tpu.memory_space<vmem>>, vector<1x8x1xf32>
    %120 = vector.shape_cast %119 : vector<1x8x1xf32> to vector<8x1xf32>
    %121 = vector.broadcast %120 : vector<8x1xf32> to vector<8x16xf32>
    %122 = arith.addf %118, %121 : vector<8x16xf32>
    %cst_156 = arith.constant 0.000000e+00 : f32
    %123 = vector.broadcast %cst_156 : f32 to vector<8x16xf32>
    %124 = arith.maximumf %122, %123 : vector<8x16xf32>
    %c0_157 = arith.constant 0 : index
    %c8_158 = arith.constant 8 : index
    %125 = vector.load %arg7[%c0_157, %c8_158] : memref<8x32xf32, #tpu.memory_space<vmem>>, vector<8x16xf32>
    tpu.vector_store %arg7[%c0_157, %c8_158], %124 {strides = array<i32>} : memref<8x32xf32, #tpu.memory_space<vmem>>, vector<8x16xf32>,
    %c0_159 = arith.constant 0 : index
    %c0_160 = arith.constant 0 : index
    %126 = vector.load %arg7[%c0_159, %c0_160] : memref<8x32xf32, #tpu.memory_space<vmem>>, vector<8x16xf32>
    %c0_161 = arith.constant 0 : index
    %c0_162 = arith.constant 0 : index
    %127 = vector.load %arg8[%c0_161, %c0_162] : memref<72x16xf32, #tpu.memory_space<vmem>>, vector<8x16xf32>
    tpu.vector_store %arg8[%c0_161, %c0_162], %126 {strides = array<i32>} : memref<72x16xf32, #tpu.memory_space<vmem>>, vector<8x16xf32>,
    %c0_163 = arith.constant 0 : index
    %c2_164 = arith.constant 2 : index
    %128 = vector.load %arg7[%c0_163, %c2_164] : memref<8x32xf32, #tpu.memory_space<vmem>>, vector<8x16xf32>
    %c8_165 = arith.constant 8 : index
    %c0_166 = arith.constant 0 : index
    %129 = vector.load %arg8[%c8_165, %c0_166] : memref<72x16xf32, #tpu.memory_space<vmem>>, vector<8x16xf32>
    tpu.vector_store %arg8[%c8_165, %c0_166], %128 {strides = array<i32>} : memref<72x16xf32, #tpu.memory_space<vmem>>, vector<8x16xf32>,
    %c0_167 = arith.constant 0 : index
    %c4_168 = arith.constant 4 : index
    %130 = vector.load %arg7[%c0_167, %c4_168] : memref<8x32xf32, #tpu.memory_space<vmem>>, vector<8x16xf32>
    %c16_169 = arith.constant 16 : index
    %c0_170 = arith.constant 0 : index
    %131 = vector.load %arg8[%c16_169, %c0_170] : memref<72x16xf32, #tpu.memory_space<vmem>>, vector<8x16xf32>
    tpu.vector_store %arg8[%c16_169, %c0_170], %130 {strides = array<i32>} : memref<72x16xf32, #tpu.memory_space<vmem>>, vector<8x16xf32>,
    %c0_171 = arith.constant 0 : index
    %c6_172 = arith.constant 6 : index
    %132 = vector.load %arg7[%c0_171, %c6_172] : memref<8x32xf32, #tpu.memory_space<vmem>>, vector<8x16xf32>
    %c24_173 = arith.constant 24 : index
    %c0_174 = arith.constant 0 : index
    %133 = vector.load %arg8[%c24_173, %c0_174] : memref<72x16xf32, #tpu.memory_space<vmem>>, vector<8x16xf32>
    tpu.vector_store %arg8[%c24_173, %c0_174], %132 {strides = array<i32>} : memref<72x16xf32, #tpu.memory_space<vmem>>, vector<8x16xf32>,
    %c0_175 = arith.constant 0 : index
    %c8_176 = arith.constant 8 : index
    %134 = vector.load %arg7[%c0_175, %c8_176] : memref<8x32xf32, #tpu.memory_space<vmem>>, vector<8x16xf32>
    %c32_177 = arith.constant 32 : index
    %c0_178 = arith.constant 0 : index
    %135 = vector.load %arg8[%c32_177, %c0_178] : memref<72x16xf32, #tpu.memory_space<vmem>>, vector<8x16xf32>
    tpu.vector_store %arg8[%c32_177, %c0_178], %134 {strides = array<i32>} : memref<72x16xf32, #tpu.memory_space<vmem>>, vector<8x16xf32>,
    %c0_179 = arith.constant 0 : index
    %c10_180 = arith.constant 10 : index
    %136 = vector.load %arg7[%c0_179, %c10_180] : memref<8x32xf32, #tpu.memory_space<vmem>>, vector<8x16xf32>
    %c40_181 = arith.constant 40 : index
    %c0_182 = arith.constant 0 : index
    %137 = vector.load %arg8[%c40_181, %c0_182] : memref<72x16xf32, #tpu.memory_space<vmem>>, vector<8x16xf32>
    tpu.vector_store %arg8[%c40_181, %c0_182], %136 {strides = array<i32>} : memref<72x16xf32, #tpu.memory_space<vmem>>, vector<8x16xf32>,
    %c0_183 = arith.constant 0 : index
    %c12_184 = arith.constant 12 : index
    %138 = vector.load %arg7[%c0_183, %c12_184] : memref<8x32xf32, #tpu.memory_space<vmem>>, vector<8x16xf32>
    %c48_185 = arith.constant 48 : index
    %c0_186 = arith.constant 0 : index
    %139 = vector.load %arg8[%c48_185, %c0_186] : memref<72x16xf32, #tpu.memory_space<vmem>>, vector<8x16xf32>
    tpu.vector_store %arg8[%c48_185, %c0_186], %138 {strides = array<i32>} : memref<72x16xf32, #tpu.memory_space<vmem>>, vector<8x16xf32>,
    %c0_187 = arith.constant 0 : index
    %c14_188 = arith.constant 14 : index
    %140 = vector.load %arg7[%c0_187, %c14_188] : memref<8x32xf32, #tpu.memory_space<vmem>>, vector<8x16xf32>
    %c56_189 = arith.constant 56 : index
    %c0_190 = arith.constant 0 : index
    %141 = vector.load %arg8[%c56_189, %c0_190] : memref<72x16xf32, #tpu.memory_space<vmem>>, vector<8x16xf32>
    tpu.vector_store %arg8[%c56_189, %c0_190], %140 {strides = array<i32>} : memref<72x16xf32, #tpu.memory_space<vmem>>, vector<8x16xf32>,
    %c0_191 = arith.constant 0 : index
    %c16_192 = arith.constant 16 : index
    %142 = vector.load %arg7[%c0_191, %c16_192] : memref<8x32xf32, #tpu.memory_space<vmem>>, vector<8x16xf32>
    %c64_193 = arith.constant 64 : index
    %c0_194 = arith.constant 0 : index
    %143 = vector.load %arg8[%c64_193, %c0_194] : memref<72x16xf32, #tpu.memory_space<vmem>>, vector<8x16xf32>
    tpu.vector_store %arg8[%c64_193, %c0_194], %142 {strides = array<i32>} : memref<72x16xf32, #tpu.memory_space<vmem>>, vector<8x16xf32>,
    %c3_195 = arith.constant 3 : index
    %c0_196 = arith.constant 0 : index
    %c0_197 = arith.constant 0 : index
    %144 = vector.load %arg1[%c3_195, %c0_196, %c0_197] : memref<10x8x72xf32, #tpu.memory_space<vmem>>, vector<1x8x72xf32>
    %145 = vector.shape_cast %144 : vector<1x8x72xf32> to vector<8x72xf32>
    %c0_198 = arith.constant 0 : index
    %c0_199 = arith.constant 0 : index
    %146 = vector.load %arg8[%c0_198, %c0_199] : memref<72x16xf32, #tpu.memory_space<vmem>>, vector<72x16xf32>
    %cst_200 = arith.constant dense<0.000000e+00> : vector<8x16xf32>
    %147 = tpu.matmul %145, %146, %cst_200 {dimension_numbers = #tpu.dot_dimension_numbers<[1], [0], [0], [1], [0, 0, 1, 1], [], []>, precision = #tpu.contract_precision<fp32>} : vector<8x72xf32>, vector<72x16xf32>, vector<8x16xf32> -> vector<8x16xf32>
    %c3_201 = arith.constant 3 : index
    %c0_202 = arith.constant 0 : index
    %c0_203 = arith.constant 0 : index
    %148 = vector.load %arg2[%c3_201, %c0_202, %c0_203] : memref<10x8x1xf32, #tpu.memory_space<vmem>>, vector<1x8x1xf32>
    %149 = vector.shape_cast %148 : vector<1x8x1xf32> to vector<8x1xf32>
    %150 = vector.broadcast %149 : vector<8x1xf32> to vector<8x16xf32>
    %151 = arith.addf %147, %150 : vector<8x16xf32>
    %152 = arith.addf %77, %151 : vector<8x16xf32>
    %c4_204 = arith.constant 4 : index
    %c0_205 = arith.constant 0 : index
    %c0_206 = arith.constant 0 : index
    %153 = vector.load %arg3[%c4_204, %c0_205, %c0_206] : memref<10x8x1xf32, #tpu.memory_space<vmem>>, vector<1x8x1xf32>
    %154 = vector.shape_cast %153 : vector<1x8x1xf32> to vector<8x1xf32>
    %155 = vector.broadcast %154 : vector<8x1xf32> to vector<8x16xf32>
    %156 = arith.mulf %152, %155 : vector<8x16xf32>
    %c4_207 = arith.constant 4 : index
    %c0_208 = arith.constant 0 : index
    %c0_209 = arith.constant 0 : index
    %157 = vector.load %arg4[%c4_207, %c0_208, %c0_209] : memref<10x8x1xf32, #tpu.memory_space<vmem>>, vector<1x8x1xf32>
    %158 = vector.shape_cast %157 : vector<1x8x1xf32> to vector<8x1xf32>
    %159 = vector.broadcast %158 : vector<8x1xf32> to vector<8x16xf32>
    %160 = arith.addf %156, %159 : vector<8x16xf32>
    %cst_210 = arith.constant 0.000000e+00 : f32
    %161 = vector.broadcast %cst_210 : f32 to vector<8x16xf32>
    %162 = arith.maximumf %160, %161 : vector<8x16xf32>
    %c0_211 = arith.constant 0 : index
    %c8_212 = arith.constant 8 : index
    %163 = vector.load %arg7[%c0_211, %c8_212] : memref<8x32xf32, #tpu.memory_space<vmem>>, vector<8x16xf32>
    tpu.vector_store %arg7[%c0_211, %c8_212], %162 {strides = array<i32>} : memref<8x32xf32, #tpu.memory_space<vmem>>, vector<8x16xf32>,
    %c0_213 = arith.constant 0 : index
    %c0_214 = arith.constant 0 : index
    %164 = vector.load %arg7[%c0_213, %c0_214] : memref<8x32xf32, #tpu.memory_space<vmem>>, vector<8x16xf32>
    %c0_215 = arith.constant 0 : index
    %c0_216 = arith.constant 0 : index
    %165 = vector.load %arg8[%c0_215, %c0_216] : memref<72x16xf32, #tpu.memory_space<vmem>>, vector<8x16xf32>
    tpu.vector_store %arg8[%c0_215, %c0_216], %164 {strides = array<i32>} : memref<72x16xf32, #tpu.memory_space<vmem>>, vector<8x16xf32>,
    %c0_217 = arith.constant 0 : index
    %c2_218 = arith.constant 2 : index
    %166 = vector.load %arg7[%c0_217, %c2_218] : memref<8x32xf32, #tpu.memory_space<vmem>>, vector<8x16xf32>
    %c8_219 = arith.constant 8 : index
    %c0_220 = arith.constant 0 : index
    %167 = vector.load %arg8[%c8_219, %c0_220] : memref<72x16xf32, #tpu.memory_space<vmem>>, vector<8x16xf32>
    tpu.vector_store %arg8[%c8_219, %c0_220], %166 {strides = array<i32>} : memref<72x16xf32, #tpu.memory_space<vmem>>, vector<8x16xf32>,
    %c0_221 = arith.constant 0 : index
    %c4_222 = arith.constant 4 : index
    %168 = vector.load %arg7[%c0_221, %c4_222] : memref<8x32xf32, #tpu.memory_space<vmem>>, vector<8x16xf32>
    %c16_223 = arith.constant 16 : index
    %c0_224 = arith.constant 0 : index
    %169 = vector.load %arg8[%c16_223, %c0_224] : memref<72x16xf32, #tpu.memory_space<vmem>>, vector<8x16xf32>
    tpu.vector_store %arg8[%c16_223, %c0_224], %168 {strides = array<i32>} : memref<72x16xf32, #tpu.memory_space<vmem>>, vector<8x16xf32>,
    %c0_225 = arith.constant 0 : index
    %c6_226 = arith.constant 6 : index
    %170 = vector.load %arg7[%c0_225, %c6_226] : memref<8x32xf32, #tpu.memory_space<vmem>>, vector<8x16xf32>
    %c24_227 = arith.constant 24 : index
    %c0_228 = arith.constant 0 : index
    %171 = vector.load %arg8[%c24_227, %c0_228] : memref<72x16xf32, #tpu.memory_space<vmem>>, vector<8x16xf32>
    tpu.vector_store %arg8[%c24_227, %c0_228], %170 {strides = array<i32>} : memref<72x16xf32, #tpu.memory_space<vmem>>, vector<8x16xf32>,
    %c0_229 = arith.constant 0 : index
    %c8_230 = arith.constant 8 : index
    %172 = vector.load %arg7[%c0_229, %c8_230] : memref<8x32xf32, #tpu.memory_space<vmem>>, vector<8x16xf32>
    %c32_231 = arith.constant 32 : index
    %c0_232 = arith.constant 0 : index
    %173 = vector.load %arg8[%c32_231, %c0_232] : memref<72x16xf32, #tpu.memory_space<vmem>>, vector<8x16xf32>
    tpu.vector_store %arg8[%c32_231, %c0_232], %172 {strides = array<i32>} : memref<72x16xf32, #tpu.memory_space<vmem>>, vector<8x16xf32>,
    %c0_233 = arith.constant 0 : index
    %c10_234 = arith.constant 10 : index
    %174 = vector.load %arg7[%c0_233, %c10_234] : memref<8x32xf32, #tpu.memory_space<vmem>>, vector<8x16xf32>
    %c40_235 = arith.constant 40 : index
    %c0_236 = arith.constant 0 : index
    %175 = vector.load %arg8[%c40_235, %c0_236] : memref<72x16xf32, #tpu.memory_space<vmem>>, vector<8x16xf32>
    tpu.vector_store %arg8[%c40_235, %c0_236], %174 {strides = array<i32>} : memref<72x16xf32, #tpu.memory_space<vmem>>, vector<8x16xf32>,
    %c0_237 = arith.constant 0 : index
    %c12_238 = arith.constant 12 : index
    %176 = vector.load %arg7[%c0_237, %c12_238] : memref<8x32xf32, #tpu.memory_space<vmem>>, vector<8x16xf32>
    %c48_239 = arith.constant 48 : index
    %c0_240 = arith.constant 0 : index
    %177 = vector.load %arg8[%c48_239, %c0_240] : memref<72x16xf32, #tpu.memory_space<vmem>>, vector<8x16xf32>
    tpu.vector_store %arg8[%c48_239, %c0_240], %176 {strides = array<i32>} : memref<72x16xf32, #tpu.memory_space<vmem>>, vector<8x16xf32>,
    %c0_241 = arith.constant 0 : index
    %c14_242 = arith.constant 14 : index
    %178 = vector.load %arg7[%c0_241, %c14_242] : memref<8x32xf32, #tpu.memory_space<vmem>>, vector<8x16xf32>
    %c56_243 = arith.constant 56 : index
    %c0_244 = arith.constant 0 : index
    %179 = vector.load %arg8[%c56_243, %c0_244] : memref<72x16xf32, #tpu.memory_space<vmem>>, vector<8x16xf32>
    tpu.vector_store %arg8[%c56_243, %c0_244], %178 {strides = array<i32>} : memref<72x16xf32, #tpu.memory_space<vmem>>, vector<8x16xf32>,
    %c0_245 = arith.constant 0 : index
    %c16_246 = arith.constant 16 : index
    %180 = vector.load %arg7[%c0_245, %c16_246] : memref<8x32xf32, #tpu.memory_space<vmem>>, vector<8x16xf32>
    %c64_247 = arith.constant 64 : index
    %c0_248 = arith.constant 0 : index
    %181 = vector.load %arg8[%c64_247, %c0_248] : memref<72x16xf32, #tpu.memory_space<vmem>>, vector<8x16xf32>
    tpu.vector_store %arg8[%c64_247, %c0_248], %180 {strides = array<i32>} : memref<72x16xf32, #tpu.memory_space<vmem>>, vector<8x16xf32>,
    %c4_249 = arith.constant 4 : index
    %c0_250 = arith.constant 0 : index
    %c0_251 = arith.constant 0 : index
    %182 = vector.load %arg1[%c4_249, %c0_250, %c0_251] : memref<10x8x72xf32, #tpu.memory_space<vmem>>, vector<1x8x72xf32>
    %183 = vector.shape_cast %182 : vector<1x8x72xf32> to vector<8x72xf32>
    %c0_252 = arith.constant 0 : index
    %c0_253 = arith.constant 0 : index
    %184 = vector.load %arg8[%c0_252, %c0_253] : memref<72x16xf32, #tpu.memory_space<vmem>>, vector<72x16xf32>
    %cst_254 = arith.constant dense<0.000000e+00> : vector<8x16xf32>
    %185 = tpu.matmul %183, %184, %cst_254 {dimension_numbers = #tpu.dot_dimension_numbers<[1], [0], [0], [1], [0, 0, 1, 1], [], []>, precision = #tpu.contract_precision<fp32>} : vector<8x72xf32>, vector<72x16xf32>, vector<8x16xf32> -> vector<8x16xf32>
    %c4_255 = arith.constant 4 : index
    %c0_256 = arith.constant 0 : index
    %c0_257 = arith.constant 0 : index
    %186 = vector.load %arg2[%c4_255, %c0_256, %c0_257] : memref<10x8x1xf32, #tpu.memory_space<vmem>>, vector<1x8x1xf32>
    %187 = vector.shape_cast %186 : vector<1x8x1xf32> to vector<8x1xf32>
    %188 = vector.broadcast %187 : vector<8x1xf32> to vector<8x16xf32>
    %189 = arith.addf %185, %188 : vector<8x16xf32>
    %c5 = arith.constant 5 : index
    %c0_258 = arith.constant 0 : index
    %c0_259 = arith.constant 0 : index
    %190 = vector.load %arg3[%c5, %c0_258, %c0_259] : memref<10x8x1xf32, #tpu.memory_space<vmem>>, vector<1x8x1xf32>
    %191 = vector.shape_cast %190 : vector<1x8x1xf32> to vector<8x1xf32>
    %192 = vector.broadcast %191 : vector<8x1xf32> to vector<8x16xf32>
    %193 = arith.mulf %189, %192 : vector<8x16xf32>
    %c5_260 = arith.constant 5 : index
    %c0_261 = arith.constant 0 : index
    %c0_262 = arith.constant 0 : index
    %194 = vector.load %arg4[%c5_260, %c0_261, %c0_262] : memref<10x8x1xf32, #tpu.memory_space<vmem>>, vector<1x8x1xf32>
    %195 = vector.shape_cast %194 : vector<1x8x1xf32> to vector<8x1xf32>
    %196 = vector.broadcast %195 : vector<8x1xf32> to vector<8x16xf32>
    %197 = arith.addf %193, %196 : vector<8x16xf32>
    %cst_263 = arith.constant 0.000000e+00 : f32
    %198 = vector.broadcast %cst_263 : f32 to vector<8x16xf32>
    %199 = arith.maximumf %197, %198 : vector<8x16xf32>
    %c0_264 = arith.constant 0 : index
    %c8_265 = arith.constant 8 : index
    %200 = vector.load %arg7[%c0_264, %c8_265] : memref<8x32xf32, #tpu.memory_space<vmem>>, vector<8x16xf32>
    tpu.vector_store %arg7[%c0_264, %c8_265], %199 {strides = array<i32>} : memref<8x32xf32, #tpu.memory_space<vmem>>, vector<8x16xf32>,
    %c0_266 = arith.constant 0 : index
    %c0_267 = arith.constant 0 : index
    %201 = vector.load %arg7[%c0_266, %c0_267] : memref<8x32xf32, #tpu.memory_space<vmem>>, vector<8x16xf32>
    %c0_268 = arith.constant 0 : index
    %c0_269 = arith.constant 0 : index
    %202 = vector.load %arg8[%c0_268, %c0_269] : memref<72x16xf32, #tpu.memory_space<vmem>>, vector<8x16xf32>
    tpu.vector_store %arg8[%c0_268, %c0_269], %201 {strides = array<i32>} : memref<72x16xf32, #tpu.memory_space<vmem>>, vector<8x16xf32>,
    %c0_270 = arith.constant 0 : index
    %c2_271 = arith.constant 2 : index
    %203 = vector.load %arg7[%c0_270, %c2_271] : memref<8x32xf32, #tpu.memory_space<vmem>>, vector<8x16xf32>
    %c8_272 = arith.constant 8 : index
    %c0_273 = arith.constant 0 : index
    %204 = vector.load %arg8[%c8_272, %c0_273] : memref<72x16xf32, #tpu.memory_space<vmem>>, vector<8x16xf32>
    tpu.vector_store %arg8[%c8_272, %c0_273], %203 {strides = array<i32>} : memref<72x16xf32, #tpu.memory_space<vmem>>, vector<8x16xf32>,
    %c0_274 = arith.constant 0 : index
    %c4_275 = arith.constant 4 : index
    %205 = vector.load %arg7[%c0_274, %c4_275] : memref<8x32xf32, #tpu.memory_space<vmem>>, vector<8x16xf32>
    %c16_276 = arith.constant 16 : index
    %c0_277 = arith.constant 0 : index
    %206 = vector.load %arg8[%c16_276, %c0_277] : memref<72x16xf32, #tpu.memory_space<vmem>>, vector<8x16xf32>
    tpu.vector_store %arg8[%c16_276, %c0_277], %205 {strides = array<i32>} : memref<72x16xf32, #tpu.memory_space<vmem>>, vector<8x16xf32>,
    %c0_278 = arith.constant 0 : index
    %c6_279 = arith.constant 6 : index
    %207 = vector.load %arg7[%c0_278, %c6_279] : memref<8x32xf32, #tpu.memory_space<vmem>>, vector<8x16xf32>
    %c24_280 = arith.constant 24 : index
    %c0_281 = arith.constant 0 : index
    %208 = vector.load %arg8[%c24_280, %c0_281] : memref<72x16xf32, #tpu.memory_space<vmem>>, vector<8x16xf32>
    tpu.vector_store %arg8[%c24_280, %c0_281], %207 {strides = array<i32>} : memref<72x16xf32, #tpu.memory_space<vmem>>, vector<8x16xf32>,
    %c0_282 = arith.constant 0 : index
    %c8_283 = arith.constant 8 : index
    %209 = vector.load %arg7[%c0_282, %c8_283] : memref<8x32xf32, #tpu.memory_space<vmem>>, vector<8x16xf32>
    %c32_284 = arith.constant 32 : index
    %c0_285 = arith.constant 0 : index
    %210 = vector.load %arg8[%c32_284, %c0_285] : memref<72x16xf32, #tpu.memory_space<vmem>>, vector<8x16xf32>
    tpu.vector_store %arg8[%c32_284, %c0_285], %209 {strides = array<i32>} : memref<72x16xf32, #tpu.memory_space<vmem>>, vector<8x16xf32>,
    %c0_286 = arith.constant 0 : index
    %c10_287 = arith.constant 10 : index
    %211 = vector.load %arg7[%c0_286, %c10_287] : memref<8x32xf32, #tpu.memory_space<vmem>>, vector<8x16xf32>
    %c40_288 = arith.constant 40 : index
    %c0_289 = arith.constant 0 : index
    %212 = vector.load %arg8[%c40_288, %c0_289] : memref<72x16xf32, #tpu.memory_space<vmem>>, vector<8x16xf32>
    tpu.vector_store %arg8[%c40_288, %c0_289], %211 {strides = array<i32>} : memref<72x16xf32, #tpu.memory_space<vmem>>, vector<8x16xf32>,
    %c0_290 = arith.constant 0 : index
    %c12_291 = arith.constant 12 : index
    %213 = vector.load %arg7[%c0_290, %c12_291] : memref<8x32xf32, #tpu.memory_space<vmem>>, vector<8x16xf32>
    %c48_292 = arith.constant 48 : index
    %c0_293 = arith.constant 0 : index
    %214 = vector.load %arg8[%c48_292, %c0_293] : memref<72x16xf32, #tpu.memory_space<vmem>>, vector<8x16xf32>
    tpu.vector_store %arg8[%c48_292, %c0_293], %213 {strides = array<i32>} : memref<72x16xf32, #tpu.memory_space<vmem>>, vector<8x16xf32>,
    %c0_294 = arith.constant 0 : index
    %c14_295 = arith.constant 14 : index
    %215 = vector.load %arg7[%c0_294, %c14_295] : memref<8x32xf32, #tpu.memory_space<vmem>>, vector<8x16xf32>
    %c56_296 = arith.constant 56 : index
    %c0_297 = arith.constant 0 : index
    %216 = vector.load %arg8[%c56_296, %c0_297] : memref<72x16xf32, #tpu.memory_space<vmem>>, vector<8x16xf32>
    tpu.vector_store %arg8[%c56_296, %c0_297], %215 {strides = array<i32>} : memref<72x16xf32, #tpu.memory_space<vmem>>, vector<8x16xf32>,
    %c0_298 = arith.constant 0 : index
    %c16_299 = arith.constant 16 : index
    %217 = vector.load %arg7[%c0_298, %c16_299] : memref<8x32xf32, #tpu.memory_space<vmem>>, vector<8x16xf32>
    %c64_300 = arith.constant 64 : index
    %c0_301 = arith.constant 0 : index
    %218 = vector.load %arg8[%c64_300, %c0_301] : memref<72x16xf32, #tpu.memory_space<vmem>>, vector<8x16xf32>
    tpu.vector_store %arg8[%c64_300, %c0_301], %217 {strides = array<i32>} : memref<72x16xf32, #tpu.memory_space<vmem>>, vector<8x16xf32>,
    %c5_302 = arith.constant 5 : index
    %c0_303 = arith.constant 0 : index
    %c0_304 = arith.constant 0 : index
    %219 = vector.load %arg1[%c5_302, %c0_303, %c0_304] : memref<10x8x72xf32, #tpu.memory_space<vmem>>, vector<1x8x72xf32>
    %220 = vector.shape_cast %219 : vector<1x8x72xf32> to vector<8x72xf32>
    %c0_305 = arith.constant 0 : index
    %c0_306 = arith.constant 0 : index
    %221 = vector.load %arg8[%c0_305, %c0_306] : memref<72x16xf32, #tpu.memory_space<vmem>>, vector<72x16xf32>
    %cst_307 = arith.constant dense<0.000000e+00> : vector<8x16xf32>
    %222 = tpu.matmul %220, %221, %cst_307 {dimension_numbers = #tpu.dot_dimension_numbers<[1], [0], [0], [1], [0, 0, 1, 1], [], []>, precision = #tpu.contract_precision<fp32>} : vector<8x72xf32>, vector<72x16xf32>, vector<8x16xf32> -> vector<8x16xf32>
    %c5_308 = arith.constant 5 : index
    %c0_309 = arith.constant 0 : index
    %c0_310 = arith.constant 0 : index
    %223 = vector.load %arg2[%c5_308, %c0_309, %c0_310] : memref<10x8x1xf32, #tpu.memory_space<vmem>>, vector<1x8x1xf32>
    %224 = vector.shape_cast %223 : vector<1x8x1xf32> to vector<8x1xf32>
    %225 = vector.broadcast %224 : vector<8x1xf32> to vector<8x16xf32>
    %226 = arith.addf %222, %225 : vector<8x16xf32>
    %227 = arith.addf %152, %226 : vector<8x16xf32>
    %c6_311 = arith.constant 6 : index
    %c0_312 = arith.constant 0 : index
    %c0_313 = arith.constant 0 : index
    %228 = vector.load %arg3[%c6_311, %c0_312, %c0_313] : memref<10x8x1xf32, #tpu.memory_space<vmem>>, vector<1x8x1xf32>
    %229 = vector.shape_cast %228 : vector<1x8x1xf32> to vector<8x1xf32>
    %230 = vector.broadcast %229 : vector<8x1xf32> to vector<8x16xf32>
    %231 = arith.mulf %227, %230 : vector<8x16xf32>
    %c6_314 = arith.constant 6 : index
    %c0_315 = arith.constant 0 : index
    %c0_316 = arith.constant 0 : index
    %232 = vector.load %arg4[%c6_314, %c0_315, %c0_316] : memref<10x8x1xf32, #tpu.memory_space<vmem>>, vector<1x8x1xf32>
    %233 = vector.shape_cast %232 : vector<1x8x1xf32> to vector<8x1xf32>
    %234 = vector.broadcast %233 : vector<8x1xf32> to vector<8x16xf32>
    %235 = arith.addf %231, %234 : vector<8x16xf32>
    %cst_317 = arith.constant 0.000000e+00 : f32
    %236 = vector.broadcast %cst_317 : f32 to vector<8x16xf32>
    %237 = arith.maximumf %235, %236 : vector<8x16xf32>
    %c0_318 = arith.constant 0 : index
    %c8_319 = arith.constant 8 : index
    %238 = vector.load %arg7[%c0_318, %c8_319] : memref<8x32xf32, #tpu.memory_space<vmem>>, vector<8x16xf32>
    tpu.vector_store %arg7[%c0_318, %c8_319], %237 {strides = array<i32>} : memref<8x32xf32, #tpu.memory_space<vmem>>, vector<8x16xf32>,
    %c0_320 = arith.constant 0 : index
    %c0_321 = arith.constant 0 : index
    %239 = vector.load %arg7[%c0_320, %c0_321] : memref<8x32xf32, #tpu.memory_space<vmem>>, vector<8x16xf32>
    %c0_322 = arith.constant 0 : index
    %c0_323 = arith.constant 0 : index
    %240 = vector.load %arg8[%c0_322, %c0_323] : memref<72x16xf32, #tpu.memory_space<vmem>>, vector<8x16xf32>
    tpu.vector_store %arg8[%c0_322, %c0_323], %239 {strides = array<i32>} : memref<72x16xf32, #tpu.memory_space<vmem>>, vector<8x16xf32>,
    %c0_324 = arith.constant 0 : index
    %c2_325 = arith.constant 2 : index
    %241 = vector.load %arg7[%c0_324, %c2_325] : memref<8x32xf32, #tpu.memory_space<vmem>>, vector<8x16xf32>
    %c8_326 = arith.constant 8 : index
    %c0_327 = arith.constant 0 : index
    %242 = vector.load %arg8[%c8_326, %c0_327] : memref<72x16xf32, #tpu.memory_space<vmem>>, vector<8x16xf32>
    tpu.vector_store %arg8[%c8_326, %c0_327], %241 {strides = array<i32>} : memref<72x16xf32, #tpu.memory_space<vmem>>, vector<8x16xf32>,
    %c0_328 = arith.constant 0 : index
    %c4_329 = arith.constant 4 : index
    %243 = vector.load %arg7[%c0_328, %c4_329] : memref<8x32xf32, #tpu.memory_space<vmem>>, vector<8x16xf32>
    %c16_330 = arith.constant 16 : index
    %c0_331 = arith.constant 0 : index
    %244 = vector.load %arg8[%c16_330, %c0_331] : memref<72x16xf32, #tpu.memory_space<vmem>>, vector<8x16xf32>
    tpu.vector_store %arg8[%c16_330, %c0_331], %243 {strides = array<i32>} : memref<72x16xf32, #tpu.memory_space<vmem>>, vector<8x16xf32>,
    %c0_332 = arith.constant 0 : index
    %c6_333 = arith.constant 6 : index
    %245 = vector.load %arg7[%c0_332, %c6_333] : memref<8x32xf32, #tpu.memory_space<vmem>>, vector<8x16xf32>
    %c24_334 = arith.constant 24 : index
    %c0_335 = arith.constant 0 : index
    %246 = vector.load %arg8[%c24_334, %c0_335] : memref<72x16xf32, #tpu.memory_space<vmem>>, vector<8x16xf32>
    tpu.vector_store %arg8[%c24_334, %c0_335], %245 {strides = array<i32>} : memref<72x16xf32, #tpu.memory_space<vmem>>, vector<8x16xf32>,
    %c0_336 = arith.constant 0 : index
    %c8_337 = arith.constant 8 : index
    %247 = vector.load %arg7[%c0_336, %c8_337] : memref<8x32xf32, #tpu.memory_space<vmem>>, vector<8x16xf32>
    %c32_338 = arith.constant 32 : index
    %c0_339 = arith.constant 0 : index
    %248 = vector.load %arg8[%c32_338, %c0_339] : memref<72x16xf32, #tpu.memory_space<vmem>>, vector<8x16xf32>
    tpu.vector_store %arg8[%c32_338, %c0_339], %247 {strides = array<i32>} : memref<72x16xf32, #tpu.memory_space<vmem>>, vector<8x16xf32>,
    %c0_340 = arith.constant 0 : index
    %c10_341 = arith.constant 10 : index
    %249 = vector.load %arg7[%c0_340, %c10_341] : memref<8x32xf32, #tpu.memory_space<vmem>>, vector<8x16xf32>
    %c40_342 = arith.constant 40 : index
    %c0_343 = arith.constant 0 : index
    %250 = vector.load %arg8[%c40_342, %c0_343] : memref<72x16xf32, #tpu.memory_space<vmem>>, vector<8x16xf32>
    tpu.vector_store %arg8[%c40_342, %c0_343], %249 {strides = array<i32>} : memref<72x16xf32, #tpu.memory_space<vmem>>, vector<8x16xf32>,
    %c0_344 = arith.constant 0 : index
    %c12_345 = arith.constant 12 : index
    %251 = vector.load %arg7[%c0_344, %c12_345] : memref<8x32xf32, #tpu.memory_space<vmem>>, vector<8x16xf32>
    %c48_346 = arith.constant 48 : index
    %c0_347 = arith.constant 0 : index
    %252 = vector.load %arg8[%c48_346, %c0_347] : memref<72x16xf32, #tpu.memory_space<vmem>>, vector<8x16xf32>
    tpu.vector_store %arg8[%c48_346, %c0_347], %251 {strides = array<i32>} : memref<72x16xf32, #tpu.memory_space<vmem>>, vector<8x16xf32>,
    %c0_348 = arith.constant 0 : index
    %c14_349 = arith.constant 14 : index
    %253 = vector.load %arg7[%c0_348, %c14_349] : memref<8x32xf32, #tpu.memory_space<vmem>>, vector<8x16xf32>
    %c56_350 = arith.constant 56 : index
    %c0_351 = arith.constant 0 : index
    %254 = vector.load %arg8[%c56_350, %c0_351] : memref<72x16xf32, #tpu.memory_space<vmem>>, vector<8x16xf32>
    tpu.vector_store %arg8[%c56_350, %c0_351], %253 {strides = array<i32>} : memref<72x16xf32, #tpu.memory_space<vmem>>, vector<8x16xf32>,
    %c0_352 = arith.constant 0 : index
    %c16_353 = arith.constant 16 : index
    %255 = vector.load %arg7[%c0_352, %c16_353] : memref<8x32xf32, #tpu.memory_space<vmem>>, vector<8x16xf32>
    %c64_354 = arith.constant 64 : index
    %c0_355 = arith.constant 0 : index
    %256 = vector.load %arg8[%c64_354, %c0_355] : memref<72x16xf32, #tpu.memory_space<vmem>>, vector<8x16xf32>
    tpu.vector_store %arg8[%c64_354, %c0_355], %255 {strides = array<i32>} : memref<72x16xf32, #tpu.memory_space<vmem>>, vector<8x16xf32>,
    %c6_356 = arith.constant 6 : index
    %c0_357 = arith.constant 0 : index
    %c0_358 = arith.constant 0 : index
    %257 = vector.load %arg1[%c6_356, %c0_357, %c0_358] : memref<10x8x72xf32, #tpu.memory_space<vmem>>, vector<1x8x72xf32>
    %258 = vector.shape_cast %257 : vector<1x8x72xf32> to vector<8x72xf32>
    %c0_359 = arith.constant 0 : index
    %c0_360 = arith.constant 0 : index
    %259 = vector.load %arg8[%c0_359, %c0_360] : memref<72x16xf32, #tpu.memory_space<vmem>>, vector<72x16xf32>
    %cst_361 = arith.constant dense<0.000000e+00> : vector<8x16xf32>
    %260 = tpu.matmul %258, %259, %cst_361 {dimension_numbers = #tpu.dot_dimension_numbers<[1], [0], [0], [1], [0, 0, 1, 1], [], []>, precision = #tpu.contract_precision<fp32>} : vector<8x72xf32>, vector<72x16xf32>, vector<8x16xf32> -> vector<8x16xf32>
    %c6_362 = arith.constant 6 : index
    %c0_363 = arith.constant 0 : index
    %c0_364 = arith.constant 0 : index
    %261 = vector.load %arg2[%c6_362, %c0_363, %c0_364] : memref<10x8x1xf32, #tpu.memory_space<vmem>>, vector<1x8x1xf32>
    %262 = vector.shape_cast %261 : vector<1x8x1xf32> to vector<8x1xf32>
    %263 = vector.broadcast %262 : vector<8x1xf32> to vector<8x16xf32>
    %264 = arith.addf %260, %263 : vector<8x16xf32>
    %c7 = arith.constant 7 : index
    %c0_365 = arith.constant 0 : index
    %c0_366 = arith.constant 0 : index
    %265 = vector.load %arg3[%c7, %c0_365, %c0_366] : memref<10x8x1xf32, #tpu.memory_space<vmem>>, vector<1x8x1xf32>
    %266 = vector.shape_cast %265 : vector<1x8x1xf32> to vector<8x1xf32>
    %267 = vector.broadcast %266 : vector<8x1xf32> to vector<8x16xf32>
    %268 = arith.mulf %264, %267 : vector<8x16xf32>
    %c7_367 = arith.constant 7 : index
    %c0_368 = arith.constant 0 : index
    %c0_369 = arith.constant 0 : index
    %269 = vector.load %arg4[%c7_367, %c0_368, %c0_369] : memref<10x8x1xf32, #tpu.memory_space<vmem>>, vector<1x8x1xf32>
    %270 = vector.shape_cast %269 : vector<1x8x1xf32> to vector<8x1xf32>
    %271 = vector.broadcast %270 : vector<8x1xf32> to vector<8x16xf32>
    %272 = arith.addf %268, %271 : vector<8x16xf32>
    %cst_370 = arith.constant 0.000000e+00 : f32
    %273 = vector.broadcast %cst_370 : f32 to vector<8x16xf32>
    %274 = arith.maximumf %272, %273 : vector<8x16xf32>
    %c0_371 = arith.constant 0 : index
    %c8_372 = arith.constant 8 : index
    %275 = vector.load %arg7[%c0_371, %c8_372] : memref<8x32xf32, #tpu.memory_space<vmem>>, vector<8x16xf32>
    tpu.vector_store %arg7[%c0_371, %c8_372], %274 {strides = array<i32>} : memref<8x32xf32, #tpu.memory_space<vmem>>, vector<8x16xf32>,
    %c0_373 = arith.constant 0 : index
    %c0_374 = arith.constant 0 : index
    %276 = vector.load %arg7[%c0_373, %c0_374] : memref<8x32xf32, #tpu.memory_space<vmem>>, vector<8x16xf32>
    %c0_375 = arith.constant 0 : index
    %c0_376 = arith.constant 0 : index
    %277 = vector.load %arg8[%c0_375, %c0_376] : memref<72x16xf32, #tpu.memory_space<vmem>>, vector<8x16xf32>
    tpu.vector_store %arg8[%c0_375, %c0_376], %276 {strides = array<i32>} : memref<72x16xf32, #tpu.memory_space<vmem>>, vector<8x16xf32>,
    %c0_377 = arith.constant 0 : index
    %c2_378 = arith.constant 2 : index
    %278 = vector.load %arg7[%c0_377, %c2_378] : memref<8x32xf32, #tpu.memory_space<vmem>>, vector<8x16xf32>
    %c8_379 = arith.constant 8 : index
    %c0_380 = arith.constant 0 : index
    %279 = vector.load %arg8[%c8_379, %c0_380] : memref<72x16xf32, #tpu.memory_space<vmem>>, vector<8x16xf32>
    tpu.vector_store %arg8[%c8_379, %c0_380], %278 {strides = array<i32>} : memref<72x16xf32, #tpu.memory_space<vmem>>, vector<8x16xf32>,
    %c0_381 = arith.constant 0 : index
    %c4_382 = arith.constant 4 : index
    %280 = vector.load %arg7[%c0_381, %c4_382] : memref<8x32xf32, #tpu.memory_space<vmem>>, vector<8x16xf32>
    %c16_383 = arith.constant 16 : index
    %c0_384 = arith.constant 0 : index
    %281 = vector.load %arg8[%c16_383, %c0_384] : memref<72x16xf32, #tpu.memory_space<vmem>>, vector<8x16xf32>
    tpu.vector_store %arg8[%c16_383, %c0_384], %280 {strides = array<i32>} : memref<72x16xf32, #tpu.memory_space<vmem>>, vector<8x16xf32>,
    %c0_385 = arith.constant 0 : index
    %c6_386 = arith.constant 6 : index
    %282 = vector.load %arg7[%c0_385, %c6_386] : memref<8x32xf32, #tpu.memory_space<vmem>>, vector<8x16xf32>
    %c24_387 = arith.constant 24 : index
    %c0_388 = arith.constant 0 : index
    %283 = vector.load %arg8[%c24_387, %c0_388] : memref<72x16xf32, #tpu.memory_space<vmem>>, vector<8x16xf32>
    tpu.vector_store %arg8[%c24_387, %c0_388], %282 {strides = array<i32>} : memref<72x16xf32, #tpu.memory_space<vmem>>, vector<8x16xf32>,
    %c0_389 = arith.constant 0 : index
    %c8_390 = arith.constant 8 : index
    %284 = vector.load %arg7[%c0_389, %c8_390] : memref<8x32xf32, #tpu.memory_space<vmem>>, vector<8x16xf32>
    %c32_391 = arith.constant 32 : index
    %c0_392 = arith.constant 0 : index
    %285 = vector.load %arg8[%c32_391, %c0_392] : memref<72x16xf32, #tpu.memory_space<vmem>>, vector<8x16xf32>
    tpu.vector_store %arg8[%c32_391, %c0_392], %284 {strides = array<i32>} : memref<72x16xf32, #tpu.memory_space<vmem>>, vector<8x16xf32>,
    %c0_393 = arith.constant 0 : index
    %c10_394 = arith.constant 10 : index
    %286 = vector.load %arg7[%c0_393, %c10_394] : memref<8x32xf32, #tpu.memory_space<vmem>>, vector<8x16xf32>
    %c40_395 = arith.constant 40 : index
    %c0_396 = arith.constant 0 : index
    %287 = vector.load %arg8[%c40_395, %c0_396] : memref<72x16xf32, #tpu.memory_space<vmem>>, vector<8x16xf32>
    tpu.vector_store %arg8[%c40_395, %c0_396], %286 {strides = array<i32>} : memref<72x16xf32, #tpu.memory_space<vmem>>, vector<8x16xf32>,
    %c0_397 = arith.constant 0 : index
    %c12_398 = arith.constant 12 : index
    %288 = vector.load %arg7[%c0_397, %c12_398] : memref<8x32xf32, #tpu.memory_space<vmem>>, vector<8x16xf32>
    %c48_399 = arith.constant 48 : index
    %c0_400 = arith.constant 0 : index
    %289 = vector.load %arg8[%c48_399, %c0_400] : memref<72x16xf32, #tpu.memory_space<vmem>>, vector<8x16xf32>
    tpu.vector_store %arg8[%c48_399, %c0_400], %288 {strides = array<i32>} : memref<72x16xf32, #tpu.memory_space<vmem>>, vector<8x16xf32>,
    %c0_401 = arith.constant 0 : index
    %c14_402 = arith.constant 14 : index
    %290 = vector.load %arg7[%c0_401, %c14_402] : memref<8x32xf32, #tpu.memory_space<vmem>>, vector<8x16xf32>
    %c56_403 = arith.constant 56 : index
    %c0_404 = arith.constant 0 : index
    %291 = vector.load %arg8[%c56_403, %c0_404] : memref<72x16xf32, #tpu.memory_space<vmem>>, vector<8x16xf32>
    tpu.vector_store %arg8[%c56_403, %c0_404], %290 {strides = array<i32>} : memref<72x16xf32, #tpu.memory_space<vmem>>, vector<8x16xf32>,
    %c0_405 = arith.constant 0 : index
    %c16_406 = arith.constant 16 : index
    %292 = vector.load %arg7[%c0_405, %c16_406] : memref<8x32xf32, #tpu.memory_space<vmem>>, vector<8x16xf32>
    %c64_407 = arith.constant 64 : index
    %c0_408 = arith.constant 0 : index
    %293 = vector.load %arg8[%c64_407, %c0_408] : memref<72x16xf32, #tpu.memory_space<vmem>>, vector<8x16xf32>
    tpu.vector_store %arg8[%c64_407, %c0_408], %292 {strides = array<i32>} : memref<72x16xf32, #tpu.memory_space<vmem>>, vector<8x16xf32>,
    %c7_409 = arith.constant 7 : index
    %c0_410 = arith.constant 0 : index
    %c0_411 = arith.constant 0 : index
    %294 = vector.load %arg1[%c7_409, %c0_410, %c0_411] : memref<10x8x72xf32, #tpu.memory_space<vmem>>, vector<1x8x72xf32>
    %295 = vector.shape_cast %294 : vector<1x8x72xf32> to vector<8x72xf32>
    %c0_412 = arith.constant 0 : index
    %c0_413 = arith.constant 0 : index
    %296 = vector.load %arg8[%c0_412, %c0_413] : memref<72x16xf32, #tpu.memory_space<vmem>>, vector<72x16xf32>
    %cst_414 = arith.constant dense<0.000000e+00> : vector<8x16xf32>
    %297 = tpu.matmul %295, %296, %cst_414 {dimension_numbers = #tpu.dot_dimension_numbers<[1], [0], [0], [1], [0, 0, 1, 1], [], []>, precision = #tpu.contract_precision<fp32>} : vector<8x72xf32>, vector<72x16xf32>, vector<8x16xf32> -> vector<8x16xf32>
    %c7_415 = arith.constant 7 : index
    %c0_416 = arith.constant 0 : index
    %c0_417 = arith.constant 0 : index
    %298 = vector.load %arg2[%c7_415, %c0_416, %c0_417] : memref<10x8x1xf32, #tpu.memory_space<vmem>>, vector<1x8x1xf32>
    %299 = vector.shape_cast %298 : vector<1x8x1xf32> to vector<8x1xf32>
    %300 = vector.broadcast %299 : vector<8x1xf32> to vector<8x16xf32>
    %301 = arith.addf %297, %300 : vector<8x16xf32>
    %302 = arith.addf %227, %301 : vector<8x16xf32>
    %c8_418 = arith.constant 8 : index
    %c0_419 = arith.constant 0 : index
    %c0_420 = arith.constant 0 : index
    %303 = vector.load %arg3[%c8_418, %c0_419, %c0_420] : memref<10x8x1xf32, #tpu.memory_space<vmem>>, vector<1x8x1xf32>
    %304 = vector.shape_cast %303 : vector<1x8x1xf32> to vector<8x1xf32>
    %305 = vector.broadcast %304 : vector<8x1xf32> to vector<8x16xf32>
    %306 = arith.mulf %302, %305 : vector<8x16xf32>
    %c8_421 = arith.constant 8 : index
    %c0_422 = arith.constant 0 : index
    %c0_423 = arith.constant 0 : index
    %307 = vector.load %arg4[%c8_421, %c0_422, %c0_423] : memref<10x8x1xf32, #tpu.memory_space<vmem>>, vector<1x8x1xf32>
    %308 = vector.shape_cast %307 : vector<1x8x1xf32> to vector<8x1xf32>
    %309 = vector.broadcast %308 : vector<8x1xf32> to vector<8x16xf32>
    %310 = arith.addf %306, %309 : vector<8x16xf32>
    %cst_424 = arith.constant 0.000000e+00 : f32
    %311 = vector.broadcast %cst_424 : f32 to vector<8x16xf32>
    %312 = arith.maximumf %310, %311 : vector<8x16xf32>
    %c0_425 = arith.constant 0 : index
    %c8_426 = arith.constant 8 : index
    %313 = vector.load %arg7[%c0_425, %c8_426] : memref<8x32xf32, #tpu.memory_space<vmem>>, vector<8x16xf32>
    tpu.vector_store %arg7[%c0_425, %c8_426], %312 {strides = array<i32>} : memref<8x32xf32, #tpu.memory_space<vmem>>, vector<8x16xf32>,
    %c0_427 = arith.constant 0 : index
    %c0_428 = arith.constant 0 : index
    %314 = vector.load %arg7[%c0_427, %c0_428] : memref<8x32xf32, #tpu.memory_space<vmem>>, vector<8x16xf32>
    %c0_429 = arith.constant 0 : index
    %c0_430 = arith.constant 0 : index
    %315 = vector.load %arg8[%c0_429, %c0_430] : memref<72x16xf32, #tpu.memory_space<vmem>>, vector<8x16xf32>
    tpu.vector_store %arg8[%c0_429, %c0_430], %314 {strides = array<i32>} : memref<72x16xf32, #tpu.memory_space<vmem>>, vector<8x16xf32>,
    %c0_431 = arith.constant 0 : index
    %c2_432 = arith.constant 2 : index
    %316 = vector.load %arg7[%c0_431, %c2_432] : memref<8x32xf32, #tpu.memory_space<vmem>>, vector<8x16xf32>
    %c8_433 = arith.constant 8 : index
    %c0_434 = arith.constant 0 : index
    %317 = vector.load %arg8[%c8_433, %c0_434] : memref<72x16xf32, #tpu.memory_space<vmem>>, vector<8x16xf32>
    tpu.vector_store %arg8[%c8_433, %c0_434], %316 {strides = array<i32>} : memref<72x16xf32, #tpu.memory_space<vmem>>, vector<8x16xf32>,
    %c0_435 = arith.constant 0 : index
    %c4_436 = arith.constant 4 : index
    %318 = vector.load %arg7[%c0_435, %c4_436] : memref<8x32xf32, #tpu.memory_space<vmem>>, vector<8x16xf32>
    %c16_437 = arith.constant 16 : index
    %c0_438 = arith.constant 0 : index
    %319 = vector.load %arg8[%c16_437, %c0_438] : memref<72x16xf32, #tpu.memory_space<vmem>>, vector<8x16xf32>
    tpu.vector_store %arg8[%c16_437, %c0_438], %318 {strides = array<i32>} : memref<72x16xf32, #tpu.memory_space<vmem>>, vector<8x16xf32>,
    %c0_439 = arith.constant 0 : index
    %c6_440 = arith.constant 6 : index
    %320 = vector.load %arg7[%c0_439, %c6_440] : memref<8x32xf32, #tpu.memory_space<vmem>>, vector<8x16xf32>
    %c24_441 = arith.constant 24 : index
    %c0_442 = arith.constant 0 : index
    %321 = vector.load %arg8[%c24_441, %c0_442] : memref<72x16xf32, #tpu.memory_space<vmem>>, vector<8x16xf32>
    tpu.vector_store %arg8[%c24_441, %c0_442], %320 {strides = array<i32>} : memref<72x16xf32, #tpu.memory_space<vmem>>, vector<8x16xf32>,
    %c0_443 = arith.constant 0 : index
    %c8_444 = arith.constant 8 : index
    %322 = vector.load %arg7[%c0_443, %c8_444] : memref<8x32xf32, #tpu.memory_space<vmem>>, vector<8x16xf32>
    %c32_445 = arith.constant 32 : index
    %c0_446 = arith.constant 0 : index
    %323 = vector.load %arg8[%c32_445, %c0_446] : memref<72x16xf32, #tpu.memory_space<vmem>>, vector<8x16xf32>
    tpu.vector_store %arg8[%c32_445, %c0_446], %322 {strides = array<i32>} : memref<72x16xf32, #tpu.memory_space<vmem>>, vector<8x16xf32>,
    %c0_447 = arith.constant 0 : index
    %c10_448 = arith.constant 10 : index
    %324 = vector.load %arg7[%c0_447, %c10_448] : memref<8x32xf32, #tpu.memory_space<vmem>>, vector<8x16xf32>
    %c40_449 = arith.constant 40 : index
    %c0_450 = arith.constant 0 : index
    %325 = vector.load %arg8[%c40_449, %c0_450] : memref<72x16xf32, #tpu.memory_space<vmem>>, vector<8x16xf32>
    tpu.vector_store %arg8[%c40_449, %c0_450], %324 {strides = array<i32>} : memref<72x16xf32, #tpu.memory_space<vmem>>, vector<8x16xf32>,
    %c0_451 = arith.constant 0 : index
    %c12_452 = arith.constant 12 : index
    %326 = vector.load %arg7[%c0_451, %c12_452] : memref<8x32xf32, #tpu.memory_space<vmem>>, vector<8x16xf32>
    %c48_453 = arith.constant 48 : index
    %c0_454 = arith.constant 0 : index
    %327 = vector.load %arg8[%c48_453, %c0_454] : memref<72x16xf32, #tpu.memory_space<vmem>>, vector<8x16xf32>
    tpu.vector_store %arg8[%c48_453, %c0_454], %326 {strides = array<i32>} : memref<72x16xf32, #tpu.memory_space<vmem>>, vector<8x16xf32>,
    %c0_455 = arith.constant 0 : index
    %c14_456 = arith.constant 14 : index
    %328 = vector.load %arg7[%c0_455, %c14_456] : memref<8x32xf32, #tpu.memory_space<vmem>>, vector<8x16xf32>
    %c56_457 = arith.constant 56 : index
    %c0_458 = arith.constant 0 : index
    %329 = vector.load %arg8[%c56_457, %c0_458] : memref<72x16xf32, #tpu.memory_space<vmem>>, vector<8x16xf32>
    tpu.vector_store %arg8[%c56_457, %c0_458], %328 {strides = array<i32>} : memref<72x16xf32, #tpu.memory_space<vmem>>, vector<8x16xf32>,
    %c0_459 = arith.constant 0 : index
    %c16_460 = arith.constant 16 : index
    %330 = vector.load %arg7[%c0_459, %c16_460] : memref<8x32xf32, #tpu.memory_space<vmem>>, vector<8x16xf32>
    %c64_461 = arith.constant 64 : index
    %c0_462 = arith.constant 0 : index
    %331 = vector.load %arg8[%c64_461, %c0_462] : memref<72x16xf32, #tpu.memory_space<vmem>>, vector<8x16xf32>
    tpu.vector_store %arg8[%c64_461, %c0_462], %330 {strides = array<i32>} : memref<72x16xf32, #tpu.memory_space<vmem>>, vector<8x16xf32>,
    %c8_463 = arith.constant 8 : index
    %c0_464 = arith.constant 0 : index
    %c0_465 = arith.constant 0 : index
    %332 = vector.load %arg1[%c8_463, %c0_464, %c0_465] : memref<10x8x72xf32, #tpu.memory_space<vmem>>, vector<1x8x72xf32>
    %333 = vector.shape_cast %332 : vector<1x8x72xf32> to vector<8x72xf32>
    %c0_466 = arith.constant 0 : index
    %c0_467 = arith.constant 0 : index
    %334 = vector.load %arg8[%c0_466, %c0_467] : memref<72x16xf32, #tpu.memory_space<vmem>>, vector<72x16xf32>
    %cst_468 = arith.constant dense<0.000000e+00> : vector<8x16xf32>
    %335 = tpu.matmul %333, %334, %cst_468 {dimension_numbers = #tpu.dot_dimension_numbers<[1], [0], [0], [1], [0, 0, 1, 1], [], []>, precision = #tpu.contract_precision<fp32>} : vector<8x72xf32>, vector<72x16xf32>, vector<8x16xf32> -> vector<8x16xf32>
    %c8_469 = arith.constant 8 : index
    %c0_470 = arith.constant 0 : index
    %c0_471 = arith.constant 0 : index
    %336 = vector.load %arg2[%c8_469, %c0_470, %c0_471] : memref<10x8x1xf32, #tpu.memory_space<vmem>>, vector<1x8x1xf32>
    %337 = vector.shape_cast %336 : vector<1x8x1xf32> to vector<8x1xf32>
    %338 = vector.broadcast %337 : vector<8x1xf32> to vector<8x16xf32>
    %339 = arith.addf %335, %338 : vector<8x16xf32>
    %c9 = arith.constant 9 : index
    %c0_472 = arith.constant 0 : index
    %c0_473 = arith.constant 0 : index
    %340 = vector.load %arg3[%c9, %c0_472, %c0_473] : memref<10x8x1xf32, #tpu.memory_space<vmem>>, vector<1x8x1xf32>
    %341 = vector.shape_cast %340 : vector<1x8x1xf32> to vector<8x1xf32>
    %342 = vector.broadcast %341 : vector<8x1xf32> to vector<8x16xf32>
    %343 = arith.mulf %339, %342 : vector<8x16xf32>
    %c9_474 = arith.constant 9 : index
    %c0_475 = arith.constant 0 : index
    %c0_476 = arith.constant 0 : index
    %344 = vector.load %arg4[%c9_474, %c0_475, %c0_476] : memref<10x8x1xf32, #tpu.memory_space<vmem>>, vector<1x8x1xf32>
    %345 = vector.shape_cast %344 : vector<1x8x1xf32> to vector<8x1xf32>
    %346 = vector.broadcast %345 : vector<8x1xf32> to vector<8x16xf32>
    %347 = arith.addf %343, %346 : vector<8x16xf32>
    %cst_477 = arith.constant 0.000000e+00 : f32
    %348 = vector.broadcast %cst_477 : f32 to vector<8x16xf32>
    %349 = arith.maximumf %347, %348 : vector<8x16xf32>
    %c0_478 = arith.constant 0 : index
    %c8_479 = arith.constant 8 : index
    %350 = vector.load %arg7[%c0_478, %c8_479] : memref<8x32xf32, #tpu.memory_space<vmem>>, vector<8x16xf32>
    tpu.vector_store %arg7[%c0_478, %c8_479], %349 {strides = array<i32>} : memref<8x32xf32, #tpu.memory_space<vmem>>, vector<8x16xf32>,
    %c0_480 = arith.constant 0 : index
    %c0_481 = arith.constant 0 : index
    %351 = vector.load %arg7[%c0_480, %c0_481] : memref<8x32xf32, #tpu.memory_space<vmem>>, vector<8x16xf32>
    %c0_482 = arith.constant 0 : index
    %c0_483 = arith.constant 0 : index
    %352 = vector.load %arg8[%c0_482, %c0_483] : memref<72x16xf32, #tpu.memory_space<vmem>>, vector<8x16xf32>
    tpu.vector_store %arg8[%c0_482, %c0_483], %351 {strides = array<i32>} : memref<72x16xf32, #tpu.memory_space<vmem>>, vector<8x16xf32>,
    %c0_484 = arith.constant 0 : index
    %c2_485 = arith.constant 2 : index
    %353 = vector.load %arg7[%c0_484, %c2_485] : memref<8x32xf32, #tpu.memory_space<vmem>>, vector<8x16xf32>
    %c8_486 = arith.constant 8 : index
    %c0_487 = arith.constant 0 : index
    %354 = vector.load %arg8[%c8_486, %c0_487] : memref<72x16xf32, #tpu.memory_space<vmem>>, vector<8x16xf32>
    tpu.vector_store %arg8[%c8_486, %c0_487], %353 {strides = array<i32>} : memref<72x16xf32, #tpu.memory_space<vmem>>, vector<8x16xf32>,
    %c0_488 = arith.constant 0 : index
    %c4_489 = arith.constant 4 : index
    %355 = vector.load %arg7[%c0_488, %c4_489] : memref<8x32xf32, #tpu.memory_space<vmem>>, vector<8x16xf32>
    %c16_490 = arith.constant 16 : index
    %c0_491 = arith.constant 0 : index
    %356 = vector.load %arg8[%c16_490, %c0_491] : memref<72x16xf32, #tpu.memory_space<vmem>>, vector<8x16xf32>
    tpu.vector_store %arg8[%c16_490, %c0_491], %355 {strides = array<i32>} : memref<72x16xf32, #tpu.memory_space<vmem>>, vector<8x16xf32>,
    %c0_492 = arith.constant 0 : index
    %c6_493 = arith.constant 6 : index
    %357 = vector.load %arg7[%c0_492, %c6_493] : memref<8x32xf32, #tpu.memory_space<vmem>>, vector<8x16xf32>
    %c24_494 = arith.constant 24 : index
    %c0_495 = arith.constant 0 : index
    %358 = vector.load %arg8[%c24_494, %c0_495] : memref<72x16xf32, #tpu.memory_space<vmem>>, vector<8x16xf32>
    tpu.vector_store %arg8[%c24_494, %c0_495], %357 {strides = array<i32>} : memref<72x16xf32, #tpu.memory_space<vmem>>, vector<8x16xf32>,
    %c0_496 = arith.constant 0 : index
    %c8_497 = arith.constant 8 : index
    %359 = vector.load %arg7[%c0_496, %c8_497] : memref<8x32xf32, #tpu.memory_space<vmem>>, vector<8x16xf32>
    %c32_498 = arith.constant 32 : index
    %c0_499 = arith.constant 0 : index
    %360 = vector.load %arg8[%c32_498, %c0_499] : memref<72x16xf32, #tpu.memory_space<vmem>>, vector<8x16xf32>
    tpu.vector_store %arg8[%c32_498, %c0_499], %359 {strides = array<i32>} : memref<72x16xf32, #tpu.memory_space<vmem>>, vector<8x16xf32>,
    %c0_500 = arith.constant 0 : index
    %c10_501 = arith.constant 10 : index
    %361 = vector.load %arg7[%c0_500, %c10_501] : memref<8x32xf32, #tpu.memory_space<vmem>>, vector<8x16xf32>
    %c40_502 = arith.constant 40 : index
    %c0_503 = arith.constant 0 : index
    %362 = vector.load %arg8[%c40_502, %c0_503] : memref<72x16xf32, #tpu.memory_space<vmem>>, vector<8x16xf32>
    tpu.vector_store %arg8[%c40_502, %c0_503], %361 {strides = array<i32>} : memref<72x16xf32, #tpu.memory_space<vmem>>, vector<8x16xf32>,
    %c0_504 = arith.constant 0 : index
    %c12_505 = arith.constant 12 : index
    %363 = vector.load %arg7[%c0_504, %c12_505] : memref<8x32xf32, #tpu.memory_space<vmem>>, vector<8x16xf32>
    %c48_506 = arith.constant 48 : index
    %c0_507 = arith.constant 0 : index
    %364 = vector.load %arg8[%c48_506, %c0_507] : memref<72x16xf32, #tpu.memory_space<vmem>>, vector<8x16xf32>
    tpu.vector_store %arg8[%c48_506, %c0_507], %363 {strides = array<i32>} : memref<72x16xf32, #tpu.memory_space<vmem>>, vector<8x16xf32>,
    %c0_508 = arith.constant 0 : index
    %c14_509 = arith.constant 14 : index
    %365 = vector.load %arg7[%c0_508, %c14_509] : memref<8x32xf32, #tpu.memory_space<vmem>>, vector<8x16xf32>
    %c56_510 = arith.constant 56 : index
    %c0_511 = arith.constant 0 : index
    %366 = vector.load %arg8[%c56_510, %c0_511] : memref<72x16xf32, #tpu.memory_space<vmem>>, vector<8x16xf32>
    tpu.vector_store %arg8[%c56_510, %c0_511], %365 {strides = array<i32>} : memref<72x16xf32, #tpu.memory_space<vmem>>, vector<8x16xf32>,
    %c0_512 = arith.constant 0 : index
    %c16_513 = arith.constant 16 : index
    %367 = vector.load %arg7[%c0_512, %c16_513] : memref<8x32xf32, #tpu.memory_space<vmem>>, vector<8x16xf32>
    %c64_514 = arith.constant 64 : index
    %c0_515 = arith.constant 0 : index
    %368 = vector.load %arg8[%c64_514, %c0_515] : memref<72x16xf32, #tpu.memory_space<vmem>>, vector<8x16xf32>
    tpu.vector_store %arg8[%c64_514, %c0_515], %367 {strides = array<i32>} : memref<72x16xf32, #tpu.memory_space<vmem>>, vector<8x16xf32>,
    %c9_516 = arith.constant 9 : index
    %c0_517 = arith.constant 0 : index
    %c0_518 = arith.constant 0 : index
    %369 = vector.load %arg1[%c9_516, %c0_517, %c0_518] : memref<10x8x72xf32, #tpu.memory_space<vmem>>, vector<1x8x72xf32>
    %370 = vector.shape_cast %369 : vector<1x8x72xf32> to vector<8x72xf32>
    %c0_519 = arith.constant 0 : index
    %c0_520 = arith.constant 0 : index
    %371 = vector.load %arg8[%c0_519, %c0_520] : memref<72x16xf32, #tpu.memory_space<vmem>>, vector<72x16xf32>
    %cst_521 = arith.constant dense<0.000000e+00> : vector<8x16xf32>
    %372 = tpu.matmul %370, %371, %cst_521 {dimension_numbers = #tpu.dot_dimension_numbers<[1], [0], [0], [1], [0, 0, 1, 1], [], []>, precision = #tpu.contract_precision<fp32>} : vector<8x72xf32>, vector<72x16xf32>, vector<8x16xf32> -> vector<8x16xf32>
    %c9_522 = arith.constant 9 : index
    %c0_523 = arith.constant 0 : index
    %c0_524 = arith.constant 0 : index
    %373 = vector.load %arg2[%c9_522, %c0_523, %c0_524] : memref<10x8x1xf32, #tpu.memory_space<vmem>>, vector<1x8x1xf32>
    %374 = vector.shape_cast %373 : vector<1x8x1xf32> to vector<8x1xf32>
    %375 = vector.broadcast %374 : vector<8x1xf32> to vector<8x16xf32>
    %376 = arith.addf %372, %375 : vector<8x16xf32>
    %377 = arith.addf %302, %376 : vector<8x16xf32>
    %c0_525 = arith.constant 0 : index
    %c0_526 = arith.constant 0 : index
    %c0_527 = arith.constant 0 : index
    %378 = vector.load %arg6[%c0_525, %c0_526, %c0_527] : memref<1x8x16xf32, #tpu.memory_space<vmem>>, vector<1x8x16xf32>
    %379 = vector.shape_cast %378 : vector<1x8x16xf32> to vector<8x16xf32>
    %380 = vector.shape_cast %377 : vector<8x16xf32> to vector<1x8x16xf32>
    tpu.vector_store %arg6[%c0_525, %c0_526, %c0_527], %380 {strides = array<i32>} : memref<1x8x16xf32, #tpu.memory_space<vmem>>, vector<1x8x16xf32>,
    return
  }
  func.func @transform_0(%arg0: i32) -> (i32, i32, i32) {
    %c0_i32 = arith.constant 0 : i32
    %c0_i32_0 = arith.constant 0 : i32
    %c0_i32_1 = arith.constant 0 : i32
    %c0_i32_2 = arith.constant 0 : i32
    return %c0_i32, %c0_i32_0, %c0_i32_1 : i32, i32, i32
  }
  func.func @transform_1(%arg0: i32) -> (i32, i32, i32) {
    %c0_i32 = arith.constant 0 : i32
    %c0_i32_0 = arith.constant 0 : i32
    %c0_i32_1 = arith.constant 0 : i32
    %c0_i32_2 = arith.constant 0 : i32
    return %c0_i32, %c0_i32_0, %c0_i32_1 : i32, i32, i32
  }
  func.func @transform_2(%arg0: i32) -> (i32, i32, i32) {
    %c0_i32 = arith.constant 0 : i32
    %c0_i32_0 = arith.constant 0 : i32
    %c0_i32_1 = arith.constant 0 : i32
    %c0_i32_2 = arith.constant 0 : i32
    return %c0_i32, %c0_i32_0, %c0_i32_1 : i32, i32, i32
  }
  func.func @transform_3(%arg0: i32) -> (i32, i32, i32) {
    %c0_i32 = arith.constant 0 : i32
    %c0_i32_0 = arith.constant 0 : i32
    %c0_i32_1 = arith.constant 0 : i32
    %c0_i32_2 = arith.constant 0 : i32
    return %c0_i32, %c0_i32_0, %c0_i32_1 : i32, i32, i32
  }
  func.func @transform_4(%arg0: i32) -> (i32, i32, i32) {
    %c0_i32 = arith.constant 0 : i32
    %c0_i32_0 = arith.constant 0 : i32
    %c0_i32_1 = arith.constant 0 : i32
    return %arg0, %c0_i32, %c0_i32_0 : i32, i32, i32
  }
  func.func @transform_5(%arg0: i32) -> (i32, i32, i32) {
    %c0_i32 = arith.constant 0 : i32
    %c0_i32_0 = arith.constant 0 : i32
    %c0_i32_1 = arith.constant 0 : i32
    return %arg0, %c0_i32, %c0_i32_0 : i32, i32, i32
  }
}

</mosaic_0001>

<bundles_post_ra>
// kernel: tpu_custom_call.1
= control target key start
LH: loop header
LB: loop body
LE: loop exit
PB: predicated region body
PF: predicated region fallthrough
CT: control target
= control target key end

     0   :  { %10 = vsyncpa [#allocation5], 0  ;;  %s11382_s0 = inlined_call_operand.vmem [shape: f32[10,8,72], index: 0, kind: input, shape index: {}]   ;;  %s11383_s1 = inlined_call_operand.vmem [shape: f32[10,8,1], index: 1, kind: input, shape index: {}]   ;;  %s11384_s2 = inlined_call_operand.vmem [shape: f32[10,8,1], index: 2, kind: input, shape index: {}]   ;;  %s11385_s3 = inlined_call_operand.vmem [shape: f32[10,8,1], index: 3, kind: input, shape index: {}]   ;;  %s11386_s4 = inlined_call_operand.vmem [shape: f32[2,8,16], index: 4, kind: input, shape index: {}]   ;;  %s11387_s5 = inlined_call_operand.hbm [shape: f32[2,8,16], index: 5, kind: output, shape index: {}]  }
   0x1   :  { %12 = vsyncpa [#allocation5 + $0x1], 0  ;;  %s8794_s18 = smov 0   ;;  %s8796_s19 = smov 0  }
   0x2   :  { %s8798_s20 = smov 0   ;;  %s8800_s21 = smov 0  }
   0x3 LB: > { %s8815_s22 = sadd.s32 4294967295, %s8749_s21   ;;  %s6730_s23 = sadd.s32 4294967294, %s8749_s21   ;;  %s8749_s21 = sphi %s8800_s21, %s11402_s21   ;;  %s8745_s20 = sphi %s8798_s20, %s11401_s20   ;;  %s8741_s19 = sphi %s8796_s19, %s11400_s19   ;;  %s8737_s18 = sphi %s8794_s18, %s11399_s18  }
   0x4   : > { %s8819_s24 = sadd.s32 1, %s8749_s21   ;;  %s135_s25 = sadd.s32 1, %s8745_s20 }
   0x5   : > { %s132_s26 = ssub.s32 %s8749_s21, %s8819_s24  ;;  %p145_p0 = scmp.ne.s32.totalorder %s8745_s20, %s8741_s19 }
   0x6   : > { %p133_p1 = scmp.eq.s32.totalorder %s132_s26, 0  ;;  %p146_p2 = scmp.eq.s32.totalorder %s8815_s22, 1 }
   0x7   : > { %p151_p3 = scmp.ne.s32.totalorder %s8741_s19, %s8737_s18  ;;  %p152_p4 = scmp.eq.s32.totalorder %s6730_s23, 1 }
   0x8   : > { %s8830_s27 = scalar_select %p133_p1, %s8745_s20, %s135_s25  }
   0x9   : > { %p8832_p5 = por %p146_p2, %p145_p0  ;;  %p8836_p6 = por %p152_p4, %p151_p3 }
   0xa   : > { %p6733_p7 = scmp.ge.s32.totalorder %s8749_s21, 1  ;;  %p189_p8 = scmp.lt.s32.totalorder %s8749_s21, 3 }
   0xc   : > { %p190_p9 = pnand %p6733_p7, %p189_p8 }
   0xd   : > { %p216_p10 = scmp.lt.s32.totalorder (!%p190_p9), %s8815_s22, 1  ;;  %s8752_s10 = smov (!%p190_p9), 8  }
   0xe   : > { %193 = sbr.rel (%p190_p9) target bundleno = 5185 (0x1441), region = 40  ;;  %s8753_s11 = smov (!%p190_p9), 112  }
   0xf   : > { %s8754_s12 = smov (!%p190_p9), 114   ;;  %s8755_s13 = smov (!%p190_p9), 116  }
  0x10   : > { %s8756_s14 = smov (!%p190_p9), 118   ;;  %s8757_s15 = smov (!%p190_p9), 120  }
  0x11   : > { %s11388_s16 = smov (!%p190_p9), 122   ;;  %s11392_s17 = smov (!%p190_p9), 124  }
  0x12   : > { %s11390_s23 = smov (!%p190_p9), 126  }
  0x13   : > { %vm220_vm0 = vcmask 261120   ;;  %v8751_v0 = vmov 0.0   ;;  %s217_s30 = scalar_select %p216_p10, %s8815_s22, 1  ;;  %vm227_vm1 = vcmask 195648   ;;  %vm230_vm2 = vcmask 130048   ;;  %v290_v4 = vld [vmem:[%s11383_s1] sm:$0xff] }
  0x14   : > { %221 = vst.msk [vmem:[#allocation2] sm:$0xff] %vm220_vm0, %v8751_v0  ;;  %7376 = vmatprep.subr.mxu0 %v8751_v0  ;;  %7397 = vmatprep.subr.mxu1 %v8751_v0  ;;  %vm8761_vm3 = vmmov 0   ;;  %v850_v5 = vld [vmem:[%s11384_s2] sm:$0xff]  ;;  %v8762_v6 = vmov 0   ;;  %vm296_vm4 = vcmask 588800  }
  0x15   : > { %s6735_s6 = sshll.u32 %s217_s30, 3  ;;  %7394 = vmatprep.mubr.msk.f32.mxu0 %vm8761_vm3, %v8751_v0  ;;  %7415 = vmatprep.mubr.msk.f32.mxu1 %vm8761_vm3, %v8751_v0  ;;  %v857_v7 = vld [vmem:[%s11385_s3] sm:$0xff] }
  0x16   : > { %s219_s9 = scalar_lea.vmem %s11386_s4, %s6735_s6  ;;  %8687 = vset.pattern.permute.xlu1 %v8762_v6  ;;  %8688 = vset.pattern.permute.xlu0 %v8762_v6  ;;  %v280_v10 = vld [vmem:[%s11382_s0] sm:$0xff] }
  0x17   : > { %v222_v1 = vld [vmem:[%s219_s9] sm:$0xff]  ;;  %v298_v13 = vsel %vm296_vm4, %v280_v10, 0 }
  0x18   : > { %224 = vrot.lane.b32.xlu0 %v222_v1, %s8752_s10  ;;  %v8882_v18 = vand.u32 4294901760, %v298_v13 }
  0x1a   : > { %v8899_v27 = vsub.f32 %v298_v13, %v8882_v18 }
  0x1c   : > { %v376_v39 = vand.u32 4294901760, %v8899_v27 }
  0x1e   : > { %v377_v53 = vsub.f32 %v8899_v27, %v376_v39 }
  0x8a   : > { %v225_v2 = vpop.permute.xlu0 %224 }
  0x8b   : > { %228 = vst.msk [vmem:[#allocation2] sm:$0xff] %vm227_vm1, %v225_v2 }
  0x92   : > { %v229_v3 = vld [vmem:[#allocation2] sm:$0xff] }
  0x93   : > { %231 = vst.msk [vmem:[#allocation3] sm:$0xff] %vm230_vm2, %v229_v3  ;;  %276 = vrot.lane.b32.xlu0 %v229_v3, %s8753_s11  ;;  %270 = vrot.lane.b32.xlu1 %v229_v3, %s8754_s12 }
  0x97   : > { %264 = vrot.lane.b32.xlu1 %v229_v3, %s8755_s13  ;;  %258 = vrot.lane.b32.xlu0 %v229_v3, %s8756_s14 }
  0x9a   : > { %v281_v36 = vld [vmem:[#allocation3] sm:$0xff] }
  0x9b   : > { %252 = vrot.lane.b32.xlu1 %v229_v3, %s8757_s15  ;;  %246 = vrot.lane.b32.xlu0 %v229_v3, %s11388_s16  ;;  %v8934_v45 = vand.u32 4294901760, %v281_v36 }
  0x9d   : > { %v8964_v59 = vsub.f32 %v281_v36, %v8934_v45 }
  0x9f   : > { %240 = vrot.lane.b32.xlu1 %v229_v3, %s11392_s17  ;;  %234 = vrot.lane.b32.xlu0 %v229_v3, %s11390_s23  ;;  %v378_v3 = vand.u32 4294901760, %v377_v53  ;;  %v457_v6 = vand.u32 4294901760, %v8964_v59 }
  0xa3   : > { %293 = vperm.xlu1 %8687, %v290_v4   ;;  %853 = vperm.xlu0 %8688, %v850_v5  }
  0xa7   : > { %860 = vperm.xlu1 %8687, %v857_v7  }
 0x105   : > { %v277_v8 = vpop.permute.xlu0 %276  ;;  %v271_v9 = vpop.permute.xlu1 %270 }
 0x106   : > { %279 = vst.msk [vmem:[#allocation3 + $0x40] sm:$0xff] %vm230_vm2, %v277_v8  ;;  %273 = vst.msk [vmem:[#allocation3 + $0x38] sm:$0xff] %vm230_vm2, %v271_v9 }
 0x109   : > { %v265_v11 = vpop.permute.xlu1 %264  ;;  %v259_v12 = vpop.permute.xlu0 %258 }
 0x10a   : > { %267 = vst.msk [vmem:[#allocation3 + $0x30] sm:$0xff] %vm230_vm2, %v265_v11  ;;  %261 = vst.msk [vmem:[#allocation3 + $0x28] sm:$0xff] %vm230_vm2, %v259_v12  ;;  %v458_v11 = vsub.f32 %v8964_v59, %v457_v6 }
 0x10c   : > { %v459_v13 = vand.u32 4294901760, %v458_v11 }
 0x10d   : > { %v253_v14 = vpop.permute.xlu1 %252  ;;  %v247_v15 = vpop.permute.xlu0 %246  ;;  %v289_v16 = vld [vmem:[#allocation3 + $0x40] sm:$0xff]  ;;  %v288_v17 = vld [vmem:[#allocation3 + $0x38] sm:$0xff] }
 0x10e   : > { %255 = vst.msk [vmem:[#allocation3 + $0x20] sm:$0xff] %vm230_vm2, %v253_v14  ;;  %249 = vst.msk [vmem:[#allocation3 + $0x18] sm:$0xff] %vm230_vm2, %v247_v15  ;;  %v8886_v19 = vand.u32 4294901760, %v289_v16  ;;  %v8888_v20 = vand.u32 4294901760, %v288_v17 }
 0x110   : > { %7377 = vmatpush3.msra.mxu0 %v8886_v19  ;;  %v8892_v21 = vsub.f32 %v289_v16, %v8886_v19  ;;  %v8895_v22 = vsub.f32 %v288_v17, %v8888_v20 }
 0x111   : > { %7378 = vmatprep.subr.mxu0 %v8751_v0  ;;  %v241_v23 = vpop.permute.xlu1 %240  ;;  %v235_v24 = vpop.permute.xlu0 %234  ;;  %v287_v25 = vld [vmem:[#allocation3 + $0x30] sm:$0xff]  ;;  %v286_v26 = vld [vmem:[#allocation3 + $0x28] sm:$0xff] }
 0x112   : > { %243 = vst.msk [vmem:[#allocation3 + $0x10] sm:$0xff] %vm230_vm2, %v241_v23  ;;  %237 = vst.msk [vmem:[#allocation3 + $0x8] sm:$0xff] %vm230_vm2, %v235_v24  ;;  %7379 = vmatpush3.msra.mxu0 %v8888_v20  ;;  %v8904_v28 = vand.u32 4294901760, %v287_v25  ;;  %v8906_v29 = vand.u32 4294901760, %v286_v26  ;;  %v401_v30 = vand.u32 4294901760, %v8892_v21  ;;  %v408_v31 = vand.u32 4294901760, %v8895_v22 }
 0x113   : > { %7380 = vmatprep.subr.mxu0 %v8751_v0 }
 0x114   : > { %7381 = vmatpush3.msra.mxu0 %v8904_v28  ;;  %v402_v32 = vsub.f32 %v8892_v21, %v401_v30  ;;  %v409_v33 = vsub.f32 %v8895_v22, %v408_v31  ;;  %v8919_v34 = vsub.f32 %v287_v25, %v8904_v28  ;;  %v8922_v35 = vsub.f32 %v286_v26, %v8906_v29 }
 0x115   : > { %7382 = vmatprep.subr.mxu0 %v8751_v0  ;;  %v285_v37 = vld [vmem:[#allocation3 + $0x20] sm:$0xff]  ;;  %v284_v38 = vld [vmem:[#allocation3 + $0x18] sm:$0xff] }
 0x116   : > { %7383 = vmatpush3.msra.mxu0 %v8906_v29  ;;  %v8927_v40 = vand.u32 4294901760, %v285_v37  ;;  %v403_v41 = vand.u32 4294901760, %v402_v32  ;;  %v8929_v42 = vand.u32 4294901760, %v284_v38  ;;  %v415_v43 = vand.u32 4294901760, %v8919_v34 }
 0x117   : > { %7384 = vmatprep.subr.mxu0 %v8751_v0  ;;  %v422_v44 = vand.u32 4294901760, %v8922_v35  ;;  %v410_v46 = vand.u32 4294901760, %v409_v33 }
 0x118   : > { %7385 = vmatpush3.msra.mxu0 %v8927_v40  ;;  %7398 = vmatpush3.msra.mxu1 %v403_v41  ;;  %v8938_v47 = vsub.f32 %v285_v37, %v8927_v40  ;;  %v8941_v48 = vsub.f32 %v284_v38, %v8929_v42  ;;  %v416_v50 = vsub.f32 %v8919_v34, %v415_v43  ;;  %v6738_v41 = vld [vmem:[%s11384_s2 + $0x8] sm:$0xff] }
 0x119   : > { %7386 = vmatprep.subr.mxu0 %v8751_v0  ;;  %7399 = vmatprep.subr.mxu1 %v8751_v0  ;;  %v283_v49 = vld [vmem:[#allocation3 + $0x10] sm:$0xff]  ;;  %v282_v51 = vld [vmem:[#allocation3 + $0x8] sm:$0xff]  ;;  %v423_v52 = vsub.f32 %v8922_v35, %v422_v44 }
 0x11a   : > { %7387 = vmatpush3.msra.mxu0 %v8929_v42  ;;  %7400 = vmatpush3.msra.mxu1 %v410_v46  ;;  %v8955_v54 = vand.u32 4294901760, %v283_v49  ;;  %v8957_v55 = vand.u32 4294901760, %v282_v51  ;;  %v429_v56 = vand.u32 4294901760, %v8938_v47  ;;  %v436_v57 = vand.u32 4294901760, %v8941_v48 }
 0x11b   : > { %7388 = vmatprep.subr.mxu0 %v8751_v0  ;;  %7401 = vmatprep.subr.mxu1 %v8751_v0  ;;  %v417_v58 = vand.u32 4294901760, %v416_v50  ;;  %v424_v63 = vand.u32 4294901760, %v423_v52 }
 0x11c   : > { %7389 = vmatpush3.msra.mxu0 %v8955_v54  ;;  %v430_v60 = vsub.f32 %v8938_v47, %v429_v56  ;;  %v8971_v61 = vsub.f32 %v283_v49, %v8955_v54  ;;  %v8974_v62 = vsub.f32 %v282_v51, %v8957_v55  ;;  %v437_v1 = vsub.f32 %v8941_v48, %v436_v57 }
 0x11d   : > { %7402 = vmatpush3.msra.mxu1 %v417_v58  ;;  %7390 = vmatprep.subr.mxu0 %v8751_v0 }
 0x11e   : > { %7403 = vmatprep.subr.mxu1 %v8751_v0  ;;  %7391 = vmatpush3.msra.mxu0 %v8957_v55  ;;  %v431_v2 = vand.u32 4294901760, %v430_v60  ;;  %v443_v4 = vand.u32 4294901760, %v8971_v61  ;;  %v450_v5 = vand.u32 4294901760, %v8974_v62  ;;  %v438_v8 = vand.u32 4294901760, %v437_v1  ;;  %v294_v23 = vpop.permute.xlu1 %293 }
 0x11f   : > { %7404 = vmatpush3.msra.mxu1 %v424_v63  ;;  %7392 = vmatprep.subr.mxu0 %v8751_v0 }
 0x120   : > { %7405 = vmatprep.subr.mxu1 %v8751_v0  ;;  %7393 = vmatpush3.msra.mxu0 %v8934_v45  ;;  %v444_v7 = vsub.f32 %v8971_v61, %v443_v4  ;;  %v451_v9 = vsub.f32 %v8974_v62, %v450_v5 }
 0x121   : > { %7406 = vmatpush3.msra.mxu1 %v431_v2  ;;  %7418 = vmatprep.subr.mxu0 %v8751_v0 }
 0x122   : > { %7407 = vmatprep.subr.mxu1 %v8751_v0  ;;  %7395 = vmatmul.mubr.f32.vlgmr.msra.gmra.mxu0 %v378_v3  ;;  %v445_v10 = vand.u32 4294901760, %v444_v7  ;;  %v452_v12 = vand.u32 4294901760, %v451_v9 }
 0x123   : > { %7408 = vmatpush3.msra.mxu1 %v438_v8  ;;  %7419 = vmatpush3.msra.mxu0 %v8892_v21 }
 0x124   : > { %7409 = vmatprep.subr.mxu1 %v8751_v0  ;;  %7420 = vmatprep.subr.mxu0 %v8751_v0 }
 0x125   : > { %7410 = vmatpush3.msra.mxu1 %v445_v10  ;;  %7421 = vmatpush3.msra.mxu0 %v8895_v22 }
 0x126   : > { %7411 = vmatprep.subr.mxu1 %v8751_v0  ;;  %7422 = vmatprep.subr.mxu0 %v8751_v0 }
 0x127   : > { %7412 = vmatpush3.msra.mxu1 %v452_v12  ;;  %7423 = vmatpush3.msra.mxu0 %v8919_v34 }
 0x128   : > { %7413 = vmatprep.subr.mxu1 %v8751_v0  ;;  %7424 = vmatprep.subr.mxu0 %v8751_v0 }
 0x129   : > { %7414 = vmatpush3.msra.mxu1 %v459_v13  ;;  %7425 = vmatpush3.msra.mxu0 %v8922_v35  ;;  %v861_v35 = vpop.permute.xlu1 %860 }
 0x12a   : > { %7416 = vmatmul.mubr.f32.vlgmr.msra.gmra.mxu1 %v8882_v18  ;;  %7426 = vmatprep.subr.mxu0 %v8751_v0 }
 0x12b   : > { %7439 = vmatprep.subr.mxu1 %v8751_v0  ;;  %7427 = vmatpush3.msra.mxu0 %v8938_v47  ;;  %v6736_v47 = vld [vmem:[%s11382_s0 + $0x8] sm:$0xff] }
 0x12c   : > { %7440 = vmatpush3.msra.mxu1 %v8886_v19  ;;  %7428 = vmatprep.subr.mxu0 %v8751_v0  ;;  %v939_v50 = vsel %vm296_vm4, %v6736_v47, 0 }
 0x12d   : > { %7441 = vmatprep.subr.mxu1 %v8751_v0  ;;  %7429 = vmatpush3.msra.mxu0 %v8941_v48 }
 0x12e   : > { %7442 = vmatpush3.msra.mxu1 %v8888_v20  ;;  %7430 = vmatprep.subr.mxu0 %v8751_v0 }
 0x12f   : > { %7443 = vmatprep.subr.mxu1 %v8751_v0  ;;  %7431 = vmatpush3.msra.mxu0 %v8971_v61 }
 0x130   : > { %7444 = vmatpush3.msra.mxu1 %v8904_v28  ;;  %7432 = vmatprep.subr.mxu0 %v8751_v0 }
 0x131   : > { %7445 = vmatprep.subr.mxu1 %v8751_v0  ;;  %7433 = vmatpush3.msra.mxu0 %v8974_v62 }
 0x132   : > { %7446 = vmatpush3.msra.mxu1 %v8906_v29  ;;  %7434 = vmatprep.subr.mxu0 %v8751_v0 }
 0x133   : > { %7447 = vmatprep.subr.mxu1 %v8751_v0  ;;  %7435 = vmatpush3.msra.mxu0 %v8964_v59 }
 0x134   : > { %7436 = vmatprep.mubr.msk.f32.mxu0 %vm8761_vm3, %v8751_v0  ;;  %7448 = vmatpush3.msra.mxu1 %v8927_v40 }
 0x135   : > { %7437 = vmatmul.mubr.f32.vlgmr.msra.gmra.mxu0 %v8899_v27  ;;  %7449 = vmatprep.subr.mxu1 %v8751_v0 }
 0x136   : > { %7460 = vmatprep.subr.mxu0 %v8751_v0  ;;  %7450 = vmatpush3.msra.mxu1 %v8929_v42 }
 0x137   : > { %7461 = vmatpush3.msra.mxu0 %v401_v30  ;;  %7451 = vmatprep.subr.mxu1 %v8751_v0 }
 0x138   : > { %7462 = vmatprep.subr.mxu0 %v8751_v0  ;;  %7452 = vmatpush3.msra.mxu1 %v8955_v54 }
 0x139   : > { %7463 = vmatpush3.msra.mxu0 %v408_v31  ;;  %7453 = vmatprep.subr.mxu1 %v8751_v0  ;;  %v854_v31 = vpop.permute.xlu0 %853 }
 0x13a   : > { %7464 = vmatprep.subr.mxu0 %v8751_v0  ;;  %7454 = vmatpush3.msra.mxu1 %v8957_v55 }
 0x13b   : > { %7465 = vmatpush3.msra.mxu0 %v415_v43  ;;  %7455 = vmatprep.subr.mxu1 %v8751_v0  ;;  %v6740_v43 = vld [vmem:[%s11384_s2 + $0x10] sm:$0xff] }
 0x13c   : > { %7466 = vmatprep.subr.mxu0 %v8751_v0  ;;  %7456 = vmatpush3.msra.mxu1 %v8934_v45 }
 0x13d   : > { %7457 = vmatprep.mubr.msk.f32.mxu1 %vm8761_vm3, %v8751_v0  ;;  %7467 = vmatpush3.msra.mxu0 %v422_v44  ;;  %v6741_v44 = vld [vmem:[%s11385_s3 + $0x10] sm:$0xff] }
 0x13e   : > { %7458 = vmatmul.mubr.f32.vlgmr.msra.gmra.mxu1 %v376_v39  ;;  %7468 = vmatprep.subr.mxu0 %v8751_v0 }
 0x13f   : > { %7481 = vmatprep.subr.mxu1 %v8751_v0  ;;  %7469 = vmatpush3.msra.mxu0 %v429_v56 }
 0x140   : > { %7482 = vmatpush3.msra.mxu1 %v8886_v19  ;;  %7470 = vmatprep.subr.mxu0 %v8751_v0 }
 0x141   : > { %7483 = vmatprep.subr.mxu1 %v8751_v0  ;;  %7471 = vmatpush3.msra.mxu0 %v436_v57 }
 0x142   : > { %7484 = vmatpush3.msra.mxu1 %v8888_v20  ;;  %7472 = vmatprep.subr.mxu0 %v8751_v0 }
 0x143   : > { %7485 = vmatprep.subr.mxu1 %v8751_v0  ;;  %7473 = vmatpush3.msra.mxu0 %v443_v4 }
 0x144   : > { %7486 = vmatpush3.msra.mxu1 %v8904_v28  ;;  %7474 = vmatprep.subr.mxu0 %v8751_v0 }
 0x145   : > { %7487 = vmatprep.subr.mxu1 %v8751_v0  ;;  %7475 = vmatpush3.msra.mxu0 %v450_v5 }
 0x146   : > { %7488 = vmatpush3.msra.mxu1 %v8906_v29  ;;  %7476 = vmatprep.subr.mxu0 %v8751_v0 }
 0x147   : > { %7489 = vmatprep.subr.mxu1 %v8751_v0  ;;  %7477 = vmatpush3.msra.mxu0 %v457_v6 }
 0x148   : > { %7478 = vmatprep.mubr.msk.f32.mxu0 %vm8761_vm3, %v8751_v0  ;;  %7490 = vmatpush3.msra.mxu1 %v8927_v40  ;;  %v6737_v40 = vld [vmem:[%s11383_s1 + $0x8] sm:$0xff] }
 0x149   : > { %7479 = vmatmul.mubr.f32.vlgmr.msra.gmra.mxu0 %v8882_v18  ;;  %7491 = vmatprep.subr.mxu1 %v8751_v0 }
 0x14a   : > { %7492 = vmatpush3.msra.mxu1 %v8929_v42  ;;  %7499 = vmatprep.mubr.msk.f32.mxu1 %vm8761_vm3, %v8751_v0  ;;  %v6739_v42 = vld [vmem:[%s11385_s3 + $0x8] sm:$0xff] }
 0x14b   : > { %7493 = vmatprep.subr.mxu1 %v8751_v0  ;;  %7502 = vmatprep.subr.mxu0 %v8751_v0 }
 0x14c   : > { %7494 = vmatpush3.msra.mxu1 %v8955_v54  ;;  %7520 = vmatprep.mubr.msk.f32.mxu0 %vm8761_vm3, %v8751_v0 }
 0x14d   : > { %7495 = vmatprep.subr.mxu1 %v8751_v0 }
 0x14e   : > { %7496 = vmatpush3.msra.mxu1 %v8957_v55  ;;  %v9136_v55 = vand.u32 4294901760, %v939_v50 }
 0x14f   : > { %7497 = vmatprep.subr.mxu1 %v8751_v0 }
 0x150   : > { %7498 = vmatpush3.msra.mxu1 %v8934_v45  ;;  %v9153_v1 = vsub.f32 %v939_v50, %v9136_v55 }
 0x151   : > { %7500 = vmatmul.mubr.f32.vlgmr.msra.gmra.mxu1 %v8882_v18  ;;  %7523 = vmatprep.subr.mxu1 %v8751_v0 }
 0x152   : > { %7541 = vmatprep.mubr.msk.f32.mxu1 %vm8761_vm3, %v8751_v0  ;;  %v1017_v13 = vand.u32 4294901760, %v9153_v1 }
 0x1e2   : > { %v380_v14 = vpop.f32.mrf.mxu0 }
 0x1e3   : > { %v381_v24 = vadd.f32 %v380_v14, %v294_v23 }
 0x1e4   : > { %v7396_v15 = vpop.f32.mrf.mxu0 }
 0x1ea   : > { %v496_v16 = vpop.f32.mrf.mxu1 }
 0x1eb   : > { %v497_v26 = vadd.f32 %v496_v16, %v381_v24 }
 0x1ec   : > { %v7417_v17 = vpop.f32.mrf.mxu1 }
 0x1f5   : > { %v586_v19 = vpop.f32.mrf.mxu0 }
 0x1f6   : > { %v587_v28 = vadd.f32 %v586_v19, %v497_v26 }
 0x1f7   : > { %v7438_v20 = vpop.f32.mrf.mxu0 }
 0x1fe   : > { %v668_v21 = vpop.f32.mrf.mxu1 }
 0x1ff   : > { %v669_v18 = vadd.f32 %v668_v21, %v587_v28  ;;  %v1018_v28 = vsub.f32 %v9153_v1, %v1017_v13 }
 0x200   : > { %v7459_v22 = vpop.f32.mrf.mxu1 }
 0x209   : > { %v766_v25 = vpop.f32.mrf.mxu0 }
 0x20a   : > { %v767_v29 = vadd.f32 %v766_v25, %v669_v18 }
 0x20b   : > { %v7480_v27 = vpop.f32.mrf.mxu0 }
 0x211   : > { %v846_v30 = vpop.f32.mrf.mxu1 }
 0x212   : > { %v847_v32 = vadd.f32 %v846_v30, %v767_v29 }
 0x213   : > { %v7501_v33 = vpop.f32.mrf.mxu1 }
 0x214   : > { %v856_v34 = vmul.f32 %v854_v31, %v847_v32 }
 0x216   : > { %v863_v36 = vadd.f32 %v861_v35, %v856_v34 }
 0x218   : > { %v864_v37 = vmax.f32 %v863_v36, 0.0 }
 0x21a   : > { %866 = vrot.lane.b32.xlu1 %v864_v37, %s8752_s10 }
 0x28c   : > { %v867_v38 = vpop.permute.xlu1 %866 }
 0x28d   : > { %869 = vst.msk [vmem:[#allocation2] sm:$0xff] %vm227_vm1, %v867_v38  ;;  %v1019_v38 = vand.u32 4294901760, %v1018_v28 }
 0x294   : > { %v914_v39 = vld [vmem:[#allocation2] sm:$0xff] }
 0x295   : > { %916 = vrot.lane.b32.xlu0 %v914_v39, %s8753_s11  ;;  %910 = vrot.lane.b32.xlu1 %v914_v39, %s8754_s12  ;;  %871 = vst.msk [vmem:[#allocation3] sm:$0xff] %vm230_vm2, %v914_v39 }
 0x299   : > { %904 = vrot.lane.b32.xlu0 %v914_v39, %s8755_s13  ;;  %898 = vrot.lane.b32.xlu1 %v914_v39, %s8756_s14 }
 0x29c   : > { %v922_v10 = vld [vmem:[#allocation3] sm:$0xff] }
 0x29d   : > { %892 = vrot.lane.b32.xlu0 %v914_v39, %s8757_s15  ;;  %886 = vrot.lane.b32.xlu1 %v914_v39, %s11388_s16  ;;  %v9188_v20 = vand.u32 4294901760, %v922_v10  ;;  %s11396_s16 = smov 122  }
 0x29f   : > { %v9218_v33 = vsub.f32 %v922_v10, %v9188_v20 }
 0x2a1   : > { %880 = vrot.lane.b32.xlu0 %v914_v39, %s11392_s17  ;;  %874 = vrot.lane.b32.xlu1 %v914_v39, %s11390_s23  ;;  %s11397_s17 = smov 124   ;;  %s11398_s23 = smov 126  }
 0x2a5   : > { %935 = vperm.xlu0 %8688, %v6737_v40   ;;  %1495 = vperm.xlu1 %8687, %v6738_v41  }
 0x2a9   : > { %1503 = vperm.xlu0 %8688, %v6739_v42   ;;  %1512 = vperm.xlu1 %8687, %v6740_v43   ;;  %v1098_v43 = vand.u32 4294901760, %v9218_v33 }
 0x2ad   : > { %1520 = vperm.xlu0 %8688, %v6741_v44  }
 0x307   : > { %v917_v45 = vpop.permute.xlu0 %916  ;;  %v911_v46 = vpop.permute.xlu1 %910 }
 0x308   : > { %919 = vst.msk [vmem:[#allocation3 + $0x40] sm:$0xff] %vm230_vm2, %v917_v45  ;;  %913 = vst.msk [vmem:[#allocation3 + $0x38] sm:$0xff] %vm230_vm2, %v911_v46 }
 0x30b   : > { %v905_v48 = vpop.permute.xlu0 %904  ;;  %v899_v49 = vpop.permute.xlu1 %898 }
 0x30c   : > { %907 = vst.msk [vmem:[#allocation3 + $0x30] sm:$0xff] %vm230_vm2, %v905_v48  ;;  %901 = vst.msk [vmem:[#allocation3 + $0x28] sm:$0xff] %vm230_vm2, %v899_v49  ;;  %v1099_v48 = vsub.f32 %v9218_v33, %v1098_v43 }
 0x30e   : > { %v1100_v50 = vand.u32 4294901760, %v1099_v48 }
 0x30f   : > { %v893_v51 = vpop.permute.xlu0 %892  ;;  %v887_v52 = vpop.permute.xlu1 %886  ;;  %v930_v53 = vld [vmem:[#allocation3 + $0x40] sm:$0xff]  ;;  %v929_v54 = vld [vmem:[#allocation3 + $0x38] sm:$0xff] }
 0x310   : > { %895 = vst.msk [vmem:[#allocation3 + $0x20] sm:$0xff] %vm230_vm2, %v893_v51  ;;  %889 = vst.msk [vmem:[#allocation3 + $0x18] sm:$0xff] %vm230_vm2, %v887_v52  ;;  %v9140_v56 = vand.u32 4294901760, %v930_v53  ;;  %v9142_v57 = vand.u32 4294901760, %v929_v54 }
 0x312   : > { %7503 = vmatpush3.msra.mxu0 %v9140_v56  ;;  %v9146_v58 = vsub.f32 %v930_v53, %v9140_v56  ;;  %v9149_v59 = vsub.f32 %v929_v54, %v9142_v57 }
 0x313   : > { %7504 = vmatprep.subr.mxu0 %v8751_v0  ;;  %v881_v60 = vpop.permute.xlu0 %880  ;;  %v875_v61 = vpop.permute.xlu1 %874  ;;  %v928_v62 = vld [vmem:[#allocation3 + $0x30] sm:$0xff]  ;;  %v927_v63 = vld [vmem:[#allocation3 + $0x28] sm:$0xff] }
 0x314   : > { %883 = vst.msk [vmem:[#allocation3 + $0x10] sm:$0xff] %vm230_vm2, %v881_v60  ;;  %877 = vst.msk [vmem:[#allocation3 + $0x8] sm:$0xff] %vm230_vm2, %v875_v61  ;;  %7505 = vmatpush3.msra.mxu0 %v9142_v57  ;;  %v9158_v2 = vand.u32 4294901760, %v928_v62  ;;  %v9160_v3 = vand.u32 4294901760, %v927_v63  ;;  %v1042_v4 = vand.u32 4294901760, %v9146_v58  ;;  %v1049_v5 = vand.u32 4294901760, %v9149_v59 }
 0x315   : > { %7506 = vmatprep.subr.mxu0 %v8751_v0 }
 0x316   : > { %7507 = vmatpush3.msra.mxu0 %v9158_v2  ;;  %v9167_v6 = vsub.f32 %v928_v62, %v9158_v2  ;;  %v9170_v7 = vsub.f32 %v927_v63, %v9160_v3  ;;  %v1043_v8 = vsub.f32 %v9146_v58, %v1042_v4  ;;  %v1050_v9 = vsub.f32 %v9149_v59, %v1049_v5 }
 0x317   : > { %7508 = vmatprep.subr.mxu0 %v8751_v0  ;;  %v926_v11 = vld [vmem:[#allocation3 + $0x20] sm:$0xff]  ;;  %v925_v12 = vld [vmem:[#allocation3 + $0x18] sm:$0xff] }
 0x318   : > { %7509 = vmatpush3.msra.mxu0 %v9160_v3  ;;  %v9181_v14 = vand.u32 4294901760, %v926_v11  ;;  %v1044_v15 = vand.u32 4294901760, %v1043_v8  ;;  %v9183_v16 = vand.u32 4294901760, %v925_v12  ;;  %v1056_v17 = vand.u32 4294901760, %v9167_v6 }
 0x319   : > { %7510 = vmatprep.subr.mxu0 %v8751_v0  ;;  %v1063_v19 = vand.u32 4294901760, %v9170_v7  ;;  %v1051_v23 = vand.u32 4294901760, %v1050_v9 }
 0x31a   : > { %7511 = vmatpush3.msra.mxu0 %v9181_v14  ;;  %v9192_v21 = vsub.f32 %v926_v11, %v9181_v14  ;;  %7524 = vmatpush3.msra.mxu1 %v1044_v15  ;;  %v9195_v22 = vsub.f32 %v925_v12, %v9183_v16  ;;  %v1057_v25 = vsub.f32 %v9167_v6, %v1056_v17 }
 0x31b   : > { %7512 = vmatprep.subr.mxu0 %v8751_v0  ;;  %7525 = vmatprep.subr.mxu1 %v8751_v0  ;;  %v924_v24 = vld [vmem:[#allocation3 + $0x10] sm:$0xff]  ;;  %v1064_v26 = vsub.f32 %v9170_v7, %v1063_v19  ;;  %v923_v27 = vld [vmem:[#allocation3 + $0x8] sm:$0xff] }
 0x31c   : > { %7513 = vmatpush3.msra.mxu0 %v9183_v16  ;;  %7526 = vmatpush3.msra.mxu1 %v1051_v23  ;;  %v9209_v18 = vand.u32 4294901760, %v924_v24  ;;  %v9211_v29 = vand.u32 4294901760, %v923_v27  ;;  %v1070_v30 = vand.u32 4294901760, %v9192_v21  ;;  %v1077_v31 = vand.u32 4294901760, %v9195_v22 }
 0x31d   : > { %7514 = vmatprep.subr.mxu0 %v8751_v0  ;;  %7527 = vmatprep.subr.mxu1 %v8751_v0  ;;  %v1058_v32 = vand.u32 4294901760, %v1057_v25  ;;  %v1065_v37 = vand.u32 4294901760, %v1064_v26  ;;  %v6742_v25 = vld [vmem:[%s11382_s0 + $0x10] sm:$0xff] }
 0x31e   : > { %7515 = vmatpush3.msra.mxu0 %v9209_v18  ;;  %v9222_v34 = vsub.f32 %v924_v24, %v9209_v18  ;;  %v9225_v35 = vsub.f32 %v923_v27, %v9211_v29  ;;  %v1071_v36 = vsub.f32 %v9192_v21, %v1070_v30  ;;  %v1078_v39 = vsub.f32 %v9195_v22, %v1077_v31 }
 0x31f   : > { %7528 = vmatpush3.msra.mxu1 %v1058_v32  ;;  %7516 = vmatprep.subr.mxu0 %v8751_v0  ;;  %v1599_v28 = vsel %vm296_vm4, %v6742_v25, 0 }
 0x320   : > { %7529 = vmatprep.subr.mxu1 %v8751_v0  ;;  %7517 = vmatpush3.msra.mxu0 %v9211_v29  ;;  %v1072_v40 = vand.u32 4294901760, %v1071_v36  ;;  %v1084_v41 = vand.u32 4294901760, %v9222_v34  ;;  %v1091_v42 = vand.u32 4294901760, %v9225_v35  ;;  %v1079_v45 = vand.u32 4294901760, %v1078_v39  ;;  %v936_v60 = vpop.permute.xlu0 %935 }
 0x321   : > { %7530 = vmatpush3.msra.mxu1 %v1065_v37  ;;  %7518 = vmatprep.subr.mxu0 %v8751_v0  ;;  %v9389_v32 = vand.u32 4294901760, %v1599_v28 }
 0x322   : > { %7531 = vmatprep.subr.mxu1 %v8751_v0  ;;  %7519 = vmatpush3.msra.mxu0 %v9188_v20  ;;  %v1085_v44 = vsub.f32 %v9222_v34, %v1084_v41  ;;  %v1092_v46 = vsub.f32 %v9225_v35, %v1091_v42 }
 0x323   : > { %7532 = vmatpush3.msra.mxu1 %v1072_v40  ;;  %7521 = vmatmul.mubr.f32.vlgmr.msra.gmra.mxu0 %v1019_v38 }
 0x324   : > { %7533 = vmatprep.subr.mxu1 %v8751_v0  ;;  %7544 = vmatprep.subr.mxu0 %v8751_v0  ;;  %v1086_v47 = vand.u32 4294901760, %v1085_v44  ;;  %v1093_v49 = vand.u32 4294901760, %v1092_v46  ;;  %v1504_v9 = vpop.permute.xlu0 %1503 }
 0x325   : > { %7534 = vmatpush3.msra.mxu1 %v1079_v45  ;;  %7545 = vmatpush3.msra.mxu0 %v9146_v58 }
 0x326   : > { %7535 = vmatprep.subr.mxu1 %v8751_v0  ;;  %7546 = vmatprep.subr.mxu0 %v8751_v0 }
 0x327   : > { %7536 = vmatpush3.msra.mxu1 %v1086_v47  ;;  %7547 = vmatpush3.msra.mxu0 %v9149_v59 }
 0x328   : > { %7537 = vmatprep.subr.mxu1 %v8751_v0  ;;  %7548 = vmatprep.subr.mxu0 %v8751_v0 }
 0x329   : > { %7538 = vmatpush3.msra.mxu1 %v1093_v49  ;;  %7549 = vmatpush3.msra.mxu0 %v9167_v6  ;;  %v1496_v6 = vpop.permute.xlu1 %1495 }
 0x32a   : > { %7539 = vmatprep.subr.mxu1 %v8751_v0  ;;  %7550 = vmatprep.subr.mxu0 %v8751_v0 }
 0x32b   : > { %7540 = vmatpush3.msra.mxu1 %v1100_v50  ;;  %7551 = vmatpush3.msra.mxu0 %v9170_v7 }
 0x32c   : > { %7542 = vmatmul.mubr.f32.vlgmr.msra.gmra.mxu1 %v9136_v55  ;;  %7552 = vmatprep.subr.mxu0 %v8751_v0 }
 0x32d   : > { %7565 = vmatprep.subr.mxu1 %v8751_v0  ;;  %7553 = vmatpush3.msra.mxu0 %v9192_v21  ;;  %v1513_v12 = vpop.permute.xlu1 %1512  ;;  %v6744_v21 = vld [vmem:[%s11384_s2 + $0x18] sm:$0xff] }
 0x32e   : > { %7566 = vmatpush3.msra.mxu1 %v9140_v56  ;;  %7554 = vmatprep.subr.mxu0 %v8751_v0 }
 0x32f   : > { %7567 = vmatprep.subr.mxu1 %v8751_v0  ;;  %7555 = vmatpush3.msra.mxu0 %v9195_v22  ;;  %v6745_v22 = vld [vmem:[%s11385_s3 + $0x18] sm:$0xff] }
 0x330   : > { %7568 = vmatpush3.msra.mxu1 %v9142_v57  ;;  %7556 = vmatprep.subr.mxu0 %v8751_v0 }
 0x331   : > { %7569 = vmatprep.subr.mxu1 %v8751_v0  ;;  %7557 = vmatpush3.msra.mxu0 %v9222_v34 }
 0x332   : > { %7570 = vmatpush3.msra.mxu1 %v9158_v2  ;;  %7558 = vmatprep.subr.mxu0 %v8751_v0 }
 0x333   : > { %7571 = vmatprep.subr.mxu1 %v8751_v0  ;;  %7559 = vmatpush3.msra.mxu0 %v9225_v35 }
 0x334   : > { %7572 = vmatpush3.msra.mxu1 %v9160_v3  ;;  %7560 = vmatprep.subr.mxu0 %v8751_v0 }
 0x335   : > { %7573 = vmatprep.subr.mxu1 %v8751_v0  ;;  %7561 = vmatpush3.msra.mxu0 %v9218_v33 }
 0x336   : > { %7562 = vmatprep.mubr.msk.f32.mxu0 %vm8761_vm3, %v8751_v0  ;;  %7574 = vmatpush3.msra.mxu1 %v9181_v14 }
 0x337   : > { %7563 = vmatmul.mubr.f32.vlgmr.msra.gmra.mxu0 %v9153_v1  ;;  %7575 = vmatprep.subr.mxu1 %v8751_v0 }
 0x338   : > { %7586 = vmatprep.subr.mxu0 %v8751_v0  ;;  %7576 = vmatpush3.msra.mxu1 %v9183_v16 }
 0x339   : > { %7587 = vmatpush3.msra.mxu0 %v1042_v4  ;;  %7577 = vmatprep.subr.mxu1 %v8751_v0 }
 0x33a   : > { %7588 = vmatprep.subr.mxu0 %v8751_v0  ;;  %7578 = vmatpush3.msra.mxu1 %v9209_v18 }
 0x33b   : > { %7589 = vmatpush3.msra.mxu0 %v1049_v5  ;;  %7579 = vmatprep.subr.mxu1 %v8751_v0 }
 0x33c   : > { %7590 = vmatprep.subr.mxu0 %v8751_v0  ;;  %7580 = vmatpush3.msra.mxu1 %v9211_v29 }
 0x33d   : > { %7591 = vmatpush3.msra.mxu0 %v1056_v17  ;;  %7581 = vmatprep.subr.mxu1 %v8751_v0 }
 0x33e   : > { %7592 = vmatprep.subr.mxu0 %v8751_v0  ;;  %7582 = vmatpush3.msra.mxu1 %v9188_v20 }
 0x33f   : > { %7583 = vmatprep.mubr.msk.f32.mxu1 %vm8761_vm3, %v8751_v0  ;;  %7593 = vmatpush3.msra.mxu0 %v1063_v19 }
 0x340   : > { %7584 = vmatmul.mubr.f32.vlgmr.msra.gmra.mxu1 %v1017_v13  ;;  %7594 = vmatprep.subr.mxu0 %v8751_v0 }
 0x341   : > { %7607 = vmatprep.subr.mxu1 %v8751_v0  ;;  %7595 = vmatpush3.msra.mxu0 %v1070_v30 }
 0x342   : > { %7608 = vmatpush3.msra.mxu1 %v9140_v56  ;;  %7596 = vmatprep.subr.mxu0 %v8751_v0 }
 0x343   : > { %7609 = vmatprep.subr.mxu1 %v8751_v0  ;;  %7597 = vmatpush3.msra.mxu0 %v1077_v31 }
 0x344   : > { %7610 = vmatpush3.msra.mxu1 %v9142_v57  ;;  %7598 = vmatprep.subr.mxu0 %v8751_v0 }
 0x345   : > { %7611 = vmatprep.subr.mxu1 %v8751_v0  ;;  %7599 = vmatpush3.msra.mxu0 %v1084_v41  ;;  %v9406_v41 = vsub.f32 %v1599_v28, %v9389_v32 }
 0x346   : > { %7612 = vmatpush3.msra.mxu1 %v9158_v2  ;;  %7600 = vmatprep.subr.mxu0 %v8751_v0 }
 0x347   : > { %7613 = vmatprep.subr.mxu1 %v8751_v0  ;;  %7601 = vmatpush3.msra.mxu0 %v1091_v42 }
 0x348   : > { %7614 = vmatpush3.msra.mxu1 %v9160_v3  ;;  %7602 = vmatprep.subr.mxu0 %v8751_v0 }
 0x349   : > { %7615 = vmatprep.subr.mxu1 %v8751_v0  ;;  %7603 = vmatpush3.msra.mxu0 %v1098_v43 }
 0x34a   : > { %7604 = vmatprep.mubr.msk.f32.mxu0 %vm8761_vm3, %v8751_v0  ;;  %7616 = vmatpush3.msra.mxu1 %v9181_v14  ;;  %v1521_v14 = vpop.permute.xlu0 %1520 }
 0x34b   : > { %7605 = vmatmul.mubr.f32.vlgmr.msra.gmra.mxu0 %v9136_v55  ;;  %7617 = vmatprep.subr.mxu1 %v8751_v0 }
 0x34c   : > { %7618 = vmatpush3.msra.mxu1 %v9183_v16  ;;  %7625 = vmatprep.mubr.msk.f32.mxu1 %vm8761_vm3, %v8751_v0 }
 0x34d   : > { %7619 = vmatprep.subr.mxu1 %v8751_v0  ;;  %7628 = vmatprep.subr.mxu0 %v8751_v0 }
 0x34e   : > { %7620 = vmatpush3.msra.mxu1 %v9209_v18  ;;  %7646 = vmatprep.mubr.msk.f32.mxu0 %vm8761_vm3, %v8751_v0 }
 0x34f   : > { %7621 = vmatprep.subr.mxu1 %v8751_v0 }
 0x350   : > { %7622 = vmatpush3.msra.mxu1 %v9211_v29 }
 0x351   : > { %7623 = vmatprep.subr.mxu1 %v8751_v0 }
 0x352   : > { %7624 = vmatpush3.msra.mxu1 %v9188_v20  ;;  %v6743_v20 = vld [vmem:[%s11383_s1 + $0x10] sm:$0xff] }
 0x353   : > { %7626 = vmatmul.mubr.f32.vlgmr.msra.gmra.mxu1 %v9136_v55  ;;  %7649 = vmatprep.subr.mxu1 %v8751_v0 }
 0x354   : > { %7667 = vmatprep.mubr.msk.f32.mxu1 %vm8761_vm3, %v8751_v0 }
 0x3e3   : > { %v1021_v51 = vpop.f32.mrf.mxu0 }
 0x3e4   : > { %v1022_v61 = vadd.f32 %v1021_v51, %v936_v60 }
 0x3e5   : > { %v7522_v52 = vpop.f32.mrf.mxu0 }
 0x3ec   : > { %v1137_v53 = vpop.f32.mrf.mxu1 }
 0x3ed   : > { %v1138_v63 = vadd.f32 %v1137_v53, %v1022_v61  ;;  %v1677_v53 = vand.u32 4294901760, %v9406_v41 }
 0x3ee   : > { %v7543_v54 = vpop.f32.mrf.mxu1 }
 0x3f7   : > { %v1227_v56 = vpop.f32.mrf.mxu0 }
 0x3f8   : > { %v1228_v2 = vadd.f32 %v1227_v56, %v1138_v63 }
 0x3f9   : > { %v7564_v57 = vpop.f32.mrf.mxu0 }
 0x400   : > { %v1309_v58 = vpop.f32.mrf.mxu1 }
 0x401   : > { %v1310_v55 = vadd.f32 %v1309_v58, %v1228_v2 }
 0x402   : > { %v7585_v59 = vpop.f32.mrf.mxu1 }
 0x40b   : > { %v1407_v62 = vpop.f32.mrf.mxu0 }
 0x40c   : > { %v1408_v3 = vadd.f32 %v1407_v62, %v1310_v55 }
 0x40d   : > { %v7606_v1 = vpop.f32.mrf.mxu0 }
 0x413   : > { %v1487_v4 = vpop.f32.mrf.mxu1 }
 0x414   : > { %v1488_v5 = vadd.f32 %v1487_v4, %v1408_v3  ;;  %v1678_v4 = vsub.f32 %v9406_v41, %v1677_v53 }
 0x415   : > { %v7627_v7 = vpop.f32.mrf.mxu1 }
 0x416   : > { %v1498_v8 = vmul.f32 %v1496_v6, %v1488_v5 }
 0x418   : > { %v9356_v10 = vadd.f32 %v1504_v9, %v1498_v8 }
 0x41a   : > { %v1507_v11 = vmax.f32 %v9356_v10, 0.0  ;;  %v6751_v10 = vld [vmem:[%s11383_s1 + $0x20] sm:$0xff] }
 0x41c   : > { %v1515_v13 = vmul.f32 %v1513_v12, %v1507_v11 }
 0x41e   : > { %v1523_v15 = vadd.f32 %v1521_v14, %v1515_v13 }
 0x420   : > { %v1524_v16 = vmax.f32 %v1523_v15, 0.0 }
 0x422   : > { %1526 = vrot.lane.b32.xlu1 %v1524_v16, %s8752_s10 }
 0x494   : > { %v1527_v17 = vpop.permute.xlu1 %1526 }
 0x495   : > { %1529 = vst.msk [vmem:[#allocation2] sm:$0xff] %vm227_vm1, %v1527_v17  ;;  %v1679_v17 = vand.u32 4294901760, %v1678_v4 }
 0x49c   : > { %v1574_v19 = vld [vmem:[#allocation2] sm:$0xff] }
 0x49d   : > { %1576 = vrot.lane.b32.xlu0 %v1574_v19, %s8753_s11  ;;  %1570 = vrot.lane.b32.xlu1 %v1574_v19, %s8754_s12  ;;  %1531 = vst.msk [vmem:[#allocation3] sm:$0xff] %vm230_vm2, %v1574_v19 }
 0x4a1   : > { %1564 = vrot.lane.b32.xlu0 %v1574_v19, %s8755_s13  ;;  %1558 = vrot.lane.b32.xlu1 %v1574_v19, %s8756_s14 }
 0x4a4   : > { %v1582_v50 = vld [vmem:[#allocation3] sm:$0xff] }
 0x4a5   : > { %1552 = vrot.lane.b32.xlu0 %v1574_v19, %s8757_s15  ;;  %1546 = vrot.lane.b32.xlu1 %v1574_v19, %s11396_s16  ;;  %v9441_v60 = vand.u32 4294901760, %v1582_v50 }
 0x4a7   : > { %v9471_v12 = vsub.f32 %v1582_v50, %v9441_v60 }
 0x4a9   : > { %1540 = vrot.lane.b32.xlu0 %v1574_v19, %s11397_s17  ;;  %1534 = vrot.lane.b32.xlu1 %v1574_v19, %s11398_s23 }
 0x4ad   : > { %1595 = vperm.xlu0 %8688, %v6743_v20   ;;  %2155 = vperm.xlu1 %8687, %v6744_v21  }
 0x4b1   : > { %2163 = vperm.xlu0 %8688, %v6745_v22  }
 0x50f   : > { %v1577_v23 = vpop.permute.xlu0 %1576  ;;  %v1571_v24 = vpop.permute.xlu1 %1570 }
 0x510   : > { %1579 = vst.msk [vmem:[#allocation3 + $0x40] sm:$0xff] %vm230_vm2, %v1577_v23  ;;  %1573 = vst.msk [vmem:[#allocation3 + $0x38] sm:$0xff] %vm230_vm2, %v1571_v24  ;;  %v1758_v23 = vand.u32 4294901760, %v9471_v12 }
 0x512   : > { %v1759_v28 = vsub.f32 %v9471_v12, %v1758_v23 }
 0x513   : > { %v1565_v26 = vpop.permute.xlu0 %1564  ;;  %v1559_v27 = vpop.permute.xlu1 %1558 }
 0x514   : > { %1567 = vst.msk [vmem:[#allocation3 + $0x30] sm:$0xff] %vm230_vm2, %v1565_v26  ;;  %1561 = vst.msk [vmem:[#allocation3 + $0x28] sm:$0xff] %vm230_vm2, %v1559_v27 }
 0x517   : > { %v1553_v18 = vpop.permute.xlu0 %1552  ;;  %v1547_v29 = vpop.permute.xlu1 %1546  ;;  %v1590_v30 = vld [vmem:[#allocation3 + $0x40] sm:$0xff]  ;;  %v1589_v31 = vld [vmem:[#allocation3 + $0x38] sm:$0xff] }
 0x518   : > { %1555 = vst.msk [vmem:[#allocation3 + $0x20] sm:$0xff] %vm230_vm2, %v1553_v18  ;;  %1549 = vst.msk [vmem:[#allocation3 + $0x18] sm:$0xff] %vm230_vm2, %v1547_v29  ;;  %v9393_v33 = vand.u32 4294901760, %v1590_v30  ;;  %v9395_v34 = vand.u32 4294901760, %v1589_v31  ;;  %v1760_v29 = vand.u32 4294901760, %v1759_v28 }
 0x51a   : > { %7629 = vmatpush3.msra.mxu0 %v9393_v33  ;;  %v9399_v35 = vsub.f32 %v1590_v30, %v9393_v33  ;;  %v9402_v36 = vsub.f32 %v1589_v31, %v9395_v34 }
 0x51b   : > { %7630 = vmatprep.subr.mxu0 %v8751_v0  ;;  %v1541_v37 = vpop.permute.xlu0 %1540  ;;  %v1535_v38 = vpop.permute.xlu1 %1534  ;;  %v1588_v39 = vld [vmem:[#allocation3 + $0x30] sm:$0xff]  ;;  %v1587_v40 = vld [vmem:[#allocation3 + $0x28] sm:$0xff] }
 0x51c   : > { %1543 = vst.msk [vmem:[#allocation3 + $0x10] sm:$0xff] %vm230_vm2, %v1541_v37  ;;  %1537 = vst.msk [vmem:[#allocation3 + $0x8] sm:$0xff] %vm230_vm2, %v1535_v38  ;;  %7631 = vmatpush3.msra.mxu0 %v9395_v34  ;;  %v9411_v42 = vand.u32 4294901760, %v1588_v39  ;;  %v9413_v43 = vand.u32 4294901760, %v1587_v40  ;;  %v1702_v44 = vand.u32 4294901760, %v9399_v35  ;;  %v1709_v45 = vand.u32 4294901760, %v9402_v36 }
 0x51d   : > { %7632 = vmatprep.subr.mxu0 %v8751_v0 }
 0x51e   : > { %7633 = vmatpush3.msra.mxu0 %v9411_v42  ;;  %v9420_v46 = vsub.f32 %v1588_v39, %v9411_v42  ;;  %v9423_v47 = vsub.f32 %v1587_v40, %v9413_v43  ;;  %v1703_v48 = vsub.f32 %v9399_v35, %v1702_v44  ;;  %v1710_v49 = vsub.f32 %v9402_v36, %v1709_v45 }
 0x51f   : > { %7634 = vmatprep.subr.mxu0 %v8751_v0  ;;  %v1586_v51 = vld [vmem:[#allocation3 + $0x20] sm:$0xff]  ;;  %v1585_v52 = vld [vmem:[#allocation3 + $0x18] sm:$0xff] }
 0x520   : > { %7635 = vmatpush3.msra.mxu0 %v9413_v43  ;;  %v9434_v54 = vand.u32 4294901760, %v1586_v51  ;;  %v1704_v56 = vand.u32 4294901760, %v1703_v48  ;;  %v9436_v57 = vand.u32 4294901760, %v1585_v52  ;;  %v1716_v58 = vand.u32 4294901760, %v9420_v46 }
 0x521   : > { %7636 = vmatprep.subr.mxu0 %v8751_v0  ;;  %v1723_v59 = vand.u32 4294901760, %v9423_v47  ;;  %v1711_v63 = vand.u32 4294901760, %v1710_v49 }
 0x522   : > { %7637 = vmatpush3.msra.mxu0 %v9434_v54  ;;  %v9445_v61 = vsub.f32 %v1586_v51, %v9434_v54  ;;  %7650 = vmatpush3.msra.mxu1 %v1704_v56  ;;  %v9448_v62 = vsub.f32 %v1585_v52, %v9436_v57  ;;  %v1717_v2 = vsub.f32 %v9420_v46, %v1716_v58 }
 0x523   : > { %7638 = vmatprep.subr.mxu0 %v8751_v0  ;;  %7651 = vmatprep.subr.mxu1 %v8751_v0  ;;  %v1584_v1 = vld [vmem:[#allocation3 + $0x10] sm:$0xff]  ;;  %v1724_v55 = vsub.f32 %v9423_v47, %v1723_v59  ;;  %v1583_v3 = vld [vmem:[#allocation3 + $0x8] sm:$0xff] }
 0x524   : > { %7639 = vmatpush3.msra.mxu0 %v9436_v57  ;;  %7652 = vmatpush3.msra.mxu1 %v1711_v63  ;;  %v9462_v5 = vand.u32 4294901760, %v1584_v1  ;;  %v9464_v6 = vand.u32 4294901760, %v1583_v3  ;;  %v1730_v7 = vand.u32 4294901760, %v9445_v61  ;;  %v1737_v8 = vand.u32 4294901760, %v9448_v62 }
 0x525   : > { %7640 = vmatprep.subr.mxu0 %v8751_v0  ;;  %7653 = vmatprep.subr.mxu1 %v8751_v0  ;;  %v1718_v9 = vand.u32 4294901760, %v1717_v2  ;;  %v1725_v16 = vand.u32 4294901760, %v1724_v55 }
 0x526   : > { %7641 = vmatpush3.msra.mxu0 %v9462_v5  ;;  %v9475_v13 = vsub.f32 %v1584_v1, %v9462_v5  ;;  %v9478_v14 = vsub.f32 %v1583_v3, %v9464_v6  ;;  %v1731_v15 = vsub.f32 %v9445_v61, %v1730_v7  ;;  %v1738_v19 = vsub.f32 %v9448_v62, %v1737_v8 }
 0x527   : > { %7654 = vmatpush3.msra.mxu1 %v1718_v9  ;;  %7642 = vmatprep.subr.mxu0 %v8751_v0 }
 0x528   : > { %7655 = vmatprep.subr.mxu1 %v8751_v0  ;;  %7643 = vmatpush3.msra.mxu0 %v9464_v6  ;;  %v1732_v20 = vand.u32 4294901760, %v1731_v15  ;;  %v1744_v21 = vand.u32 4294901760, %v9475_v13  ;;  %v1751_v22 = vand.u32 4294901760, %v9478_v14  ;;  %v1739_v25 = vand.u32 4294901760, %v1738_v19  ;;  %v1596_v39 = vpop.permute.xlu0 %1595  ;;  %v2156_v48 = vpop.permute.xlu1 %2155 }
 0x529   : > { %7656 = vmatpush3.msra.mxu1 %v1725_v16  ;;  %7644 = vmatprep.subr.mxu0 %v8751_v0 }
 0x52a   : > { %7657 = vmatprep.subr.mxu1 %v8751_v0  ;;  %7645 = vmatpush3.msra.mxu0 %v9441_v60  ;;  %v1745_v24 = vsub.f32 %v9475_v13, %v1744_v21  ;;  %v1752_v26 = vsub.f32 %v9478_v14, %v1751_v22 }
 0x52b   : > { %7658 = vmatpush3.msra.mxu1 %v1732_v20  ;;  %7647 = vmatmul.mubr.f32.vlgmr.msra.gmra.mxu0 %v1679_v17 }
 0x52c   : > { %7659 = vmatprep.subr.mxu1 %v8751_v0  ;;  %7670 = vmatprep.subr.mxu0 %v8751_v0  ;;  %v1746_v27 = vand.u32 4294901760, %v1745_v24  ;;  %v1753_v18 = vand.u32 4294901760, %v1752_v26  ;;  %v2164_v51 = vpop.permute.xlu0 %2163 }
 0x52d   : > { %7660 = vmatpush3.msra.mxu1 %v1739_v25  ;;  %7671 = vmatpush3.msra.mxu0 %v9399_v35 }
 0x52e   : > { %7661 = vmatprep.subr.mxu1 %v8751_v0  ;;  %7672 = vmatprep.subr.mxu0 %v8751_v0 }
 0x52f   : > { %7662 = vmatpush3.msra.mxu1 %v1746_v27  ;;  %7673 = vmatpush3.msra.mxu0 %v9402_v36 }
 0x530   : > { %7663 = vmatprep.subr.mxu1 %v8751_v0  ;;  %7674 = vmatprep.subr.mxu0 %v8751_v0 }
 0x531   : > { %7664 = vmatpush3.msra.mxu1 %v1753_v18  ;;  %7675 = vmatpush3.msra.mxu0 %v9420_v46 }
 0x532   : > { %7665 = vmatprep.subr.mxu1 %v8751_v0  ;;  %7676 = vmatprep.subr.mxu0 %v8751_v0 }
 0x533   : > { %7666 = vmatpush3.msra.mxu1 %v1760_v29  ;;  %7677 = vmatpush3.msra.mxu0 %v9423_v47 }
 0x534   : > { %7668 = vmatmul.mubr.f32.vlgmr.msra.gmra.mxu1 %v9389_v32  ;;  %7678 = vmatprep.subr.mxu0 %v8751_v0 }
 0x535   : > { %7691 = vmatprep.subr.mxu1 %v8751_v0  ;;  %7679 = vmatpush3.msra.mxu0 %v9445_v61 }
 0x536   : > { %7692 = vmatpush3.msra.mxu1 %v9393_v33  ;;  %7680 = vmatprep.subr.mxu0 %v8751_v0 }
 0x537   : > { %7693 = vmatprep.subr.mxu1 %v8751_v0  ;;  %7681 = vmatpush3.msra.mxu0 %v9448_v62  ;;  %v6746_v62 = vld [vmem:[%s11382_s0 + $0x18] sm:$0xff] }
 0x538   : > { %7694 = vmatpush3.msra.mxu1 %v9395_v34  ;;  %7682 = vmatprep.subr.mxu0 %v8751_v0  ;;  %v2242_v2 = vsel %vm296_vm4, %v6746_v62, 0 }
 0x539   : > { %7695 = vmatprep.subr.mxu1 %v8751_v0  ;;  %7683 = vmatpush3.msra.mxu0 %v9475_v13 }
 0x53a   : > { %7696 = vmatpush3.msra.mxu1 %v9411_v42  ;;  %7684 = vmatprep.subr.mxu0 %v8751_v0 }
 0x53b   : > { %7697 = vmatprep.subr.mxu1 %v8751_v0  ;;  %7685 = vmatpush3.msra.mxu0 %v9478_v14 }
 0x53c   : > { %7698 = vmatpush3.msra.mxu1 %v9413_v43  ;;  %7686 = vmatprep.subr.mxu0 %v8751_v0 }
 0x53d   : > { %7699 = vmatprep.subr.mxu1 %v8751_v0  ;;  %7687 = vmatpush3.msra.mxu0 %v9471_v12 }
 0x53e   : > { %7688 = vmatprep.mubr.msk.f32.mxu0 %vm8761_vm3, %v8751_v0  ;;  %7700 = vmatpush3.msra.mxu1 %v9434_v54 }
 0x53f   : > { %7689 = vmatmul.mubr.f32.vlgmr.msra.gmra.mxu0 %v9406_v41  ;;  %7701 = vmatprep.subr.mxu1 %v8751_v0 }
 0x540   : > { %7712 = vmatprep.subr.mxu0 %v8751_v0  ;;  %7702 = vmatpush3.msra.mxu1 %v9436_v57 }
 0x541   : > { %7713 = vmatpush3.msra.mxu0 %v1702_v44  ;;  %7703 = vmatprep.subr.mxu1 %v8751_v0 }
 0x542   : > { %7714 = vmatprep.subr.mxu0 %v8751_v0  ;;  %7704 = vmatpush3.msra.mxu1 %v9462_v5 }
 0x543   : > { %7715 = vmatpush3.msra.mxu0 %v1709_v45  ;;  %7705 = vmatprep.subr.mxu1 %v8751_v0 }
 0x544   : > { %7716 = vmatprep.subr.mxu0 %v8751_v0  ;;  %7706 = vmatpush3.msra.mxu1 %v9464_v6 }
 0x545   : > { %7717 = vmatpush3.msra.mxu0 %v1716_v58  ;;  %7707 = vmatprep.subr.mxu1 %v8751_v0  ;;  %v6748_v58 = vld [vmem:[%s11384_s2 + $0x20] sm:$0xff] }
 0x546   : > { %7718 = vmatprep.subr.mxu0 %v8751_v0  ;;  %7708 = vmatpush3.msra.mxu1 %v9441_v60 }
 0x547   : > { %7709 = vmatprep.mubr.msk.f32.mxu1 %vm8761_vm3, %v8751_v0  ;;  %7719 = vmatpush3.msra.mxu0 %v1723_v59  ;;  %v6749_v59 = vld [vmem:[%s11385_s3 + $0x20] sm:$0xff] }
 0x548   : > { %7710 = vmatmul.mubr.f32.vlgmr.msra.gmra.mxu1 %v1677_v53  ;;  %7720 = vmatprep.subr.mxu0 %v8751_v0 }
 0x549   : > { %7733 = vmatprep.subr.mxu1 %v8751_v0  ;;  %7721 = vmatpush3.msra.mxu0 %v1730_v7 }
 0x54a   : > { %7734 = vmatpush3.msra.mxu1 %v9393_v33  ;;  %7722 = vmatprep.subr.mxu0 %v8751_v0 }
 0x54b   : > { %7735 = vmatprep.subr.mxu1 %v8751_v0  ;;  %7723 = vmatpush3.msra.mxu0 %v1737_v8 }
 0x54c   : > { %7736 = vmatpush3.msra.mxu1 %v9395_v34  ;;  %7724 = vmatprep.subr.mxu0 %v8751_v0 }
 0x54d   : > { %7737 = vmatprep.subr.mxu1 %v8751_v0  ;;  %7725 = vmatpush3.msra.mxu0 %v1744_v21 }
 0x54e   : > { %7738 = vmatpush3.msra.mxu1 %v9411_v42  ;;  %7726 = vmatprep.subr.mxu0 %v8751_v0 }
 0x54f   : > { %7739 = vmatprep.subr.mxu1 %v8751_v0  ;;  %7727 = vmatpush3.msra.mxu0 %v1751_v22 }
 0x550   : > { %7740 = vmatpush3.msra.mxu1 %v9413_v43  ;;  %7728 = vmatprep.subr.mxu0 %v8751_v0 }
 0x551   : > { %7741 = vmatprep.subr.mxu1 %v8751_v0  ;;  %7729 = vmatpush3.msra.mxu0 %v1758_v23 }
 0x552   : > { %7730 = vmatprep.mubr.msk.f32.mxu0 %vm8761_vm3, %v8751_v0  ;;  %7742 = vmatpush3.msra.mxu1 %v9434_v54 }
 0x553   : > { %7731 = vmatmul.mubr.f32.vlgmr.msra.gmra.mxu0 %v9389_v32  ;;  %7743 = vmatprep.subr.mxu1 %v8751_v0 }
 0x554   : > { %7744 = vmatpush3.msra.mxu1 %v9436_v57  ;;  %7751 = vmatprep.mubr.msk.f32.mxu1 %vm8761_vm3, %v8751_v0  ;;  %v6747_v57 = vld [vmem:[%s11383_s1 + $0x18] sm:$0xff] }
 0x555   : > { %7745 = vmatprep.subr.mxu1 %v8751_v0  ;;  %7754 = vmatprep.subr.mxu0 %v8751_v0 }
 0x556   : > { %7746 = vmatpush3.msra.mxu1 %v9462_v5  ;;  %7772 = vmatprep.mubr.msk.f32.mxu0 %vm8761_vm3, %v8751_v0 }
 0x557   : > { %7747 = vmatprep.subr.mxu1 %v8751_v0 }
 0x558   : > { %7748 = vmatpush3.msra.mxu1 %v9464_v6  ;;  %v9637_v6 = vand.u32 4294901760, %v2242_v2 }
 0x559   : > { %7749 = vmatprep.subr.mxu1 %v8751_v0 }
 0x55a   : > { %7750 = vmatpush3.msra.mxu1 %v9441_v60  ;;  %v9654_v17 = vsub.f32 %v2242_v2, %v9637_v6 }
 0x55b   : > { %7752 = vmatmul.mubr.f32.vlgmr.msra.gmra.mxu1 %v9389_v32  ;;  %7775 = vmatprep.subr.mxu1 %v8751_v0 }
 0x55c   : > { %7793 = vmatprep.mubr.msk.f32.mxu1 %vm8761_vm3, %v8751_v0  ;;  %v2320_v29 = vand.u32 4294901760, %v9654_v17 }
 0x5eb   : > { %v1681_v30 = vpop.f32.mrf.mxu0 }
 0x5ec   : > { %v1682_v40 = vadd.f32 %v1681_v30, %v1596_v39 }
 0x5ed   : > { %v7648_v31 = vpop.f32.mrf.mxu0 }
 0x5f4   : > { %v1797_v33 = vpop.f32.mrf.mxu1 }
 0x5f5   : > { %v1798_v42 = vadd.f32 %v1797_v33, %v1682_v40 }
 0x5f6   : > { %v7669_v34 = vpop.f32.mrf.mxu1 }
 0x5ff   : > { %v1887_v35 = vpop.f32.mrf.mxu0 }
 0x600   : > { %v1888_v44 = vadd.f32 %v1887_v35, %v1798_v42 }
 0x601   : > { %v7690_v36 = vpop.f32.mrf.mxu0 }
 0x608   : > { %v1969_v37 = vpop.f32.mrf.mxu1 }
 0x609   : > { %v1970_v32 = vadd.f32 %v1969_v37, %v1888_v44  ;;  %v2321_v44 = vsub.f32 %v9654_v17, %v2320_v29 }
 0x60a   : > { %v7711_v38 = vpop.f32.mrf.mxu1 }
 0x613   : > { %v2067_v41 = vpop.f32.mrf.mxu0 }
 0x614   : > { %v2068_v45 = vadd.f32 %v2067_v41, %v1970_v32 }
 0x615   : > { %v7732_v43 = vpop.f32.mrf.mxu0 }
 0x61b   : > { %v2147_v46 = vpop.f32.mrf.mxu1 }
 0x61c   : > { %v2148_v47 = vadd.f32 %v2147_v46, %v2068_v45 }
 0x61d   : > { %v7753_v49 = vpop.f32.mrf.mxu1 }
 0x61e   : > { %v2158_v50 = vmul.f32 %v2156_v48, %v2148_v47 }
 0x620   : > { %v2166_v52 = vadd.f32 %v2164_v51, %v2158_v50 }
 0x622   : > { %v2167_v53 = vmax.f32 %v2166_v52, 0.0 }
 0x624   : > { %2169 = vrot.lane.b32.xlu1 %v2167_v53, %s8752_s10 }
 0x696   : > { %v2170_v54 = vpop.permute.xlu1 %2169 }
 0x697   : > { %2172 = vst.msk [vmem:[#allocation2] sm:$0xff] %vm227_vm1, %v2170_v54  ;;  %v2322_v54 = vand.u32 4294901760, %v2321_v44 }
 0x69e   : > { %v2217_v56 = vld [vmem:[#allocation2] sm:$0xff] }
 0x69f   : > { %2219 = vrot.lane.b32.xlu0 %v2217_v56, %s8753_s11  ;;  %2213 = vrot.lane.b32.xlu1 %v2217_v56, %s8754_s12  ;;  %2174 = vst.msk [vmem:[#allocation3] sm:$0xff] %vm230_vm2, %v2217_v56 }
 0x6a3   : > { %2207 = vrot.lane.b32.xlu0 %v2217_v56, %s8755_s13  ;;  %2201 = vrot.lane.b32.xlu1 %v2217_v56, %s8756_s14 }
 0x6a6   : > { %v2225_v27 = vld [vmem:[#allocation3] sm:$0xff] }
 0x6a7   : > { %2195 = vrot.lane.b32.xlu0 %v2217_v56, %s8757_s15  ;;  %2189 = vrot.lane.b32.xlu1 %v2217_v56, %s11396_s16  ;;  %v9689_v36 = vand.u32 4294901760, %v2225_v27 }
 0x6a9   : > { %v9719_v49 = vsub.f32 %v2225_v27, %v9689_v36 }
 0x6ab   : > { %2183 = vrot.lane.b32.xlu0 %v2217_v56, %s11397_s17  ;;  %2177 = vrot.lane.b32.xlu1 %v2217_v56, %s11398_s23 }
 0x6af   : > { %2238 = vperm.xlu0 %8688, %v6747_v57   ;;  %2799 = vperm.xlu1 %8687, %v6748_v58  }
 0x6b3   : > { %2807 = vperm.xlu0 %8688, %v6749_v59  }
 0x711   : > { %v2220_v60 = vpop.permute.xlu0 %2219  ;;  %v2214_v61 = vpop.permute.xlu1 %2213 }
 0x712   : > { %2222 = vst.msk [vmem:[#allocation3 + $0x40] sm:$0xff] %vm230_vm2, %v2220_v60  ;;  %2216 = vst.msk [vmem:[#allocation3 + $0x38] sm:$0xff] %vm230_vm2, %v2214_v61  ;;  %v2401_v60 = vand.u32 4294901760, %v9719_v49 }
 0x714   : > { %v2402_v2 = vsub.f32 %v9719_v49, %v2401_v60 }
 0x715   : > { %v2208_v63 = vpop.permute.xlu0 %2207  ;;  %v2202_v1 = vpop.permute.xlu1 %2201 }
 0x716   : > { %2210 = vst.msk [vmem:[#allocation3 + $0x30] sm:$0xff] %vm230_vm2, %v2208_v63  ;;  %2204 = vst.msk [vmem:[#allocation3 + $0x28] sm:$0xff] %vm230_vm2, %v2202_v1 }
 0x719   : > { %v2196_v55 = vpop.permute.xlu0 %2195  ;;  %v2190_v3 = vpop.permute.xlu1 %2189  ;;  %v2233_v4 = vld [vmem:[#allocation3 + $0x40] sm:$0xff]  ;;  %v2232_v5 = vld [vmem:[#allocation3 + $0x38] sm:$0xff] }
 0x71a   : > { %2198 = vst.msk [vmem:[#allocation3 + $0x20] sm:$0xff] %vm230_vm2, %v2196_v55  ;;  %2192 = vst.msk [vmem:[#allocation3 + $0x18] sm:$0xff] %vm230_vm2, %v2190_v3  ;;  %v9641_v7 = vand.u32 4294901760, %v2233_v4  ;;  %v9643_v8 = vand.u32 4294901760, %v2232_v5  ;;  %v2403_v3 = vand.u32 4294901760, %v2402_v2 }
 0x71c   : > { %7755 = vmatpush3.msra.mxu0 %v9641_v7  ;;  %v9647_v9 = vsub.f32 %v2233_v4, %v9641_v7  ;;  %v9650_v12 = vsub.f32 %v2232_v5, %v9643_v8 }
 0x71d   : > { %7756 = vmatprep.subr.mxu0 %v8751_v0  ;;  %v2184_v13 = vpop.permute.xlu0 %2183  ;;  %v2178_v14 = vpop.permute.xlu1 %2177  ;;  %v2231_v15 = vld [vmem:[#allocation3 + $0x30] sm:$0xff]  ;;  %v2230_v16 = vld [vmem:[#allocation3 + $0x28] sm:$0xff] }
 0x71e   : > { %2186 = vst.msk [vmem:[#allocation3 + $0x10] sm:$0xff] %vm230_vm2, %v2184_v13  ;;  %2180 = vst.msk [vmem:[#allocation3 + $0x8] sm:$0xff] %vm230_vm2, %v2178_v14  ;;  %7757 = vmatpush3.msra.mxu0 %v9643_v8  ;;  %v9659_v19 = vand.u32 4294901760, %v2231_v15  ;;  %v9661_v20 = vand.u32 4294901760, %v2230_v16  ;;  %v2345_v21 = vand.u32 4294901760, %v9647_v9  ;;  %v2352_v22 = vand.u32 4294901760, %v9650_v12 }
 0x71f   : > { %7758 = vmatprep.subr.mxu0 %v8751_v0 }
 0x720   : > { %7759 = vmatpush3.msra.mxu0 %v9659_v19  ;;  %v9668_v23 = vsub.f32 %v2231_v15, %v9659_v19  ;;  %v9671_v24 = vsub.f32 %v2230_v16, %v9661_v20  ;;  %v2346_v25 = vsub.f32 %v9647_v9, %v2345_v21  ;;  %v2353_v26 = vsub.f32 %v9650_v12, %v2352_v22 }
 0x721   : > { %7760 = vmatprep.subr.mxu0 %v8751_v0  ;;  %v2229_v28 = vld [vmem:[#allocation3 + $0x20] sm:$0xff]  ;;  %v2228_v18 = vld [vmem:[#allocation3 + $0x18] sm:$0xff] }
 0x722   : > { %7761 = vmatpush3.msra.mxu0 %v9661_v20  ;;  %v9682_v30 = vand.u32 4294901760, %v2229_v28  ;;  %v2347_v31 = vand.u32 4294901760, %v2346_v25  ;;  %v9684_v33 = vand.u32 4294901760, %v2228_v18  ;;  %v2359_v34 = vand.u32 4294901760, %v9668_v23 }
 0x723   : > { %7762 = vmatprep.subr.mxu0 %v8751_v0  ;;  %v2366_v35 = vand.u32 4294901760, %v9671_v24  ;;  %v2354_v39 = vand.u32 4294901760, %v2353_v26 }
 0x724   : > { %7763 = vmatpush3.msra.mxu0 %v9682_v30  ;;  %v9693_v37 = vsub.f32 %v2229_v28, %v9682_v30  ;;  %7776 = vmatpush3.msra.mxu1 %v2347_v31  ;;  %v9696_v38 = vsub.f32 %v2228_v18, %v9684_v33  ;;  %v2360_v41 = vsub.f32 %v9668_v23, %v2359_v34 }
 0x725   : > { %7764 = vmatprep.subr.mxu0 %v8751_v0  ;;  %7777 = vmatprep.subr.mxu1 %v8751_v0  ;;  %v2227_v40 = vld [vmem:[#allocation3 + $0x10] sm:$0xff]  ;;  %v2367_v42 = vsub.f32 %v9671_v24, %v2366_v35  ;;  %v2226_v43 = vld [vmem:[#allocation3 + $0x8] sm:$0xff] }
 0x726   : > { %7765 = vmatpush3.msra.mxu0 %v9684_v33  ;;  %7778 = vmatpush3.msra.mxu1 %v2354_v39  ;;  %v9710_v32 = vand.u32 4294901760, %v2227_v40  ;;  %v9712_v45 = vand.u32 4294901760, %v2226_v43  ;;  %v2373_v46 = vand.u32 4294901760, %v9693_v37  ;;  %v2380_v47 = vand.u32 4294901760, %v9696_v38 }
 0x727   : > { %7766 = vmatprep.subr.mxu0 %v8751_v0  ;;  %7779 = vmatprep.subr.mxu1 %v8751_v0  ;;  %v2361_v48 = vand.u32 4294901760, %v2360_v41  ;;  %v2368_v53 = vand.u32 4294901760, %v2367_v42 }
 0x728   : > { %7767 = vmatpush3.msra.mxu0 %v9710_v32  ;;  %v9723_v50 = vsub.f32 %v2227_v40, %v9710_v32  ;;  %v9726_v51 = vsub.f32 %v2226_v43, %v9712_v45  ;;  %v2374_v52 = vsub.f32 %v9693_v37, %v2373_v46  ;;  %v2381_v56 = vsub.f32 %v9696_v38, %v2380_v47 }
 0x729   : > { %7780 = vmatpush3.msra.mxu1 %v2361_v48  ;;  %7768 = vmatprep.subr.mxu0 %v8751_v0 }
 0x72a   : > { %7781 = vmatprep.subr.mxu1 %v8751_v0  ;;  %7769 = vmatpush3.msra.mxu0 %v9712_v45  ;;  %v2375_v57 = vand.u32 4294901760, %v2374_v52  ;;  %v2387_v58 = vand.u32 4294901760, %v9723_v50  ;;  %v2394_v59 = vand.u32 4294901760, %v9726_v51  ;;  %v2382_v62 = vand.u32 4294901760, %v2381_v56  ;;  %v2239_v15 = vpop.permute.xlu0 %2238  ;;  %v2800_v27 = vpop.permute.xlu1 %2799 }
 0x72b   : > { %7782 = vmatpush3.msra.mxu1 %v2368_v53  ;;  %7770 = vmatprep.subr.mxu0 %v8751_v0 }
 0x72c   : > { %7783 = vmatprep.subr.mxu1 %v8751_v0  ;;  %7771 = vmatpush3.msra.mxu0 %v9689_v36  ;;  %v2388_v61 = vsub.f32 %v9723_v50, %v2387_v58  ;;  %v2395_v63 = vsub.f32 %v9726_v51, %v2394_v59 }
 0x72d   : > { %7784 = vmatpush3.msra.mxu1 %v2375_v57  ;;  %7773 = vmatmul.mubr.f32.vlgmr.msra.gmra.mxu0 %v2322_v54 }
 0x72e   : > { %7785 = vmatprep.subr.mxu1 %v8751_v0  ;;  %7796 = vmatprep.subr.mxu0 %v8751_v0  ;;  %v2389_v1 = vand.u32 4294901760, %v2388_v61  ;;  %v2396_v55 = vand.u32 4294901760, %v2395_v63  ;;  %v2808_v18 = vpop.permute.xlu0 %2807 }
 0x72f   : > { %7786 = vmatpush3.msra.mxu1 %v2382_v62  ;;  %7797 = vmatpush3.msra.mxu0 %v9647_v9 }
 0x730   : > { %7787 = vmatprep.subr.mxu1 %v8751_v0  ;;  %7798 = vmatprep.subr.mxu0 %v8751_v0 }
 0x731   : > { %7788 = vmatpush3.msra.mxu1 %v2389_v1  ;;  %7799 = vmatpush3.msra.mxu0 %v9650_v12 }
 0x732   : > { %7789 = vmatprep.subr.mxu1 %v8751_v0  ;;  %7800 = vmatprep.subr.mxu0 %v8751_v0 }
 0x733   : > { %7790 = vmatpush3.msra.mxu1 %v2396_v55  ;;  %7801 = vmatpush3.msra.mxu0 %v9668_v23 }
 0x734   : > { %7791 = vmatprep.subr.mxu1 %v8751_v0  ;;  %7802 = vmatprep.subr.mxu0 %v8751_v0 }
 0x735   : > { %7792 = vmatpush3.msra.mxu1 %v2403_v3  ;;  %7803 = vmatpush3.msra.mxu0 %v9671_v24 }
 0x736   : > { %7794 = vmatmul.mubr.f32.vlgmr.msra.gmra.mxu1 %v9637_v6  ;;  %7804 = vmatprep.subr.mxu0 %v8751_v0 }
 0x737   : > { %7817 = vmatprep.subr.mxu1 %v8751_v0  ;;  %7805 = vmatpush3.msra.mxu0 %v9693_v37  ;;  %v6750_v37 = vld [vmem:[%s11382_s0 + $0x20] sm:$0xff] }
 0x738   : > { %7818 = vmatpush3.msra.mxu1 %v9641_v7  ;;  %7806 = vmatprep.subr.mxu0 %v8751_v0  ;;  %v2886_v40 = vsel %vm296_vm4, %v6750_v37, 0 }
 0x739   : > { %7819 = vmatprep.subr.mxu1 %v8751_v0  ;;  %7807 = vmatpush3.msra.mxu0 %v9696_v38 }
 0x73a   : > { %7820 = vmatpush3.msra.mxu1 %v9643_v8  ;;  %7808 = vmatprep.subr.mxu0 %v8751_v0 }
 0x73b   : > { %7821 = vmatprep.subr.mxu1 %v8751_v0  ;;  %7809 = vmatpush3.msra.mxu0 %v9723_v50 }
 0x73c   : > { %7822 = vmatpush3.msra.mxu1 %v9659_v19  ;;  %7810 = vmatprep.subr.mxu0 %v8751_v0 }
 0x73d   : > { %7823 = vmatprep.subr.mxu1 %v8751_v0  ;;  %7811 = vmatpush3.msra.mxu0 %v9726_v51 }
 0x73e   : > { %7824 = vmatpush3.msra.mxu1 %v9661_v20  ;;  %7812 = vmatprep.subr.mxu0 %v8751_v0 }
 0x73f   : > { %7825 = vmatprep.subr.mxu1 %v8751_v0  ;;  %7813 = vmatpush3.msra.mxu0 %v9719_v49 }
 0x740   : > { %7814 = vmatprep.mubr.msk.f32.mxu0 %vm8761_vm3, %v8751_v0  ;;  %7826 = vmatpush3.msra.mxu1 %v9682_v30 }
 0x741   : > { %7815 = vmatmul.mubr.f32.vlgmr.msra.gmra.mxu0 %v9654_v17  ;;  %7827 = vmatprep.subr.mxu1 %v8751_v0 }
 0x742   : > { %7838 = vmatprep.subr.mxu0 %v8751_v0  ;;  %7828 = vmatpush3.msra.mxu1 %v9684_v33 }
 0x743   : > { %7839 = vmatpush3.msra.mxu0 %v2345_v21  ;;  %7829 = vmatprep.subr.mxu1 %v8751_v0 }
 0x744   : > { %7840 = vmatprep.subr.mxu0 %v8751_v0  ;;  %7830 = vmatpush3.msra.mxu1 %v9710_v32 }
 0x745   : > { %7841 = vmatpush3.msra.mxu0 %v2352_v22  ;;  %7831 = vmatprep.subr.mxu1 %v8751_v0 }
 0x746   : > { %7842 = vmatprep.subr.mxu0 %v8751_v0  ;;  %7832 = vmatpush3.msra.mxu1 %v9712_v45 }
 0x747   : > { %7843 = vmatpush3.msra.mxu0 %v2359_v34  ;;  %7833 = vmatprep.subr.mxu1 %v8751_v0  ;;  %v6753_v34 = vld [vmem:[%s11385_s3 + $0x28] sm:$0xff] }
 0x748   : > { %7844 = vmatprep.subr.mxu0 %v8751_v0  ;;  %7834 = vmatpush3.msra.mxu1 %v9689_v36 }
 0x749   : > { %7835 = vmatprep.mubr.msk.f32.mxu1 %vm8761_vm3, %v8751_v0  ;;  %7845 = vmatpush3.msra.mxu0 %v2366_v35 }
 0x74a   : > { %7836 = vmatmul.mubr.f32.vlgmr.msra.gmra.mxu1 %v2320_v29  ;;  %7846 = vmatprep.subr.mxu0 %v8751_v0 }
 0x74b   : > { %7859 = vmatprep.subr.mxu1 %v8751_v0  ;;  %7847 = vmatpush3.msra.mxu0 %v2373_v46 }
 0x74c   : > { %7860 = vmatpush3.msra.mxu1 %v9641_v7  ;;  %7848 = vmatprep.subr.mxu0 %v8751_v0 }
 0x74d   : > { %7861 = vmatprep.subr.mxu1 %v8751_v0  ;;  %7849 = vmatpush3.msra.mxu0 %v2380_v47 }
 0x74e   : > { %7862 = vmatpush3.msra.mxu1 %v9643_v8  ;;  %7850 = vmatprep.subr.mxu0 %v8751_v0 }
 0x74f   : > { %7863 = vmatprep.subr.mxu1 %v8751_v0  ;;  %7851 = vmatpush3.msra.mxu0 %v2387_v58 }
 0x750   : > { %7864 = vmatpush3.msra.mxu1 %v9659_v19  ;;  %7852 = vmatprep.subr.mxu0 %v8751_v0 }
 0x751   : > { %7865 = vmatprep.subr.mxu1 %v8751_v0  ;;  %7853 = vmatpush3.msra.mxu0 %v2394_v59 }
 0x752   : > { %7866 = vmatpush3.msra.mxu1 %v9661_v20  ;;  %7854 = vmatprep.subr.mxu0 %v8751_v0 }
 0x753   : > { %7867 = vmatprep.subr.mxu1 %v8751_v0  ;;  %7855 = vmatpush3.msra.mxu0 %v2401_v60 }
 0x754   : > { %7856 = vmatprep.mubr.msk.f32.mxu0 %vm8761_vm3, %v8751_v0  ;;  %7868 = vmatpush3.msra.mxu1 %v9682_v30 }
 0x755   : > { %7857 = vmatmul.mubr.f32.vlgmr.msra.gmra.mxu0 %v9637_v6  ;;  %7869 = vmatprep.subr.mxu1 %v8751_v0 }
 0x756   : > { %7870 = vmatpush3.msra.mxu1 %v9684_v33  ;;  %7877 = vmatprep.mubr.msk.f32.mxu1 %vm8761_vm3, %v8751_v0 }
 0x757   : > { %7871 = vmatprep.subr.mxu1 %v8751_v0  ;;  %7880 = vmatprep.subr.mxu0 %v8751_v0 }
 0x758   : > { %7872 = vmatpush3.msra.mxu1 %v9710_v32  ;;  %7898 = vmatprep.mubr.msk.f32.mxu0 %vm8761_vm3, %v8751_v0  ;;  %v9890_v32 = vand.u32 4294901760, %v2886_v40 }
 0x759   : > { %7873 = vmatprep.subr.mxu1 %v8751_v0 }
 0x75a   : > { %7874 = vmatpush3.msra.mxu1 %v9712_v45  ;;  %v9907_v53 = vsub.f32 %v2886_v40, %v9890_v32 }
 0x75b   : > { %7875 = vmatprep.subr.mxu1 %v8751_v0 }
 0x75c   : > { %7876 = vmatpush3.msra.mxu1 %v9689_v36  ;;  %v2964_v55 = vand.u32 4294901760, %v9907_v53 }
 0x75d   : > { %7878 = vmatmul.mubr.f32.vlgmr.msra.gmra.mxu1 %v9637_v6  ;;  %7901 = vmatprep.subr.mxu1 %v8751_v0 }
 0x75e   : > { %7919 = vmatprep.mubr.msk.f32.mxu1 %vm8761_vm3, %v8751_v0 }
 0x7ed   : > { %v2324_v4 = vpop.f32.mrf.mxu0 }
 0x7ee   : > { %v2325_v16 = vadd.f32 %v2324_v4, %v2239_v15 }
 0x7ef   : > { %v7774_v5 = vpop.f32.mrf.mxu0 }
 0x7f6   : > { %v2440_v7 = vpop.f32.mrf.mxu1 }
 0x7f7   : > { %v2441_v19 = vadd.f32 %v2440_v7, %v2325_v16 }
 0x7f8   : > { %v7795_v8 = vpop.f32.mrf.mxu1 }
 0x801   : > { %v2530_v9 = vpop.f32.mrf.mxu0 }
 0x802   : > { %v2531_v21 = vadd.f32 %v2530_v9, %v2441_v19 }
 0x803   : > { %v7816_v12 = vpop.f32.mrf.mxu0 }
 0x80a   : > { %v2612_v13 = vpop.f32.mrf.mxu1 }
 0x80b   : > { %v2613_v6 = vadd.f32 %v2612_v13, %v2531_v21 }
 0x80c   : > { %v7837_v14 = vpop.f32.mrf.mxu1 }
 0x815   : > { %v2710_v17 = vpop.f32.mrf.mxu0 }
 0x816   : > { %v2711_v22 = vadd.f32 %v2710_v17, %v2613_v6 }
 0x817   : > { %v7858_v20 = vpop.f32.mrf.mxu0 }
 0x818   : > { %v2965_v20 = vsub.f32 %v9907_v53, %v2964_v55 }
 0x81d   : > { %v2790_v23 = vpop.f32.mrf.mxu1 }
 0x81e   : > { %v2791_v24 = vadd.f32 %v2790_v23, %v2711_v22 }
 0x81f   : > { %v7879_v25 = vpop.f32.mrf.mxu1 }
 0x820   : > { %v9859_v26 = vadd.f32 %v2791_v24, %v1507_v11  ;;  %v6752_v11 = vld [vmem:[%s11384_s2 + $0x28] sm:$0xff] }
 0x822   : > { %v2802_v28 = vmul.f32 %v2800_v27, %v9859_v26 }
 0x824   : > { %v2810_v29 = vadd.f32 %v2808_v18, %v2802_v28 }
 0x826   : > { %v2811_v30 = vmax.f32 %v2810_v29, 0.0 }
 0x828   : > { %2813 = vrot.lane.b32.xlu1 %v2811_v30, %s8752_s10  ;;  %v2966_v30 = vand.u32 4294901760, %v2965_v20 }
 0x89a   : > { %v2814_v31 = vpop.permute.xlu1 %2813 }
 0x89b   : > { %2816 = vst.msk [vmem:[#allocation2] sm:$0xff] %vm227_vm1, %v2814_v31 }
 0x8a2   : > { %v2861_v33 = vld [vmem:[#allocation2] sm:$0xff] }
 0x8a3   : > { %2863 = vrot.lane.b32.xlu0 %v2861_v33, %s8753_s11  ;;  %2857 = vrot.lane.b32.xlu1 %v2861_v33, %s8754_s12  ;;  %2818 = vst.msk [vmem:[#allocation3] sm:$0xff] %vm230_vm2, %v2861_v33 }
 0x8a7   : > { %2851 = vrot.lane.b32.xlu0 %v2861_v33, %s8755_s13  ;;  %2845 = vrot.lane.b32.xlu1 %v2861_v33, %s8756_s14 }
 0x8aa   : > { %v2869_v63 = vld [vmem:[#allocation3] sm:$0xff] }
 0x8ab   : > { %2839 = vrot.lane.b32.xlu0 %v2861_v33, %s8757_s15  ;;  %2833 = vrot.lane.b32.xlu1 %v2861_v33, %s11396_s16  ;;  %v9942_v9 = vand.u32 4294901760, %v2869_v63 }
 0x8ad   : > { %v9972_v25 = vsub.f32 %v2869_v63, %v9942_v9 }
 0x8af   : > { %2827 = vrot.lane.b32.xlu0 %v2861_v33, %s11397_s17  ;;  %2821 = vrot.lane.b32.xlu1 %v2861_v33, %s11398_s23 }
 0x8b3   : > { %2882 = vperm.xlu0 %8688, %v6751_v10   ;;  %3442 = vperm.xlu1 %8687, %v6752_v11  }
 0x8b7   : > { %3450 = vperm.xlu0 %8688, %v6753_v34   ;;  %v3045_v34 = vand.u32 4294901760, %v9972_v25 }
 0x915   : > { %v2864_v35 = vpop.permute.xlu0 %2863  ;;  %v2858_v36 = vpop.permute.xlu1 %2857 }
 0x916   : > { %2866 = vst.msk [vmem:[#allocation3 + $0x40] sm:$0xff] %vm230_vm2, %v2864_v35  ;;  %2860 = vst.msk [vmem:[#allocation3 + $0x38] sm:$0xff] %vm230_vm2, %v2858_v36 }
 0x919   : > { %v2852_v38 = vpop.permute.xlu0 %2851  ;;  %v2846_v39 = vpop.permute.xlu1 %2845 }
 0x91a   : > { %2854 = vst.msk [vmem:[#allocation3 + $0x30] sm:$0xff] %vm230_vm2, %v2852_v38  ;;  %2848 = vst.msk [vmem:[#allocation3 + $0x28] sm:$0xff] %vm230_vm2, %v2846_v39  ;;  %v3046_v39 = vsub.f32 %v9972_v25, %v3045_v34 }
 0x91d   : > { %v2840_v41 = vpop.permute.xlu0 %2839  ;;  %v2834_v42 = vpop.permute.xlu1 %2833  ;;  %v2877_v43 = vld [vmem:[#allocation3 + $0x40] sm:$0xff]  ;;  %v2876_v44 = vld [vmem:[#allocation3 + $0x38] sm:$0xff] }
 0x91e   : > { %2842 = vst.msk [vmem:[#allocation3 + $0x20] sm:$0xff] %vm230_vm2, %v2840_v41  ;;  %2836 = vst.msk [vmem:[#allocation3 + $0x18] sm:$0xff] %vm230_vm2, %v2834_v42  ;;  %v9894_v45 = vand.u32 4294901760, %v2877_v43  ;;  %v9896_v46 = vand.u32 4294901760, %v2876_v44  ;;  %v3047_v41 = vand.u32 4294901760, %v3046_v39 }
 0x920   : > { %7881 = vmatpush3.msra.mxu0 %v9894_v45  ;;  %v9900_v47 = vsub.f32 %v2877_v43, %v9894_v45  ;;  %v9903_v48 = vsub.f32 %v2876_v44, %v9896_v46 }
 0x921   : > { %7882 = vmatprep.subr.mxu0 %v8751_v0  ;;  %v2828_v49 = vpop.permute.xlu0 %2827  ;;  %v2822_v50 = vpop.permute.xlu1 %2821  ;;  %v2875_v51 = vld [vmem:[#allocation3 + $0x30] sm:$0xff]  ;;  %v2874_v52 = vld [vmem:[#allocation3 + $0x28] sm:$0xff] }
 0x922   : > { %2830 = vst.msk [vmem:[#allocation3 + $0x10] sm:$0xff] %vm230_vm2, %v2828_v49  ;;  %2824 = vst.msk [vmem:[#allocation3 + $0x8] sm:$0xff] %vm230_vm2, %v2822_v50  ;;  %7883 = vmatpush3.msra.mxu0 %v9896_v46  ;;  %v9912_v54 = vand.u32 4294901760, %v2875_v51  ;;  %v9914_v56 = vand.u32 4294901760, %v2874_v52  ;;  %v2989_v57 = vand.u32 4294901760, %v9900_v47  ;;  %v2996_v58 = vand.u32 4294901760, %v9903_v48 }
 0x923   : > { %7884 = vmatprep.subr.mxu0 %v8751_v0 }
 0x924   : > { %7885 = vmatpush3.msra.mxu0 %v9912_v54  ;;  %v9921_v59 = vsub.f32 %v2875_v51, %v9912_v54  ;;  %v9924_v60 = vsub.f32 %v2874_v52, %v9914_v56  ;;  %v2990_v61 = vsub.f32 %v9900_v47, %v2989_v57  ;;  %v2997_v62 = vsub.f32 %v9903_v48, %v2996_v58 }
 0x925   : > { %7886 = vmatprep.subr.mxu0 %v8751_v0  ;;  %v2873_v1 = vld [vmem:[#allocation3 + $0x20] sm:$0xff]  ;;  %v2872_v2 = vld [vmem:[#allocation3 + $0x18] sm:$0xff] }
 0x926   : > { %7887 = vmatpush3.msra.mxu0 %v9914_v56  ;;  %v9935_v3 = vand.u32 4294901760, %v2873_v1  ;;  %v2991_v4 = vand.u32 4294901760, %v2990_v61  ;;  %v9937_v5 = vand.u32 4294901760, %v2872_v2  ;;  %v3003_v7 = vand.u32 4294901760, %v9921_v59 }
 0x927   : > { %7888 = vmatprep.subr.mxu0 %v8751_v0  ;;  %v3010_v8 = vand.u32 4294901760, %v9924_v60  ;;  %v2998_v14 = vand.u32 4294901760, %v2997_v62 }
 0x928   : > { %7889 = vmatpush3.msra.mxu0 %v9935_v3  ;;  %v9946_v12 = vsub.f32 %v2873_v1, %v9935_v3  ;;  %7902 = vmatpush3.msra.mxu1 %v2991_v4  ;;  %v9949_v13 = vsub.f32 %v2872_v2, %v9937_v5  ;;  %v3004_v16 = vsub.f32 %v9921_v59, %v3003_v7  ;;  %v6755_v4 = vld [vmem:[%s11383_s1 + $0x28] sm:$0xff] }
 0x929   : > { %7890 = vmatprep.subr.mxu0 %v8751_v0  ;;  %7903 = vmatprep.subr.mxu1 %v8751_v0  ;;  %v2871_v15 = vld [vmem:[#allocation3 + $0x10] sm:$0xff]  ;;  %v3011_v17 = vsub.f32 %v9924_v60, %v3010_v8  ;;  %v2870_v19 = vld [vmem:[#allocation3 + $0x8] sm:$0xff] }
 0x92a   : > { %7891 = vmatpush3.msra.mxu0 %v9937_v5  ;;  %7904 = vmatpush3.msra.mxu1 %v2998_v14  ;;  %v9963_v21 = vand.u32 4294901760, %v2871_v15  ;;  %v9965_v6 = vand.u32 4294901760, %v2870_v19  ;;  %v3017_v22 = vand.u32 4294901760, %v9946_v12  ;;  %v3024_v23 = vand.u32 4294901760, %v9949_v13 }
 0x92b   : > { %7892 = vmatprep.subr.mxu0 %v8751_v0  ;;  %7905 = vmatprep.subr.mxu1 %v8751_v0  ;;  %v3005_v24 = vand.u32 4294901760, %v3004_v16  ;;  %v3012_v29 = vand.u32 4294901760, %v3011_v17 }
 0x92c   : > { %7893 = vmatpush3.msra.mxu0 %v9963_v21  ;;  %v9976_v27 = vsub.f32 %v2871_v15, %v9963_v21  ;;  %v9979_v28 = vsub.f32 %v2870_v19, %v9965_v6  ;;  %v3018_v18 = vsub.f32 %v9946_v12, %v3017_v22  ;;  %v3025_v31 = vsub.f32 %v9949_v13, %v3024_v23 }
 0x92d   : > { %7906 = vmatpush3.msra.mxu1 %v3005_v24  ;;  %7894 = vmatprep.subr.mxu0 %v8751_v0 }
 0x92e   : > { %7907 = vmatprep.subr.mxu1 %v8751_v0  ;;  %7895 = vmatpush3.msra.mxu0 %v9965_v6  ;;  %v3019_v33 = vand.u32 4294901760, %v3018_v18  ;;  %v3031_v10 = vand.u32 4294901760, %v9976_v27  ;;  %v3038_v11 = vand.u32 4294901760, %v9979_v28  ;;  %v3026_v36 = vand.u32 4294901760, %v3025_v31  ;;  %v2883_v50 = vpop.permute.xlu0 %2882 }
 0x92f   : > { %7908 = vmatpush3.msra.mxu1 %v3012_v29  ;;  %7896 = vmatprep.subr.mxu0 %v8751_v0 }
 0x930   : > { %7909 = vmatprep.subr.mxu1 %v8751_v0  ;;  %7897 = vmatpush3.msra.mxu0 %v9942_v9  ;;  %v3032_v35 = vsub.f32 %v9976_v27, %v3031_v10  ;;  %v3039_v37 = vsub.f32 %v9979_v28, %v3038_v11 }
 0x931   : > { %7910 = vmatpush3.msra.mxu1 %v3019_v33  ;;  %7899 = vmatmul.mubr.f32.vlgmr.msra.gmra.mxu0 %v2966_v30 }
 0x932   : > { %7911 = vmatprep.subr.mxu1 %v8751_v0  ;;  %7922 = vmatprep.subr.mxu0 %v8751_v0  ;;  %v3033_v38 = vand.u32 4294901760, %v3032_v35  ;;  %v3040_v40 = vand.u32 4294901760, %v3039_v37  ;;  %v3451_v63 = vpop.permute.xlu0 %3450 }
 0x933   : > { %7912 = vmatpush3.msra.mxu1 %v3026_v36  ;;  %7923 = vmatpush3.msra.mxu0 %v9900_v47 }
 0x934   : > { %7913 = vmatprep.subr.mxu1 %v8751_v0  ;;  %7924 = vmatprep.subr.mxu0 %v8751_v0 }
 0x935   : > { %7914 = vmatpush3.msra.mxu1 %v3033_v38  ;;  %7925 = vmatpush3.msra.mxu0 %v9903_v48 }
 0x936   : > { %7915 = vmatprep.subr.mxu1 %v8751_v0  ;;  %7926 = vmatprep.subr.mxu0 %v8751_v0 }
 0x937   : > { %7916 = vmatpush3.msra.mxu1 %v3040_v40  ;;  %7927 = vmatpush3.msra.mxu0 %v9921_v59 }
 0x938   : > { %7917 = vmatprep.subr.mxu1 %v8751_v0  ;;  %7928 = vmatprep.subr.mxu0 %v8751_v0 }
 0x939   : > { %7918 = vmatpush3.msra.mxu1 %v3047_v41  ;;  %7929 = vmatpush3.msra.mxu0 %v9924_v60  ;;  %v3443_v60 = vpop.permute.xlu1 %3442 }
 0x93a   : > { %7920 = vmatmul.mubr.f32.vlgmr.msra.gmra.mxu1 %v9890_v32  ;;  %7930 = vmatprep.subr.mxu0 %v8751_v0 }
 0x93b   : > { %7943 = vmatprep.subr.mxu1 %v8751_v0  ;;  %7931 = vmatpush3.msra.mxu0 %v9946_v12  ;;  %v6754_v12 = vld [vmem:[%s11382_s0 + $0x28] sm:$0xff] }
 0x93c   : > { %7944 = vmatpush3.msra.mxu1 %v9894_v45  ;;  %7932 = vmatprep.subr.mxu0 %v8751_v0  ;;  %v3529_v15 = vsel %vm296_vm4, %v6754_v12, 0 }
 0x93d   : > { %7945 = vmatprep.subr.mxu1 %v8751_v0  ;;  %7933 = vmatpush3.msra.mxu0 %v9949_v13 }
 0x93e   : > { %7946 = vmatpush3.msra.mxu1 %v9896_v46  ;;  %7934 = vmatprep.subr.mxu0 %v8751_v0 }
 0x93f   : > { %7947 = vmatprep.subr.mxu1 %v8751_v0  ;;  %7935 = vmatpush3.msra.mxu0 %v9976_v27 }
 0x940   : > { %7948 = vmatpush3.msra.mxu1 %v9912_v54  ;;  %7936 = vmatprep.subr.mxu0 %v8751_v0 }
 0x941   : > { %7949 = vmatprep.subr.mxu1 %v8751_v0  ;;  %7937 = vmatpush3.msra.mxu0 %v9979_v28 }
 0x942   : > { %7950 = vmatpush3.msra.mxu1 %v9914_v56  ;;  %7938 = vmatprep.subr.mxu0 %v8751_v0 }
 0x943   : > { %7951 = vmatprep.subr.mxu1 %v8751_v0  ;;  %7939 = vmatpush3.msra.mxu0 %v9972_v25 }
 0x944   : > { %7940 = vmatprep.mubr.msk.f32.mxu0 %vm8761_vm3, %v8751_v0  ;;  %7952 = vmatpush3.msra.mxu1 %v9935_v3 }
 0x945   : > { %7941 = vmatmul.mubr.f32.vlgmr.msra.gmra.mxu0 %v9907_v53  ;;  %7953 = vmatprep.subr.mxu1 %v8751_v0 }
 0x946   : > { %7964 = vmatprep.subr.mxu0 %v8751_v0  ;;  %7954 = vmatpush3.msra.mxu1 %v9937_v5 }
 0x947   : > { %7965 = vmatpush3.msra.mxu0 %v2989_v57  ;;  %7955 = vmatprep.subr.mxu1 %v8751_v0 }
 0x948   : > { %7966 = vmatprep.subr.mxu0 %v8751_v0  ;;  %7956 = vmatpush3.msra.mxu1 %v9963_v21 }
 0x949   : > { %7967 = vmatpush3.msra.mxu0 %v2996_v58  ;;  %7957 = vmatprep.subr.mxu1 %v8751_v0 }
 0x94a   : > { %7968 = vmatprep.subr.mxu0 %v8751_v0  ;;  %7958 = vmatpush3.msra.mxu1 %v9965_v6 }
 0x94b   : > { %7969 = vmatpush3.msra.mxu0 %v3003_v7  ;;  %7959 = vmatprep.subr.mxu1 %v8751_v0  ;;  %v6757_v7 = vld [vmem:[%s11385_s3 + $0x30] sm:$0xff] }
 0x94c   : > { %7970 = vmatprep.subr.mxu0 %v8751_v0  ;;  %7960 = vmatpush3.msra.mxu1 %v9942_v9 }
 0x94d   : > { %7961 = vmatprep.mubr.msk.f32.mxu1 %vm8761_vm3, %v8751_v0  ;;  %7971 = vmatpush3.msra.mxu0 %v3010_v8 }
 0x94e   : > { %7962 = vmatmul.mubr.f32.vlgmr.msra.gmra.mxu1 %v2964_v55  ;;  %7972 = vmatprep.subr.mxu0 %v8751_v0 }
 0x94f   : > { %7985 = vmatprep.subr.mxu1 %v8751_v0  ;;  %7973 = vmatpush3.msra.mxu0 %v3017_v22 }
 0x950   : > { %7986 = vmatpush3.msra.mxu1 %v9894_v45  ;;  %7974 = vmatprep.subr.mxu0 %v8751_v0 }
 0x951   : > { %7987 = vmatprep.subr.mxu1 %v8751_v0  ;;  %7975 = vmatpush3.msra.mxu0 %v3024_v23 }
 0x952   : > { %7988 = vmatpush3.msra.mxu1 %v9896_v46  ;;  %7976 = vmatprep.subr.mxu0 %v8751_v0 }
 0x953   : > { %7989 = vmatprep.subr.mxu1 %v8751_v0  ;;  %7977 = vmatpush3.msra.mxu0 %v3031_v10 }
 0x954   : > { %7990 = vmatpush3.msra.mxu1 %v9912_v54  ;;  %7978 = vmatprep.subr.mxu0 %v8751_v0 }
 0x955   : > { %7991 = vmatprep.subr.mxu1 %v8751_v0  ;;  %7979 = vmatpush3.msra.mxu0 %v3038_v11 }
 0x956   : > { %7992 = vmatpush3.msra.mxu1 %v9914_v56  ;;  %7980 = vmatprep.subr.mxu0 %v8751_v0 }
 0x957   : > { %7993 = vmatprep.subr.mxu1 %v8751_v0  ;;  %7981 = vmatpush3.msra.mxu0 %v3045_v34 }
 0x958   : > { %7982 = vmatprep.mubr.msk.f32.mxu0 %vm8761_vm3, %v8751_v0  ;;  %7994 = vmatpush3.msra.mxu1 %v9935_v3 }
 0x959   : > { %7983 = vmatmul.mubr.f32.vlgmr.msra.gmra.mxu0 %v9890_v32  ;;  %7995 = vmatprep.subr.mxu1 %v8751_v0 }
 0x95a   : > { %7996 = vmatpush3.msra.mxu1 %v9937_v5  ;;  %8003 = vmatprep.mubr.msk.f32.mxu1 %vm8761_vm3, %v8751_v0  ;;  %v6756_v5 = vld [vmem:[%s11384_s2 + $0x30] sm:$0xff] }
 0x95b   : > { %7997 = vmatprep.subr.mxu1 %v8751_v0  ;;  %8006 = vmatprep.subr.mxu0 %v8751_v0 }
 0x95c   : > { %7998 = vmatpush3.msra.mxu1 %v9963_v21  ;;  %8024 = vmatprep.mubr.msk.f32.mxu0 %vm8761_vm3, %v8751_v0  ;;  %v10138_v21 = vand.u32 4294901760, %v3529_v15 }
 0x95d   : > { %7999 = vmatprep.subr.mxu1 %v8751_v0 }
 0x95e   : > { %8000 = vmatpush3.msra.mxu1 %v9965_v6  ;;  %v10155_v29 = vsub.f32 %v3529_v15, %v10138_v21 }
 0x95f   : > { %8001 = vmatprep.subr.mxu1 %v8751_v0 }
 0x960   : > { %8002 = vmatpush3.msra.mxu1 %v9942_v9  ;;  %v3607_v40 = vand.u32 4294901760, %v10155_v29 }
 0x961   : > { %8004 = vmatmul.mubr.f32.vlgmr.msra.gmra.mxu1 %v9890_v32  ;;  %8027 = vmatprep.subr.mxu1 %v8751_v0 }
 0x962   : > { %8045 = vmatprep.mubr.msk.f32.mxu1 %vm8761_vm3, %v8751_v0 }
 0x9f1   : > { %v2968_v42 = vpop.f32.mrf.mxu0 }
 0x9f2   : > { %v2969_v51 = vadd.f32 %v2968_v42, %v2883_v50 }
 0x9f3   : > { %v7900_v43 = vpop.f32.mrf.mxu0 }
 0x9fa   : > { %v3084_v44 = vpop.f32.mrf.mxu1 }
 0x9fb   : > { %v3085_v53 = vadd.f32 %v3084_v44, %v2969_v51 }
 0x9fc   : > { %v7921_v45 = vpop.f32.mrf.mxu1 }
 0xa05   : > { %v3174_v46 = vpop.f32.mrf.mxu0 }
 0xa06   : > { %v3175_v56 = vadd.f32 %v3174_v46, %v3085_v53 }
 0xa07   : > { %v7942_v47 = vpop.f32.mrf.mxu0 }
 0xa0e   : > { %v3256_v48 = vpop.f32.mrf.mxu1 }
 0xa0f   : > { %v3257_v32 = vadd.f32 %v3256_v48, %v3175_v56 }
 0xa10   : > { %v7963_v49 = vpop.f32.mrf.mxu1 }
 0xa19   : > { %v3354_v52 = vpop.f32.mrf.mxu0 }
 0xa1a   : > { %v3355_v57 = vadd.f32 %v3354_v52, %v3257_v32 }
 0xa1b   : > { %v7984_v54 = vpop.f32.mrf.mxu0 }
 0xa1c   : > { %v3608_v54 = vsub.f32 %v10155_v29, %v3607_v40 }
 0xa21   : > { %v3434_v58 = vpop.f32.mrf.mxu1 }
 0xa22   : > { %v3435_v59 = vadd.f32 %v3434_v58, %v3355_v57 }
 0xa23   : > { %v8005_v61 = vpop.f32.mrf.mxu1 }
 0xa24   : > { %v3445_v62 = vmul.f32 %v3443_v60, %v3435_v59 }
 0xa26   : > { %v3453_v1 = vadd.f32 %v3451_v63, %v3445_v62 }
 0xa28   : > { %v3454_v2 = vmax.f32 %v3453_v1, 0.0 }
 0xa2a   : > { %3456 = vrot.lane.b32.xlu1 %v3454_v2, %s8752_s10  ;;  %v3609_v2 = vand.u32 4294901760, %v3608_v54 }
 0xa9c   : > { %v3457_v55 = vpop.permute.xlu1 %3456 }
 0xa9d   : > { %3459 = vst.msk [vmem:[#allocation2] sm:$0xff] %vm227_vm1, %v3457_v55 }
 0xaa4   : > { %v3504_v3 = vld [vmem:[#allocation2] sm:$0xff] }
 0xaa5   : > { %3506 = vrot.lane.b32.xlu0 %v3504_v3, %s8753_s11  ;;  %3500 = vrot.lane.b32.xlu1 %v3504_v3, %s8754_s12  ;;  %3461 = vst.msk [vmem:[#allocation3] sm:$0xff] %vm230_vm2, %v3504_v3 }
 0xaa9   : > { %3494 = vrot.lane.b32.xlu0 %v3504_v3, %s8755_s13  ;;  %3488 = vrot.lane.b32.xlu1 %v3504_v3, %s8756_s14 }
 0xaac   : > { %v3512_v37 = vld [vmem:[#allocation3] sm:$0xff] }
 0xaad   : > { %3482 = vrot.lane.b32.xlu0 %v3504_v3, %s8757_s15  ;;  %3476 = vrot.lane.b32.xlu1 %v3504_v3, %s11396_s16  ;;  %v10190_v46 = vand.u32 4294901760, %v3512_v37 }
 0xaaf   : > { %v10220_v60 = vsub.f32 %v3512_v37, %v10190_v46 }
 0xab1   : > { %3470 = vrot.lane.b32.xlu0 %v3504_v3, %s11397_s17  ;;  %3464 = vrot.lane.b32.xlu1 %v3504_v3, %s11398_s23 }
 0xab5   : > { %3525 = vperm.xlu0 %8688, %v6755_v4   ;;  %4086 = vperm.xlu1 %8687, %v6756_v5  }
 0xab9   : > { %4094 = vperm.xlu0 %8688, %v6757_v7   ;;  %v3688_v7 = vand.u32 4294901760, %v10220_v60 }
 0xb17   : > { %v3507_v8 = vpop.permute.xlu0 %3506  ;;  %v3501_v9 = vpop.permute.xlu1 %3500 }
 0xb18   : > { %3509 = vst.msk [vmem:[#allocation3 + $0x40] sm:$0xff] %vm230_vm2, %v3507_v8  ;;  %3503 = vst.msk [vmem:[#allocation3 + $0x38] sm:$0xff] %vm230_vm2, %v3501_v9 }
 0xb1b   : > { %v3495_v13 = vpop.permute.xlu0 %3494  ;;  %v3489_v14 = vpop.permute.xlu1 %3488 }
 0xb1c   : > { %3497 = vst.msk [vmem:[#allocation3 + $0x30] sm:$0xff] %vm230_vm2, %v3495_v13  ;;  %3491 = vst.msk [vmem:[#allocation3 + $0x28] sm:$0xff] %vm230_vm2, %v3489_v14  ;;  %v3689_v14 = vsub.f32 %v10220_v60, %v3688_v7 }
 0xb1f   : > { %v3483_v16 = vpop.permute.xlu0 %3482  ;;  %v3477_v17 = vpop.permute.xlu1 %3476  ;;  %v3520_v19 = vld [vmem:[#allocation3 + $0x40] sm:$0xff]  ;;  %v3519_v20 = vld [vmem:[#allocation3 + $0x38] sm:$0xff] }
 0xb20   : > { %3485 = vst.msk [vmem:[#allocation3 + $0x20] sm:$0xff] %vm230_vm2, %v3483_v16  ;;  %3479 = vst.msk [vmem:[#allocation3 + $0x18] sm:$0xff] %vm230_vm2, %v3477_v17  ;;  %v10142_v6 = vand.u32 4294901760, %v3520_v19  ;;  %v10144_v22 = vand.u32 4294901760, %v3519_v20  ;;  %v3690_v16 = vand.u32 4294901760, %v3689_v14 }
 0xb22   : > { %8007 = vmatpush3.msra.mxu0 %v10142_v6  ;;  %v10148_v23 = vsub.f32 %v3520_v19, %v10142_v6  ;;  %v10151_v24 = vsub.f32 %v3519_v20, %v10144_v22 }
 0xb23   : > { %8008 = vmatprep.subr.mxu0 %v8751_v0  ;;  %v3471_v25 = vpop.permute.xlu0 %3470  ;;  %v3465_v27 = vpop.permute.xlu1 %3464  ;;  %v3518_v28 = vld [vmem:[#allocation3 + $0x30] sm:$0xff]  ;;  %v3517_v18 = vld [vmem:[#allocation3 + $0x28] sm:$0xff] }
 0xb24   : > { %3473 = vst.msk [vmem:[#allocation3 + $0x10] sm:$0xff] %vm230_vm2, %v3471_v25  ;;  %3467 = vst.msk [vmem:[#allocation3 + $0x8] sm:$0xff] %vm230_vm2, %v3465_v27  ;;  %8009 = vmatpush3.msra.mxu0 %v10144_v22  ;;  %v10160_v30 = vand.u32 4294901760, %v3518_v28  ;;  %v10162_v31 = vand.u32 4294901760, %v3517_v18  ;;  %v3632_v33 = vand.u32 4294901760, %v10148_v23  ;;  %v3639_v10 = vand.u32 4294901760, %v10151_v24 }
 0xb25   : > { %8010 = vmatprep.subr.mxu0 %v8751_v0 }
 0xb26   : > { %8011 = vmatpush3.msra.mxu0 %v10160_v30  ;;  %v10169_v11 = vsub.f32 %v3518_v28, %v10160_v30  ;;  %v10172_v34 = vsub.f32 %v3517_v18, %v10162_v31  ;;  %v3633_v35 = vsub.f32 %v10148_v23, %v3632_v33  ;;  %v3640_v36 = vsub.f32 %v10151_v24, %v3639_v10 }
 0xb27   : > { %8012 = vmatprep.subr.mxu0 %v8751_v0  ;;  %v3516_v38 = vld [vmem:[#allocation3 + $0x20] sm:$0xff]  ;;  %v3515_v39 = vld [vmem:[#allocation3 + $0x18] sm:$0xff] }
 0xb28   : > { %8013 = vmatpush3.msra.mxu0 %v10162_v31  ;;  %v10183_v41 = vand.u32 4294901760, %v3516_v38  ;;  %v3634_v42 = vand.u32 4294901760, %v3633_v35  ;;  %v10185_v43 = vand.u32 4294901760, %v3515_v39  ;;  %v3646_v44 = vand.u32 4294901760, %v10169_v11 }
 0xb29   : > { %8014 = vmatprep.subr.mxu0 %v8751_v0  ;;  %v3653_v45 = vand.u32 4294901760, %v10172_v34  ;;  %v3641_v49 = vand.u32 4294901760, %v3640_v36 }
 0xb2a   : > { %8015 = vmatpush3.msra.mxu0 %v10183_v41  ;;  %v10194_v47 = vsub.f32 %v3516_v38, %v10183_v41  ;;  %8028 = vmatpush3.msra.mxu1 %v3634_v42  ;;  %v10197_v48 = vsub.f32 %v3515_v39, %v10185_v43  ;;  %v3647_v51 = vsub.f32 %v10169_v11, %v3646_v44 }
 0xb2b   : > { %8016 = vmatprep.subr.mxu0 %v8751_v0  ;;  %8029 = vmatprep.subr.mxu1 %v8751_v0  ;;  %v3514_v50 = vld [vmem:[#allocation3 + $0x10] sm:$0xff]  ;;  %v3654_v52 = vsub.f32 %v10172_v34, %v3653_v45  ;;  %v3513_v53 = vld [vmem:[#allocation3 + $0x8] sm:$0xff] }
 0xb2c   : > { %8017 = vmatpush3.msra.mxu0 %v10185_v43  ;;  %8030 = vmatpush3.msra.mxu1 %v3641_v49  ;;  %v10211_v56 = vand.u32 4294901760, %v3514_v50  ;;  %v10213_v32 = vand.u32 4294901760, %v3513_v53  ;;  %v3660_v57 = vand.u32 4294901760, %v10194_v47  ;;  %v3667_v58 = vand.u32 4294901760, %v10197_v48 }
 0xb2d   : > { %8018 = vmatprep.subr.mxu0 %v8751_v0  ;;  %8031 = vmatprep.subr.mxu1 %v8751_v0  ;;  %v3648_v59 = vand.u32 4294901760, %v3647_v51  ;;  %v3655_v1 = vand.u32 4294901760, %v3654_v52 }
 0xb2e   : > { %8019 = vmatpush3.msra.mxu0 %v10211_v56  ;;  %v10224_v61 = vsub.f32 %v3514_v50, %v10211_v56  ;;  %v10227_v62 = vsub.f32 %v3513_v53, %v10213_v32  ;;  %v3661_v63 = vsub.f32 %v10194_v47, %v3660_v57  ;;  %v3668_v55 = vsub.f32 %v10197_v48, %v3667_v58 }
 0xb2f   : > { %8032 = vmatpush3.msra.mxu1 %v3648_v59  ;;  %8020 = vmatprep.subr.mxu0 %v8751_v0 }
 0xb30   : > { %8033 = vmatprep.subr.mxu1 %v8751_v0  ;;  %8021 = vmatpush3.msra.mxu0 %v10213_v32  ;;  %v3662_v3 = vand.u32 4294901760, %v3661_v63  ;;  %v3674_v4 = vand.u32 4294901760, %v10224_v61  ;;  %v3681_v5 = vand.u32 4294901760, %v10227_v62  ;;  %v3669_v9 = vand.u32 4294901760, %v3668_v55  ;;  %v3526_v27 = vpop.permute.xlu0 %3525  ;;  %v4087_v36 = vpop.permute.xlu1 %4086 }
 0xb31   : > { %8034 = vmatpush3.msra.mxu1 %v3655_v1  ;;  %8022 = vmatprep.subr.mxu0 %v8751_v0 }
 0xb32   : > { %8035 = vmatprep.subr.mxu1 %v8751_v0  ;;  %8023 = vmatpush3.msra.mxu0 %v10190_v46  ;;  %v3675_v8 = vsub.f32 %v10224_v61, %v3674_v4  ;;  %v3682_v12 = vsub.f32 %v10227_v62, %v3681_v5 }
 0xb33   : > { %8036 = vmatpush3.msra.mxu1 %v3662_v3  ;;  %8025 = vmatmul.mubr.f32.vlgmr.msra.gmra.mxu0 %v3609_v2 }
 0xb34   : > { %8037 = vmatprep.subr.mxu1 %v8751_v0  ;;  %8048 = vmatprep.subr.mxu0 %v8751_v0  ;;  %v3676_v13 = vand.u32 4294901760, %v3675_v8  ;;  %v3683_v15 = vand.u32 4294901760, %v3682_v12  ;;  %v4095_v38 = vpop.permute.xlu0 %4094 }
 0xb35   : > { %8038 = vmatpush3.msra.mxu1 %v3669_v9  ;;  %8049 = vmatpush3.msra.mxu0 %v10148_v23 }
 0xb36   : > { %8039 = vmatprep.subr.mxu1 %v8751_v0  ;;  %8050 = vmatprep.subr.mxu0 %v8751_v0 }
 0xb37   : > { %8040 = vmatpush3.msra.mxu1 %v3676_v13  ;;  %8051 = vmatpush3.msra.mxu0 %v10151_v24 }
 0xb38   : > { %8041 = vmatprep.subr.mxu1 %v8751_v0  ;;  %8052 = vmatprep.subr.mxu0 %v8751_v0 }
 0xb39   : > { %8042 = vmatpush3.msra.mxu1 %v3683_v15  ;;  %8053 = vmatpush3.msra.mxu0 %v10169_v11 }
 0xb3a   : > { %8043 = vmatprep.subr.mxu1 %v8751_v0  ;;  %8054 = vmatprep.subr.mxu0 %v8751_v0 }
 0xb3b   : > { %8044 = vmatpush3.msra.mxu1 %v3690_v16  ;;  %8055 = vmatpush3.msra.mxu0 %v10172_v34 }
 0xb3c   : > { %8046 = vmatmul.mubr.f32.vlgmr.msra.gmra.mxu1 %v10138_v21  ;;  %8056 = vmatprep.subr.mxu0 %v8751_v0 }
 0xb3d   : > { %8069 = vmatprep.subr.mxu1 %v8751_v0  ;;  %8057 = vmatpush3.msra.mxu0 %v10194_v47  ;;  %v6758_v47 = vld [vmem:[%s11382_s0 + $0x30] sm:$0xff] }
 0xb3e   : > { %8070 = vmatpush3.msra.mxu1 %v10142_v6  ;;  %8058 = vmatprep.subr.mxu0 %v8751_v0  ;;  %v4173_v50 = vsel %vm296_vm4, %v6758_v47, 0 }
 0xb3f   : > { %8071 = vmatprep.subr.mxu1 %v8751_v0  ;;  %8059 = vmatpush3.msra.mxu0 %v10197_v48 }
 0xb40   : > { %8072 = vmatpush3.msra.mxu1 %v10144_v22  ;;  %8060 = vmatprep.subr.mxu0 %v8751_v0 }
 0xb41   : > { %8073 = vmatprep.subr.mxu1 %v8751_v0  ;;  %8061 = vmatpush3.msra.mxu0 %v10224_v61 }
 0xb42   : > { %8074 = vmatpush3.msra.mxu1 %v10160_v30  ;;  %8062 = vmatprep.subr.mxu0 %v8751_v0 }
 0xb43   : > { %8075 = vmatprep.subr.mxu1 %v8751_v0  ;;  %8063 = vmatpush3.msra.mxu0 %v10227_v62 }
 0xb44   : > { %8076 = vmatpush3.msra.mxu1 %v10162_v31  ;;  %8064 = vmatprep.subr.mxu0 %v8751_v0 }
 0xb45   : > { %8077 = vmatprep.subr.mxu1 %v8751_v0  ;;  %8065 = vmatpush3.msra.mxu0 %v10220_v60 }
 0xb46   : > { %8066 = vmatprep.mubr.msk.f32.mxu0 %vm8761_vm3, %v8751_v0  ;;  %8078 = vmatpush3.msra.mxu1 %v10183_v41 }
 0xb47   : > { %8067 = vmatmul.mubr.f32.vlgmr.msra.gmra.mxu0 %v10155_v29  ;;  %8079 = vmatprep.subr.mxu1 %v8751_v0 }
 0xb48   : > { %8090 = vmatprep.subr.mxu0 %v8751_v0  ;;  %8080 = vmatpush3.msra.mxu1 %v10185_v43 }
 0xb49   : > { %8091 = vmatpush3.msra.mxu0 %v3632_v33  ;;  %8081 = vmatprep.subr.mxu1 %v8751_v0 }
 0xb4a   : > { %8092 = vmatprep.subr.mxu0 %v8751_v0  ;;  %8082 = vmatpush3.msra.mxu1 %v10211_v56 }
 0xb4b   : > { %8093 = vmatpush3.msra.mxu0 %v3639_v10  ;;  %8083 = vmatprep.subr.mxu1 %v8751_v0 }
 0xb4c   : > { %8094 = vmatprep.subr.mxu0 %v8751_v0  ;;  %8084 = vmatpush3.msra.mxu1 %v10213_v32 }
 0xb4d   : > { %8095 = vmatpush3.msra.mxu0 %v3646_v44  ;;  %8085 = vmatprep.subr.mxu1 %v8751_v0  ;;  %v6761_v44 = vld [vmem:[%s11385_s3 + $0x38] sm:$0xff] }
 0xb4e   : > { %8096 = vmatprep.subr.mxu0 %v8751_v0  ;;  %8086 = vmatpush3.msra.mxu1 %v10190_v46 }
 0xb4f   : > { %8087 = vmatprep.mubr.msk.f32.mxu1 %vm8761_vm3, %v8751_v0  ;;  %8097 = vmatpush3.msra.mxu0 %v3653_v45 }
 0xb50   : > { %8088 = vmatmul.mubr.f32.vlgmr.msra.gmra.mxu1 %v3607_v40  ;;  %8098 = vmatprep.subr.mxu0 %v8751_v0 }
 0xb51   : > { %8111 = vmatprep.subr.mxu1 %v8751_v0  ;;  %8099 = vmatpush3.msra.mxu0 %v3660_v57 }
 0xb52   : > { %8112 = vmatpush3.msra.mxu1 %v10142_v6  ;;  %8100 = vmatprep.subr.mxu0 %v8751_v0 }
 0xb53   : > { %8113 = vmatprep.subr.mxu1 %v8751_v0  ;;  %8101 = vmatpush3.msra.mxu0 %v3667_v58 }
 0xb54   : > { %8114 = vmatpush3.msra.mxu1 %v10144_v22  ;;  %8102 = vmatprep.subr.mxu0 %v8751_v0 }
 0xb55   : > { %8115 = vmatprep.subr.mxu1 %v8751_v0  ;;  %8103 = vmatpush3.msra.mxu0 %v3674_v4 }
 0xb56   : > { %8116 = vmatpush3.msra.mxu1 %v10160_v30  ;;  %8104 = vmatprep.subr.mxu0 %v8751_v0 }
 0xb57   : > { %8117 = vmatprep.subr.mxu1 %v8751_v0  ;;  %8105 = vmatpush3.msra.mxu0 %v3681_v5 }
 0xb58   : > { %8118 = vmatpush3.msra.mxu1 %v10162_v31  ;;  %8106 = vmatprep.subr.mxu0 %v8751_v0 }
 0xb59   : > { %8119 = vmatprep.subr.mxu1 %v8751_v0  ;;  %8107 = vmatpush3.msra.mxu0 %v3688_v7 }
 0xb5a   : > { %8108 = vmatprep.mubr.msk.f32.mxu0 %vm8761_vm3, %v8751_v0  ;;  %8120 = vmatpush3.msra.mxu1 %v10183_v41 }
 0xb5b   : > { %8109 = vmatmul.mubr.f32.vlgmr.msra.gmra.mxu0 %v10138_v21  ;;  %8121 = vmatprep.subr.mxu1 %v8751_v0 }
 0xb5c   : > { %8122 = vmatpush3.msra.mxu1 %v10185_v43  ;;  %8129 = vmatprep.mubr.msk.f32.mxu1 %vm8761_vm3, %v8751_v0  ;;  %v6760_v43 = vld [vmem:[%s11384_s2 + $0x38] sm:$0xff] }
 0xb5d   : > { %8123 = vmatprep.subr.mxu1 %v8751_v0  ;;  %8132 = vmatprep.subr.mxu0 %v8751_v0 }
 0xb5e   : > { %8124 = vmatpush3.msra.mxu1 %v10211_v56  ;;  %8150 = vmatprep.mubr.msk.f32.mxu0 %vm8761_vm3, %v8751_v0  ;;  %v10390_v56 = vand.u32 4294901760, %v4173_v50 }
 0xb5f   : > { %8125 = vmatprep.subr.mxu1 %v8751_v0 }
 0xb60   : > { %8126 = vmatpush3.msra.mxu1 %v10213_v32  ;;  %v10407_v1 = vsub.f32 %v4173_v50, %v10390_v56 }
 0xb61   : > { %8127 = vmatprep.subr.mxu1 %v8751_v0 }
 0xb62   : > { %8128 = vmatpush3.msra.mxu1 %v10190_v46  ;;  %v4251_v15 = vand.u32 4294901760, %v10407_v1 }
 0xb63   : > { %8130 = vmatmul.mubr.f32.vlgmr.msra.gmra.mxu1 %v10138_v21  ;;  %8153 = vmatprep.subr.mxu1 %v8751_v0 }
 0xb64   : > { %8171 = vmatprep.mubr.msk.f32.mxu1 %vm8761_vm3, %v8751_v0 }
 0xbf3   : > { %v3611_v17 = vpop.f32.mrf.mxu0 }
 0xbf4   : > { %v3612_v28 = vadd.f32 %v3611_v17, %v3526_v27 }
 0xbf5   : > { %v8026_v19 = vpop.f32.mrf.mxu0 }
 0xbfc   : > { %v3727_v20 = vpop.f32.mrf.mxu1 }
 0xbfd   : > { %v3728_v29 = vadd.f32 %v3727_v20, %v3612_v28 }
 0xbfe   : > { %v8047_v6 = vpop.f32.mrf.mxu1 }
 0xc07   : > { %v3817_v22 = vpop.f32.mrf.mxu0 }
 0xc08   : > { %v3818_v31 = vadd.f32 %v3817_v22, %v3728_v29 }
 0xc09   : > { %v8068_v23 = vpop.f32.mrf.mxu0 }
 0xc10   : > { %v3899_v24 = vpop.f32.mrf.mxu1 }
 0xc11   : > { %v3900_v21 = vadd.f32 %v3899_v24, %v3818_v31 }
 0xc12   : > { %v8089_v25 = vpop.f32.mrf.mxu1 }
 0xc1b   : > { %v3997_v18 = vpop.f32.mrf.mxu0 }
 0xc1c   : > { %v3998_v33 = vadd.f32 %v3997_v18, %v3900_v21 }
 0xc1d   : > { %v8110_v30 = vpop.f32.mrf.mxu0 }
 0xc1e   : > { %v4252_v30 = vsub.f32 %v10407_v1, %v4251_v15 }
 0xc23   : > { %v4077_v10 = vpop.f32.mrf.mxu1 }
 0xc24   : > { %v4078_v11 = vadd.f32 %v4077_v10, %v3998_v33 }
 0xc25   : > { %v8131_v34 = vpop.f32.mrf.mxu1 }
 0xc26   : > { %v10359_v35 = vadd.f32 %v4078_v11, %v9859_v26  ;;  %v6759_v26 = vld [vmem:[%s11383_s1 + $0x30] sm:$0xff] }
 0xc28   : > { %v4089_v37 = vmul.f32 %v4087_v36, %v10359_v35 }
 0xc2a   : > { %v4097_v39 = vadd.f32 %v4095_v38, %v4089_v37 }
 0xc2c   : > { %v4098_v40 = vmax.f32 %v4097_v39, 0.0 }
 0xc2e   : > { %4100 = vrot.lane.b32.xlu1 %v4098_v40, %s8752_s10  ;;  %v4253_v40 = vand.u32 4294901760, %v4252_v30 }
 0xca0   : > { %v4101_v41 = vpop.permute.xlu1 %4100 }
 0xca1   : > { %4103 = vst.msk [vmem:[#allocation2] sm:$0xff] %vm227_vm1, %v4101_v41 }
 0xca8   : > { %v4148_v42 = vld [vmem:[#allocation2] sm:$0xff] }
 0xca9   : > { %4150 = vrot.lane.b32.xlu0 %v4148_v42, %s8753_s11  ;;  %4144 = vrot.lane.b32.xlu1 %v4148_v42, %s8754_s12  ;;  %4105 = vst.msk [vmem:[#allocation3] sm:$0xff] %vm230_vm2, %v4148_v42 }
 0xcad   : > { %4138 = vrot.lane.b32.xlu0 %v4148_v42, %s8755_s13  ;;  %4132 = vrot.lane.b32.xlu1 %v4148_v42, %s8756_s14 }
 0xcb0   : > { %v4156_v12 = vld [vmem:[#allocation3] sm:$0xff] }
 0xcb1   : > { %4126 = vrot.lane.b32.xlu0 %v4148_v42, %s8757_s15  ;;  %4120 = vrot.lane.b32.xlu1 %v4148_v42, %s11396_s16  ;;  %v10442_v22 = vand.u32 4294901760, %v4156_v12 }
 0xcb3   : > { %v10472_v34 = vsub.f32 %v4156_v12, %v10442_v22 }
 0xcb5   : > { %4114 = vrot.lane.b32.xlu0 %v4148_v42, %s11397_s17  ;;  %4108 = vrot.lane.b32.xlu1 %v4148_v42, %s11398_s23 }
 0xcb9   : > { %4169 = vperm.xlu0 %8688, %v6759_v26   ;;  %4729 = vperm.xlu1 %8687, %v6760_v43  }
 0xcbd   : > { %4737 = vperm.xlu0 %8688, %v6761_v44   ;;  %v4332_v44 = vand.u32 4294901760, %v10472_v34 }
 0xd1b   : > { %v4151_v45 = vpop.permute.xlu0 %4150  ;;  %v4145_v46 = vpop.permute.xlu1 %4144 }
 0xd1c   : > { %4153 = vst.msk [vmem:[#allocation3 + $0x40] sm:$0xff] %vm230_vm2, %v4151_v45  ;;  %4147 = vst.msk [vmem:[#allocation3 + $0x38] sm:$0xff] %vm230_vm2, %v4145_v46 }
 0xd1f   : > { %v4139_v48 = vpop.permute.xlu0 %4138  ;;  %v4133_v49 = vpop.permute.xlu1 %4132 }
 0xd20   : > { %4141 = vst.msk [vmem:[#allocation3 + $0x30] sm:$0xff] %vm230_vm2, %v4139_v48  ;;  %4135 = vst.msk [vmem:[#allocation3 + $0x28] sm:$0xff] %vm230_vm2, %v4133_v49  ;;  %v4333_v49 = vsub.f32 %v10472_v34, %v4332_v44 }
 0xd23   : > { %v4127_v51 = vpop.permute.xlu0 %4126  ;;  %v4121_v52 = vpop.permute.xlu1 %4120  ;;  %v4164_v53 = vld [vmem:[#allocation3 + $0x40] sm:$0xff]  ;;  %v4163_v54 = vld [vmem:[#allocation3 + $0x38] sm:$0xff] }
 0xd24   : > { %4129 = vst.msk [vmem:[#allocation3 + $0x20] sm:$0xff] %vm230_vm2, %v4127_v51  ;;  %4123 = vst.msk [vmem:[#allocation3 + $0x18] sm:$0xff] %vm230_vm2, %v4121_v52  ;;  %v10394_v32 = vand.u32 4294901760, %v4164_v53  ;;  %v10396_v57 = vand.u32 4294901760, %v4163_v54  ;;  %v4334_v51 = vand.u32 4294901760, %v4333_v49 }
 0xd26   : > { %8133 = vmatpush3.msra.mxu0 %v10394_v32  ;;  %v10400_v58 = vsub.f32 %v4164_v53, %v10394_v32  ;;  %v10403_v59 = vsub.f32 %v4163_v54, %v10396_v57 }
 0xd27   : > { %8134 = vmatprep.subr.mxu0 %v8751_v0  ;;  %v4115_v60 = vpop.permute.xlu0 %4114  ;;  %v4109_v61 = vpop.permute.xlu1 %4108  ;;  %v4162_v62 = vld [vmem:[#allocation3 + $0x30] sm:$0xff]  ;;  %v4161_v63 = vld [vmem:[#allocation3 + $0x28] sm:$0xff] }
 0xd28   : > { %4117 = vst.msk [vmem:[#allocation3 + $0x10] sm:$0xff] %vm230_vm2, %v4115_v60  ;;  %4111 = vst.msk [vmem:[#allocation3 + $0x8] sm:$0xff] %vm230_vm2, %v4109_v61  ;;  %8135 = vmatpush3.msra.mxu0 %v10396_v57  ;;  %v10412_v2 = vand.u32 4294901760, %v4162_v62  ;;  %v10414_v55 = vand.u32 4294901760, %v4161_v63  ;;  %v4276_v3 = vand.u32 4294901760, %v10400_v58  ;;  %v4283_v4 = vand.u32 4294901760, %v10403_v59 }
 0xd29   : > { %8136 = vmatprep.subr.mxu0 %v8751_v0 }
 0xd2a   : > { %8137 = vmatpush3.msra.mxu0 %v10412_v2  ;;  %v10421_v5 = vsub.f32 %v4162_v62, %v10412_v2  ;;  %v10424_v7 = vsub.f32 %v4161_v63, %v10414_v55  ;;  %v4277_v8 = vsub.f32 %v10400_v58, %v4276_v3  ;;  %v4284_v9 = vsub.f32 %v10403_v59, %v4283_v4 }
 0xd2b   : > { %8138 = vmatprep.subr.mxu0 %v8751_v0  ;;  %v4160_v13 = vld [vmem:[#allocation3 + $0x20] sm:$0xff]  ;;  %v4159_v14 = vld [vmem:[#allocation3 + $0x18] sm:$0xff] }
 0xd2c   : > { %8139 = vmatpush3.msra.mxu0 %v10414_v55  ;;  %v10435_v16 = vand.u32 4294901760, %v4160_v13  ;;  %v4278_v17 = vand.u32 4294901760, %v4277_v8  ;;  %v10437_v19 = vand.u32 4294901760, %v4159_v14  ;;  %v4290_v20 = vand.u32 4294901760, %v10421_v5 }
 0xd2d   : > { %8140 = vmatprep.subr.mxu0 %v8751_v0  ;;  %v4297_v6 = vand.u32 4294901760, %v10424_v7  ;;  %v4285_v25 = vand.u32 4294901760, %v4284_v9 }
 0xd2e   : > { %8141 = vmatpush3.msra.mxu0 %v10435_v16  ;;  %v10446_v23 = vsub.f32 %v4160_v13, %v10435_v16  ;;  %8154 = vmatpush3.msra.mxu1 %v4278_v17  ;;  %v10449_v24 = vsub.f32 %v4159_v14, %v10437_v19  ;;  %v4291_v28 = vsub.f32 %v10421_v5, %v4290_v20  ;;  %v6763_v17 = vld [vmem:[%s11383_s1 + $0x38] sm:$0xff] }
 0xd2f   : > { %8142 = vmatprep.subr.mxu0 %v8751_v0  ;;  %8155 = vmatprep.subr.mxu1 %v8751_v0  ;;  %v4158_v27 = vld [vmem:[#allocation3 + $0x10] sm:$0xff]  ;;  %v4298_v18 = vsub.f32 %v10424_v7, %v4297_v6  ;;  %v4157_v29 = vld [vmem:[#allocation3 + $0x8] sm:$0xff] }
 0xd30   : > { %8143 = vmatpush3.msra.mxu0 %v10437_v19  ;;  %8156 = vmatpush3.msra.mxu1 %v4285_v25  ;;  %v10463_v31 = vand.u32 4294901760, %v4158_v27  ;;  %v10465_v21 = vand.u32 4294901760, %v4157_v29  ;;  %v4304_v33 = vand.u32 4294901760, %v10446_v23  ;;  %v4311_v10 = vand.u32 4294901760, %v10449_v24 }
 0xd31   : > { %8144 = vmatprep.subr.mxu0 %v8751_v0  ;;  %8157 = vmatprep.subr.mxu1 %v8751_v0  ;;  %v4292_v11 = vand.u32 4294901760, %v4291_v28  ;;  %v4299_v39 = vand.u32 4294901760, %v4298_v18 }
 0xd32   : > { %8145 = vmatpush3.msra.mxu0 %v10463_v31  ;;  %v10476_v36 = vsub.f32 %v4158_v27, %v10463_v31  ;;  %v10479_v37 = vsub.f32 %v4157_v29, %v10465_v21  ;;  %v4305_v38 = vsub.f32 %v10446_v23, %v4304_v33  ;;  %v4312_v41 = vsub.f32 %v10449_v24, %v4311_v10 }
 0xd33   : > { %8158 = vmatpush3.msra.mxu1 %v4292_v11  ;;  %8146 = vmatprep.subr.mxu0 %v8751_v0 }
 0xd34   : > { %8159 = vmatprep.subr.mxu1 %v8751_v0  ;;  %8147 = vmatpush3.msra.mxu0 %v10465_v21  ;;  %v4306_v42 = vand.u32 4294901760, %v4305_v38  ;;  %v4318_v26 = vand.u32 4294901760, %v10476_v36  ;;  %v4325_v43 = vand.u32 4294901760, %v10479_v37  ;;  %v4313_v46 = vand.u32 4294901760, %v4312_v41  ;;  %v4170_v61 = vpop.permute.xlu0 %4169 }
 0xd35   : > { %8160 = vmatpush3.msra.mxu1 %v4299_v39  ;;  %8148 = vmatprep.subr.mxu0 %v8751_v0 }
 0xd36   : > { %8161 = vmatprep.subr.mxu1 %v8751_v0  ;;  %8149 = vmatpush3.msra.mxu0 %v10442_v22  ;;  %v4319_v45 = vsub.f32 %v10476_v36, %v4318_v26  ;;  %v4326_v47 = vsub.f32 %v10479_v37, %v4325_v43 }
 0xd37   : > { %8162 = vmatpush3.msra.mxu1 %v4306_v42  ;;  %8151 = vmatmul.mubr.f32.vlgmr.msra.gmra.mxu0 %v4253_v40 }
 0xd38   : > { %8163 = vmatprep.subr.mxu1 %v8751_v0  ;;  %8174 = vmatprep.subr.mxu0 %v8751_v0  ;;  %v4320_v48 = vand.u32 4294901760, %v4319_v45  ;;  %v4327_v50 = vand.u32 4294901760, %v4326_v47  ;;  %v4738_v12 = vpop.permute.xlu0 %4737 }
 0xd39   : > { %8164 = vmatpush3.msra.mxu1 %v4313_v46  ;;  %8175 = vmatpush3.msra.mxu0 %v10400_v58 }
 0xd3a   : > { %8165 = vmatprep.subr.mxu1 %v8751_v0  ;;  %8176 = vmatprep.subr.mxu0 %v8751_v0 }
 0xd3b   : > { %8166 = vmatpush3.msra.mxu1 %v4320_v48  ;;  %8177 = vmatpush3.msra.mxu0 %v10403_v59 }
 0xd3c   : > { %8167 = vmatprep.subr.mxu1 %v8751_v0  ;;  %8178 = vmatprep.subr.mxu0 %v8751_v0 }
 0xd3d   : > { %8168 = vmatpush3.msra.mxu1 %v4327_v50  ;;  %8179 = vmatpush3.msra.mxu0 %v10421_v5 }
 0xd3e   : > { %8169 = vmatprep.subr.mxu1 %v8751_v0  ;;  %8180 = vmatprep.subr.mxu0 %v8751_v0 }
 0xd3f   : > { %8170 = vmatpush3.msra.mxu1 %v4334_v51  ;;  %8181 = vmatpush3.msra.mxu0 %v10424_v7  ;;  %v4730_v7 = vpop.permute.xlu1 %4729 }
 0xd40   : > { %8172 = vmatmul.mubr.f32.vlgmr.msra.gmra.mxu1 %v10390_v56  ;;  %8182 = vmatprep.subr.mxu0 %v8751_v0 }
 0xd41   : > { %8195 = vmatprep.subr.mxu1 %v8751_v0  ;;  %8183 = vmatpush3.msra.mxu0 %v10446_v23  ;;  %v6762_v23 = vld [vmem:[%s11382_s0 + $0x38] sm:$0xff] }
 0xd42   : > { %8196 = vmatpush3.msra.mxu1 %v10394_v32  ;;  %8184 = vmatprep.subr.mxu0 %v8751_v0  ;;  %v4816_v27 = vsel %vm296_vm4, %v6762_v23, 0 }
 0xd43   : > { %8197 = vmatprep.subr.mxu1 %v8751_v0  ;;  %8185 = vmatpush3.msra.mxu0 %v10449_v24 }
 0xd44   : > { %8198 = vmatpush3.msra.mxu1 %v10396_v57  ;;  %8186 = vmatprep.subr.mxu0 %v8751_v0 }
 0xd45   : > { %8199 = vmatprep.subr.mxu1 %v8751_v0  ;;  %8187 = vmatpush3.msra.mxu0 %v10476_v36 }
 0xd46   : > { %8200 = vmatpush3.msra.mxu1 %v10412_v2  ;;  %8188 = vmatprep.subr.mxu0 %v8751_v0 }
 0xd47   : > { %8201 = vmatprep.subr.mxu1 %v8751_v0  ;;  %8189 = vmatpush3.msra.mxu0 %v10479_v37 }
 0xd48   : > { %8202 = vmatpush3.msra.mxu1 %v10414_v55  ;;  %8190 = vmatprep.subr.mxu0 %v8751_v0 }
 0xd49   : > { %8203 = vmatprep.subr.mxu1 %v8751_v0  ;;  %8191 = vmatpush3.msra.mxu0 %v10472_v34 }
 0xd4a   : > { %8192 = vmatprep.mubr.msk.f32.mxu0 %vm8761_vm3, %v8751_v0  ;;  %8204 = vmatpush3.msra.mxu1 %v10435_v16 }
 0xd4b   : > { %8193 = vmatmul.mubr.f32.vlgmr.msra.gmra.mxu0 %v10407_v1  ;;  %8205 = vmatprep.subr.mxu1 %v8751_v0 }
 0xd4c   : > { %8216 = vmatprep.subr.mxu0 %v8751_v0  ;;  %8206 = vmatpush3.msra.mxu1 %v10437_v19 }
 0xd4d   : > { %8217 = vmatpush3.msra.mxu0 %v4276_v3  ;;  %8207 = vmatprep.subr.mxu1 %v8751_v0 }
 0xd4e   : > { %8218 = vmatprep.subr.mxu0 %v8751_v0  ;;  %8208 = vmatpush3.msra.mxu1 %v10463_v31 }
 0xd4f   : > { %8219 = vmatpush3.msra.mxu0 %v4283_v4  ;;  %8209 = vmatprep.subr.mxu1 %v8751_v0 }
 0xd50   : > { %8220 = vmatprep.subr.mxu0 %v8751_v0  ;;  %8210 = vmatpush3.msra.mxu1 %v10465_v21 }
 0xd51   : > { %8221 = vmatpush3.msra.mxu0 %v4290_v20  ;;  %8211 = vmatprep.subr.mxu1 %v8751_v0  ;;  %v6765_v20 = vld [vmem:[%s11385_s3 + $0x40] sm:$0xff] }
 0xd52   : > { %8222 = vmatprep.subr.mxu0 %v8751_v0  ;;  %8212 = vmatpush3.msra.mxu1 %v10442_v22 }
 0xd53   : > { %8213 = vmatprep.mubr.msk.f32.mxu1 %vm8761_vm3, %v8751_v0  ;;  %8223 = vmatpush3.msra.mxu0 %v4297_v6 }
 0xd54   : > { %8214 = vmatmul.mubr.f32.vlgmr.msra.gmra.mxu1 %v4251_v15  ;;  %8224 = vmatprep.subr.mxu0 %v8751_v0 }
 0xd55   : > { %8237 = vmatprep.subr.mxu1 %v8751_v0  ;;  %8225 = vmatpush3.msra.mxu0 %v4304_v33 }
 0xd56   : > { %8238 = vmatpush3.msra.mxu1 %v10394_v32  ;;  %8226 = vmatprep.subr.mxu0 %v8751_v0 }
 0xd57   : > { %8239 = vmatprep.subr.mxu1 %v8751_v0  ;;  %8227 = vmatpush3.msra.mxu0 %v4311_v10 }
 0xd58   : > { %8240 = vmatpush3.msra.mxu1 %v10396_v57  ;;  %8228 = vmatprep.subr.mxu0 %v8751_v0 }
 0xd59   : > { %8241 = vmatprep.subr.mxu1 %v8751_v0  ;;  %8229 = vmatpush3.msra.mxu0 %v4318_v26 }
 0xd5a   : > { %8242 = vmatpush3.msra.mxu1 %v10412_v2  ;;  %8230 = vmatprep.subr.mxu0 %v8751_v0 }
 0xd5b   : > { %8243 = vmatprep.subr.mxu1 %v8751_v0  ;;  %8231 = vmatpush3.msra.mxu0 %v4325_v43 }
 0xd5c   : > { %8244 = vmatpush3.msra.mxu1 %v10414_v55  ;;  %8232 = vmatprep.subr.mxu0 %v8751_v0 }
 0xd5d   : > { %8245 = vmatprep.subr.mxu1 %v8751_v0  ;;  %8233 = vmatpush3.msra.mxu0 %v4332_v44 }
 0xd5e   : > { %8234 = vmatprep.mubr.msk.f32.mxu0 %vm8761_vm3, %v8751_v0  ;;  %8246 = vmatpush3.msra.mxu1 %v10435_v16 }
 0xd5f   : > { %8235 = vmatmul.mubr.f32.vlgmr.msra.gmra.mxu0 %v10390_v56  ;;  %8247 = vmatprep.subr.mxu1 %v8751_v0 }
 0xd60   : > { %8248 = vmatpush3.msra.mxu1 %v10437_v19  ;;  %8255 = vmatprep.mubr.msk.f32.mxu1 %vm8761_vm3, %v8751_v0  ;;  %v6764_v19 = vld [vmem:[%s11384_s2 + $0x40] sm:$0xff] }
 0xd61   : > { %8249 = vmatprep.subr.mxu1 %v8751_v0  ;;  %8258 = vmatprep.subr.mxu0 %v8751_v0 }
 0xd62   : > { %8250 = vmatpush3.msra.mxu1 %v10463_v31  ;;  %8276 = vmatprep.mubr.msk.f32.mxu0 %vm8761_vm3, %v8751_v0  ;;  %v10638_v31 = vand.u32 4294901760, %v4816_v27 }
 0xd63   : > { %8251 = vmatprep.subr.mxu1 %v8751_v0 }
 0xd64   : > { %8252 = vmatpush3.msra.mxu1 %v10465_v21  ;;  %v10655_v39 = vsub.f32 %v4816_v27, %v10638_v31 }
 0xd65   : > { %8253 = vmatprep.subr.mxu1 %v8751_v0 }
 0xd66   : > { %8254 = vmatpush3.msra.mxu1 %v10442_v22  ;;  %v4894_v50 = vand.u32 4294901760, %v10655_v39 }
 0xd67   : > { %8256 = vmatmul.mubr.f32.vlgmr.msra.gmra.mxu1 %v10390_v56  ;;  %8279 = vmatprep.subr.mxu1 %v8751_v0 }
 0xd68   : > { %8297 = vmatprep.mubr.msk.f32.mxu1 %vm8761_vm3, %v8751_v0 }
 0xdf7   : > { %v4255_v52 = vpop.f32.mrf.mxu0 }
 0xdf8   : > { %v4256_v62 = vadd.f32 %v4255_v52, %v4170_v61 }
 0xdf9   : > { %v8152_v53 = vpop.f32.mrf.mxu0 }
 0xe00   : > { %v4371_v54 = vpop.f32.mrf.mxu1 }
 0xe01   : > { %v4372_v1 = vadd.f32 %v4371_v54, %v4256_v62 }
 0xe02   : > { %v8173_v32 = vpop.f32.mrf.mxu1 }
 0xe0b   : > { %v4461_v57 = vpop.f32.mrf.mxu0 }
 0xe0c   : > { %v4462_v55 = vadd.f32 %v4461_v57, %v4372_v1 }
 0xe0d   : > { %v8194_v58 = vpop.f32.mrf.mxu0 }
 0xe14   : > { %v4543_v59 = vpop.f32.mrf.mxu1 }
 0xe15   : > { %v4544_v56 = vadd.f32 %v4543_v59, %v4462_v55 }
 0xe16   : > { %v8215_v60 = vpop.f32.mrf.mxu1 }
 0xe1f   : > { %v4641_v63 = vpop.f32.mrf.mxu0 }
 0xe20   : > { %v4642_v3 = vadd.f32 %v4641_v63, %v4544_v56 }
 0xe21   : > { %v8236_v2 = vpop.f32.mrf.mxu0 }
 0xe22   : > { %v4895_v2 = vsub.f32 %v10655_v39, %v4894_v50 }
 0xe27   : > { %v4721_v4 = vpop.f32.mrf.mxu1 }
 0xe28   : > { %v4722_v5 = vadd.f32 %v4721_v4, %v4642_v3 }
 0xe29   : > { %v8257_v8 = vpop.f32.mrf.mxu1 }
 0xe2a   : > { %v4732_v9 = vmul.f32 %v4730_v7, %v4722_v5 }
 0xe2c   : > { %v4740_v13 = vadd.f32 %v4738_v12, %v4732_v9 }
 0xe2e   : > { %v4741_v14 = vmax.f32 %v4740_v13, 0.0 }
 0xe30   : > { %4743 = vrot.lane.b32.xlu1 %v4741_v14, %s8752_s10  ;;  %v4896_v14 = vand.u32 4294901760, %v4895_v2 }
 0xea2   : > { %v4744_v15 = vpop.permute.xlu1 %4743 }
 0xea3   : > { %4746 = vst.msk [vmem:[#allocation2] sm:$0xff] %vm227_vm1, %v4744_v15 }
 0xeaa   : > { %v4791_v16 = vld [vmem:[#allocation2] sm:$0xff] }
 0xeab   : > { %4793 = vrot.lane.b32.xlu0 %v4791_v16, %s8753_s11  ;;  %4787 = vrot.lane.b32.xlu1 %v4791_v16, %s8754_s12  ;;  %4748 = vst.msk [vmem:[#allocation3] sm:$0xff] %vm230_vm2, %v4791_v16 }
 0xeaf   : > { %4781 = vrot.lane.b32.xlu0 %v4791_v16, %s8755_s13  ;;  %4775 = vrot.lane.b32.xlu1 %v4791_v16, %s8756_s14 }
 0xeb2   : > { %v4799_v47 = vld [vmem:[#allocation3] sm:$0xff] }
 0xeb3   : > { %4769 = vrot.lane.b32.xlu0 %v4791_v16, %s8757_s15  ;;  %4763 = vrot.lane.b32.xlu1 %v4791_v16, %s11396_s16  ;;  %v10690_v57 = vand.u32 4294901760, %v4799_v47 }
 0xeb5   : > { %v10720_v7 = vsub.f32 %v4799_v47, %v10690_v57 }
 0xeb7   : > { %4757 = vrot.lane.b32.xlu0 %v4791_v16, %s11397_s17  ;;  %4751 = vrot.lane.b32.xlu1 %v4791_v16, %s11398_s23 }
 0xebb   : > { %4812 = vperm.xlu0 %8688, %v6763_v17   ;;  %5373 = vperm.xlu1 %8687, %v6764_v19  }
 0xebf   : > { %5381 = vperm.xlu0 %8688, %v6765_v20   ;;  %v4975_v20 = vand.u32 4294901760, %v10720_v7 }
 0xf1d   : > { %v4794_v6 = vpop.permute.xlu0 %4793  ;;  %v4788_v22 = vpop.permute.xlu1 %4787 }
 0xf1e   : > { %4796 = vst.msk [vmem:[#allocation3 + $0x40] sm:$0xff] %vm230_vm2, %v4794_v6  ;;  %4790 = vst.msk [vmem:[#allocation3 + $0x38] sm:$0xff] %vm230_vm2, %v4788_v22 }
 0xf21   : > { %v4782_v24 = vpop.permute.xlu0 %4781  ;;  %v4776_v25 = vpop.permute.xlu1 %4775 }
 0xf22   : > { %4784 = vst.msk [vmem:[#allocation3 + $0x30] sm:$0xff] %vm230_vm2, %v4782_v24  ;;  %4778 = vst.msk [vmem:[#allocation3 + $0x28] sm:$0xff] %vm230_vm2, %v4776_v25  ;;  %v4976_v25 = vsub.f32 %v10720_v7, %v4975_v20 }
 0xf25   : > { %v4770_v28 = vpop.permute.xlu0 %4769  ;;  %v4764_v18 = vpop.permute.xlu1 %4763  ;;  %v4807_v29 = vld [vmem:[#allocation3 + $0x40] sm:$0xff]  ;;  %v4806_v30 = vld [vmem:[#allocation3 + $0x38] sm:$0xff] }
 0xf26   : > { %4772 = vst.msk [vmem:[#allocation3 + $0x20] sm:$0xff] %vm230_vm2, %v4770_v28  ;;  %4766 = vst.msk [vmem:[#allocation3 + $0x18] sm:$0xff] %vm230_vm2, %v4764_v18  ;;  %v10642_v21 = vand.u32 4294901760, %v4807_v29  ;;  %v10644_v33 = vand.u32 4294901760, %v4806_v30  ;;  %v4977_v28 = vand.u32 4294901760, %v4976_v25 }
 0xf28   : > { %8259 = vmatpush3.msra.mxu0 %v10642_v21  ;;  %v10648_v10 = vsub.f32 %v4807_v29, %v10642_v21  ;;  %v10651_v11 = vsub.f32 %v4806_v30, %v10644_v33 }
 0xf29   : > { %8260 = vmatprep.subr.mxu0 %v8751_v0  ;;  %v4758_v34 = vpop.permute.xlu0 %4757  ;;  %v4752_v36 = vpop.permute.xlu1 %4751  ;;  %v4805_v37 = vld [vmem:[#allocation3 + $0x30] sm:$0xff]  ;;  %v4804_v38 = vld [vmem:[#allocation3 + $0x28] sm:$0xff] }
 0xf2a   : > { %4760 = vst.msk [vmem:[#allocation3 + $0x10] sm:$0xff] %vm230_vm2, %v4758_v34  ;;  %4754 = vst.msk [vmem:[#allocation3 + $0x8] sm:$0xff] %vm230_vm2, %v4752_v36  ;;  %8261 = vmatpush3.msra.mxu0 %v10644_v33  ;;  %v10660_v40 = vand.u32 4294901760, %v4805_v37  ;;  %v10662_v41 = vand.u32 4294901760, %v4804_v38  ;;  %v4919_v42 = vand.u32 4294901760, %v10648_v10  ;;  %v4926_v26 = vand.u32 4294901760, %v10651_v11 }
 0xf2b   : > { %8262 = vmatprep.subr.mxu0 %v8751_v0 }
 0xf2c   : > { %8263 = vmatpush3.msra.mxu0 %v10660_v40  ;;  %v10669_v43 = vsub.f32 %v4805_v37, %v10660_v40  ;;  %v10672_v44 = vsub.f32 %v4804_v38, %v10662_v41  ;;  %v4920_v45 = vsub.f32 %v10648_v10, %v4919_v42  ;;  %v4927_v46 = vsub.f32 %v10651_v11, %v4926_v26 }
 0xf2d   : > { %8264 = vmatprep.subr.mxu0 %v8751_v0  ;;  %v4803_v48 = vld [vmem:[#allocation3 + $0x20] sm:$0xff]  ;;  %v4802_v49 = vld [vmem:[#allocation3 + $0x18] sm:$0xff] }
 0xf2e   : > { %8265 = vmatpush3.msra.mxu0 %v10662_v41  ;;  %v10683_v51 = vand.u32 4294901760, %v4803_v48  ;;  %v4921_v52 = vand.u32 4294901760, %v4920_v45  ;;  %v10685_v53 = vand.u32 4294901760, %v4802_v49  ;;  %v4933_v54 = vand.u32 4294901760, %v10669_v43 }
 0xf2f   : > { %8266 = vmatprep.subr.mxu0 %v8751_v0  ;;  %v4940_v32 = vand.u32 4294901760, %v10672_v44  ;;  %v4928_v60 = vand.u32 4294901760, %v4927_v46 }
 0xf30   : > { %8267 = vmatpush3.msra.mxu0 %v10683_v51  ;;  %v10694_v58 = vsub.f32 %v4803_v48, %v10683_v51  ;;  %8280 = vmatpush3.msra.mxu1 %v4921_v52  ;;  %v10697_v59 = vsub.f32 %v4802_v49, %v10685_v53  ;;  %v4934_v62 = vsub.f32 %v10669_v43, %v4933_v54 }
 0xf31   : > { %8268 = vmatprep.subr.mxu0 %v8751_v0  ;;  %8281 = vmatprep.subr.mxu1 %v8751_v0  ;;  %v4801_v61 = vld [vmem:[#allocation3 + $0x10] sm:$0xff]  ;;  %v4941_v63 = vsub.f32 %v10672_v44, %v4940_v32  ;;  %v4800_v1 = vld [vmem:[#allocation3 + $0x8] sm:$0xff] }
 0xf32   : > { %8269 = vmatpush3.msra.mxu0 %v10685_v53  ;;  %8282 = vmatpush3.msra.mxu1 %v4928_v60  ;;  %v10711_v55 = vand.u32 4294901760, %v4801_v61  ;;  %v10713_v56 = vand.u32 4294901760, %v4800_v1  ;;  %v4947_v3 = vand.u32 4294901760, %v10694_v58  ;;  %v4954_v4 = vand.u32 4294901760, %v10697_v59 }
 0xf33   : > { %8270 = vmatprep.subr.mxu0 %v8751_v0  ;;  %8283 = vmatprep.subr.mxu1 %v8751_v0  ;;  %v4935_v5 = vand.u32 4294901760, %v4934_v62  ;;  %v4942_v13 = vand.u32 4294901760, %v4941_v63 }
 0xf34   : > { %8271 = vmatpush3.msra.mxu0 %v10711_v55  ;;  %v10724_v8 = vsub.f32 %v4801_v61, %v10711_v55  ;;  %v10727_v9 = vsub.f32 %v4800_v1, %v10713_v56  ;;  %v4948_v12 = vsub.f32 %v10694_v58, %v4947_v3  ;;  %v4955_v15 = vsub.f32 %v10697_v59, %v4954_v4 }
 0xf35   : > { %8284 = vmatpush3.msra.mxu1 %v4935_v5  ;;  %8272 = vmatprep.subr.mxu0 %v8751_v0 }
 0xf36   : > { %8285 = vmatprep.subr.mxu1 %v8751_v0  ;;  %8273 = vmatpush3.msra.mxu0 %v10713_v56  ;;  %v4949_v16 = vand.u32 4294901760, %v4948_v12  ;;  %v4961_v17 = vand.u32 4294901760, %v10724_v8  ;;  %v4968_v19 = vand.u32 4294901760, %v10727_v9  ;;  %v4956_v22 = vand.u32 4294901760, %v4955_v15  ;;  %v4813_v36 = vpop.permute.xlu0 %4812  ;;  %v5374_v46 = vpop.permute.xlu1 %5373 }
 0xf37   : > { %8286 = vmatpush3.msra.mxu1 %v4942_v13  ;;  %8274 = vmatprep.subr.mxu0 %v8751_v0 }
 0xf38   : > { %8287 = vmatprep.subr.mxu1 %v8751_v0  ;;  %8275 = vmatpush3.msra.mxu0 %v10690_v57  ;;  %v4962_v6 = vsub.f32 %v10724_v8, %v4961_v17  ;;  %v4969_v23 = vsub.f32 %v10727_v9, %v4968_v19 }
 0xf39   : > { %8288 = vmatpush3.msra.mxu1 %v4949_v16  ;;  %8277 = vmatmul.mubr.f32.vlgmr.msra.gmra.mxu0 %v4896_v14 }
 0xf3a   : > { %8289 = vmatprep.subr.mxu1 %v8751_v0  ;;  %8300 = vmatprep.subr.mxu0 %v8751_v0  ;;  %v4963_v24 = vand.u32 4294901760, %v4962_v6  ;;  %v4970_v27 = vand.u32 4294901760, %v4969_v23  ;;  %v5382_v48 = vpop.permute.xlu0 %5381 }
 0xf3b   : > { %8290 = vmatpush3.msra.mxu1 %v4956_v22  ;;  %8301 = vmatpush3.msra.mxu0 %v10648_v10 }
 0xf3c   : > { %8291 = vmatprep.subr.mxu1 %v8751_v0  ;;  %8302 = vmatprep.subr.mxu0 %v8751_v0 }
 0xf3d   : > { %8292 = vmatpush3.msra.mxu1 %v4963_v24  ;;  %8303 = vmatpush3.msra.mxu0 %v10651_v11 }
 0xf3e   : > { %8293 = vmatprep.subr.mxu1 %v8751_v0  ;;  %8304 = vmatprep.subr.mxu0 %v8751_v0 }
 0xf3f   : > { %8294 = vmatpush3.msra.mxu1 %v4970_v27  ;;  %8305 = vmatpush3.msra.mxu0 %v10669_v43 }
 0xf40   : > { %8295 = vmatprep.subr.mxu1 %v8751_v0  ;;  %8306 = vmatprep.subr.mxu0 %v8751_v0 }
 0xf41   : > { %8296 = vmatpush3.msra.mxu1 %v4977_v28  ;;  %8307 = vmatpush3.msra.mxu0 %v10672_v44 }
 0xf42   : > { %8298 = vmatmul.mubr.f32.vlgmr.msra.gmra.mxu1 %v10638_v31  ;;  %8308 = vmatprep.subr.mxu0 %v8751_v0 }
 0xf43   : > { %8321 = vmatprep.subr.mxu1 %v8751_v0  ;;  %8309 = vmatpush3.msra.mxu0 %v10694_v58  ;;  %v6766_v58 = vld [vmem:[%s11382_s0 + $0x40] sm:$0xff] }
 0xf44   : > { %8322 = vmatpush3.msra.mxu1 %v10642_v21  ;;  %8310 = vmatprep.subr.mxu0 %v8751_v0  ;;  %v5460_v61 = vsel %vm296_vm4, %v6766_v58, 0 }
 0xf45   : > { %8323 = vmatprep.subr.mxu1 %v8751_v0  ;;  %8311 = vmatpush3.msra.mxu0 %v10697_v59 }
 0xf46   : > { %8324 = vmatpush3.msra.mxu1 %v10644_v33  ;;  %8312 = vmatprep.subr.mxu0 %v8751_v0 }
 0xf47   : > { %8325 = vmatprep.subr.mxu1 %v8751_v0  ;;  %8313 = vmatpush3.msra.mxu0 %v10724_v8 }
 0xf48   : > { %8326 = vmatpush3.msra.mxu1 %v10660_v40  ;;  %8314 = vmatprep.subr.mxu0 %v8751_v0 }
 0xf49   : > { %8327 = vmatprep.subr.mxu1 %v8751_v0  ;;  %8315 = vmatpush3.msra.mxu0 %v10727_v9 }
 0xf4a   : > { %8328 = vmatpush3.msra.mxu1 %v10662_v41  ;;  %8316 = vmatprep.subr.mxu0 %v8751_v0 }
 0xf4b   : > { %8329 = vmatprep.subr.mxu1 %v8751_v0  ;;  %8317 = vmatpush3.msra.mxu0 %v10720_v7 }
 0xf4c   : > { %8318 = vmatprep.mubr.msk.f32.mxu0 %vm8761_vm3, %v8751_v0  ;;  %8330 = vmatpush3.msra.mxu1 %v10683_v51 }
 0xf4d   : > { %8319 = vmatmul.mubr.f32.vlgmr.msra.gmra.mxu0 %v10655_v39  ;;  %8331 = vmatprep.subr.mxu1 %v8751_v0 }
 0xf4e   : > { %8342 = vmatprep.subr.mxu0 %v8751_v0  ;;  %8332 = vmatpush3.msra.mxu1 %v10685_v53 }
 0xf4f   : > { %8343 = vmatpush3.msra.mxu0 %v4919_v42  ;;  %8333 = vmatprep.subr.mxu1 %v8751_v0 }
 0xf50   : > { %8344 = vmatprep.subr.mxu0 %v8751_v0  ;;  %8334 = vmatpush3.msra.mxu1 %v10711_v55 }
 0xf51   : > { %8345 = vmatpush3.msra.mxu0 %v4926_v26  ;;  %8335 = vmatprep.subr.mxu1 %v8751_v0 }
 0xf52   : > { %8346 = vmatprep.subr.mxu0 %v8751_v0  ;;  %8336 = vmatpush3.msra.mxu1 %v10713_v56 }
 0xf53   : > { %8347 = vmatpush3.msra.mxu0 %v4933_v54  ;;  %8337 = vmatprep.subr.mxu1 %v8751_v0  ;;  %v6769_v54 = vld [vmem:[%s11385_s3 + $0x48] sm:$0xff] }
 0xf54   : > { %8348 = vmatprep.subr.mxu0 %v8751_v0  ;;  %8338 = vmatpush3.msra.mxu1 %v10690_v57 }
 0xf55   : > { %8339 = vmatprep.mubr.msk.f32.mxu1 %vm8761_vm3, %v8751_v0  ;;  %8349 = vmatpush3.msra.mxu0 %v4940_v32 }
 0xf56   : > { %8340 = vmatmul.mubr.f32.vlgmr.msra.gmra.mxu1 %v4894_v50  ;;  %8350 = vmatprep.subr.mxu0 %v8751_v0 }
 0xf57   : > { %8363 = vmatprep.subr.mxu1 %v8751_v0  ;;  %8351 = vmatpush3.msra.mxu0 %v4947_v3 }
 0xf58   : > { %8364 = vmatpush3.msra.mxu1 %v10642_v21  ;;  %8352 = vmatprep.subr.mxu0 %v8751_v0 }
 0xf59   : > { %8365 = vmatprep.subr.mxu1 %v8751_v0  ;;  %8353 = vmatpush3.msra.mxu0 %v4954_v4 }
 0xf5a   : > { %8366 = vmatpush3.msra.mxu1 %v10644_v33  ;;  %8354 = vmatprep.subr.mxu0 %v8751_v0 }
 0xf5b   : > { %8367 = vmatprep.subr.mxu1 %v8751_v0  ;;  %8355 = vmatpush3.msra.mxu0 %v4961_v17 }
 0xf5c   : > { %8368 = vmatpush3.msra.mxu1 %v10660_v40  ;;  %8356 = vmatprep.subr.mxu0 %v8751_v0 }
 0xf5d   : > { %8369 = vmatprep.subr.mxu1 %v8751_v0  ;;  %8357 = vmatpush3.msra.mxu0 %v4968_v19 }
 0xf5e   : > { %8370 = vmatpush3.msra.mxu1 %v10662_v41  ;;  %8358 = vmatprep.subr.mxu0 %v8751_v0 }
 0xf5f   : > { %8371 = vmatprep.subr.mxu1 %v8751_v0  ;;  %8359 = vmatpush3.msra.mxu0 %v4975_v20 }
 0xf60   : > { %8360 = vmatprep.mubr.msk.f32.mxu0 %vm8761_vm3, %v8751_v0  ;;  %8372 = vmatpush3.msra.mxu1 %v10683_v51 }
 0xf61   : > { %8361 = vmatmul.mubr.f32.vlgmr.msra.gmra.mxu0 %v10638_v31  ;;  %8373 = vmatprep.subr.mxu1 %v8751_v0 }
 0xf62   : > { %8374 = vmatpush3.msra.mxu1 %v10685_v53  ;;  %8381 = vmatprep.mubr.msk.f32.mxu1 %vm8761_vm3, %v8751_v0  ;;  %v6768_v53 = vld [vmem:[%s11384_s2 + $0x48] sm:$0xff] }
 0xf63   : > { %8375 = vmatprep.subr.mxu1 %v8751_v0  ;;  %8384 = vmatprep.subr.mxu0 %v8751_v0 }
 0xf64   : > { %8376 = vmatpush3.msra.mxu1 %v10711_v55  ;;  %8402 = vmatprep.mubr.msk.f32.mxu0 %vm8761_vm3, %v8751_v0  ;;  %v10890_v55 = vand.u32 4294901760, %v5460_v61 }
 0xf65   : > { %8377 = vmatprep.subr.mxu1 %v8751_v0 }
 0xf66   : > { %8378 = vmatpush3.msra.mxu1 %v10713_v56  ;;  %v10907_v13 = vsub.f32 %v5460_v61, %v10890_v55 }
 0xf67   : > { %8379 = vmatprep.subr.mxu1 %v8751_v0 }
 0xf68   : > { %8380 = vmatpush3.msra.mxu1 %v10690_v57  ;;  %v5538_v27 = vand.u32 4294901760, %v10907_v13 }
 0xf69   : > { %8382 = vmatmul.mubr.f32.vlgmr.msra.gmra.mxu1 %v10638_v31  ;;  %8405 = vmatprep.subr.mxu1 %v8751_v0 }
 0xf6a   : > { %8423 = vmatprep.mubr.msk.f32.mxu1 %vm8761_vm3, %v8751_v0 }
 0xff9   : > { %v4898_v18 = vpop.f32.mrf.mxu0 }
 0xffa   : > { %v4899_v37 = vadd.f32 %v4898_v18, %v4813_v36 }
 0xffb   : > { %v8278_v29 = vpop.f32.mrf.mxu0 }
0x1002   : > { %v5014_v30 = vpop.f32.mrf.mxu1 }
0x1003   : > { %v5015_v39 = vadd.f32 %v5014_v30, %v4899_v37 }
0x1004   : > { %v8299_v21 = vpop.f32.mrf.mxu1 }
0x100d   : > { %v5104_v33 = vpop.f32.mrf.mxu0 }
0x100e   : > { %v5105_v41 = vadd.f32 %v5104_v33, %v5015_v39 }
0x100f   : > { %v8320_v10 = vpop.f32.mrf.mxu0 }
0x1016   : > { %v5186_v11 = vpop.f32.mrf.mxu1 }
0x1017   : > { %v5187_v31 = vadd.f32 %v5186_v11, %v5105_v41 }
0x1018   : > { %v8341_v34 = vpop.f32.mrf.mxu1 }
0x1021   : > { %v5284_v38 = vpop.f32.mrf.mxu0 }
0x1022   : > { %v5285_v42 = vadd.f32 %v5284_v38, %v5187_v31 }
0x1023   : > { %v8362_v40 = vpop.f32.mrf.mxu0 }
0x1024   : > { %v5539_v40 = vsub.f32 %v10907_v13, %v5538_v27 }
0x1029   : > { %v5364_v26 = vpop.f32.mrf.mxu1 }
0x102a   : > { %v5365_v43 = vadd.f32 %v5364_v26, %v5285_v42 }
0x102b   : > { %v8383_v44 = vpop.f32.mrf.mxu1 }
0x102c   : > { %v10859_v45 = vadd.f32 %v5365_v43, %v10359_v35  ;;  %v6767_v35 = vld [vmem:[%s11383_s1 + $0x40] sm:$0xff] }
0x102e   : > { %v5376_v47 = vmul.f32 %v5374_v46, %v10859_v45 }
0x1030   : > { %v5384_v49 = vadd.f32 %v5382_v48, %v5376_v47 }
0x1032   : > { %v5385_v50 = vmax.f32 %v5384_v49, 0.0 }
0x1034   : > { %5387 = vrot.lane.b32.xlu1 %v5385_v50, %s8752_s10  ;;  %v5540_v50 = vand.u32 4294901760, %v5539_v40 }
0x10a6   : > { %v5388_v51 = vpop.permute.xlu1 %5387 }
0x10a7   : > { %5390 = vst.msk [vmem:[#allocation2] sm:$0xff] %vm227_vm1, %v5388_v51 }
0x10ae   : > { %v5435_v52 = vld [vmem:[#allocation2] sm:$0xff] }
0x10af   : > { %5437 = vrot.lane.b32.xlu0 %v5435_v52, %s8753_s11  ;;  %5431 = vrot.lane.b32.xlu1 %v5435_v52, %s8754_s12  ;;  %5392 = vst.msk [vmem:[#allocation3] sm:$0xff] %vm230_vm2, %v5435_v52 }
0x10b3   : > { %5425 = vrot.lane.b32.xlu0 %v5435_v52, %s8755_s13  ;;  %5419 = vrot.lane.b32.xlu1 %v5435_v52, %s8756_s14 }
0x10b6   : > { %v5443_v23 = vld [vmem:[#allocation3] sm:$0xff] }
0x10b7   : > { %5413 = vrot.lane.b32.xlu0 %v5435_v52, %s8757_s15  ;;  %5407 = vrot.lane.b32.xlu1 %v5435_v52, %s11396_s16  ;;  %v10942_v33 = vand.u32 4294901760, %v5443_v23 }
0x10b9   : > { %v10972_v44 = vsub.f32 %v5443_v23, %v10942_v33 }
0x10bb   : > { %5401 = vrot.lane.b32.xlu0 %v5435_v52, %s11397_s17  ;;  %5395 = vrot.lane.b32.xlu1 %v5435_v52, %s11398_s23 }
0x10bf   : > { %5456 = vperm.xlu0 %8688, %v6767_v35   ;;  %6016 = vperm.xlu1 %8687, %v6768_v53  }
0x10c3   : > { %6024 = vperm.xlu0 %8688, %v6769_v54   ;;  %v5619_v54 = vand.u32 4294901760, %v10972_v44 }
0x1121   : > { %v5438_v32 = vpop.permute.xlu0 %5437  ;;  %v5432_v57 = vpop.permute.xlu1 %5431 }
0x1122   : > { %5440 = vst.msk [vmem:[#allocation3 + $0x40] sm:$0xff] %vm230_vm2, %v5438_v32  ;;  %5434 = vst.msk [vmem:[#allocation3 + $0x38] sm:$0xff] %vm230_vm2, %v5432_v57 }
0x1125   : > { %v5426_v59 = vpop.permute.xlu0 %5425  ;;  %v5420_v60 = vpop.permute.xlu1 %5419 }
0x1126   : > { %5428 = vst.msk [vmem:[#allocation3 + $0x30] sm:$0xff] %vm230_vm2, %v5426_v59  ;;  %5422 = vst.msk [vmem:[#allocation3 + $0x28] sm:$0xff] %vm230_vm2, %v5420_v60  ;;  %v5620_v60 = vsub.f32 %v10972_v44, %v5619_v54 }
0x1129   : > { %v5414_v62 = vpop.permute.xlu0 %5413  ;;  %v5408_v63 = vpop.permute.xlu1 %5407  ;;  %v5451_v1 = vld [vmem:[#allocation3 + $0x40] sm:$0xff]  ;;  %v5450_v2 = vld [vmem:[#allocation3 + $0x38] sm:$0xff] }
0x112a   : > { %5416 = vst.msk [vmem:[#allocation3 + $0x20] sm:$0xff] %vm230_vm2, %v5414_v62  ;;  %5410 = vst.msk [vmem:[#allocation3 + $0x18] sm:$0xff] %vm230_vm2, %v5408_v63  ;;  %v10894_v56 = vand.u32 4294901760, %v5451_v1  ;;  %v10896_v3 = vand.u32 4294901760, %v5450_v2  ;;  %v5621_v62 = vand.u32 4294901760, %v5620_v60 }
0x112c   : > { %8385 = vmatpush3.msra.mxu0 %v10894_v56  ;;  %v10900_v4 = vsub.f32 %v5451_v1, %v10894_v56  ;;  %v10903_v5 = vsub.f32 %v5450_v2, %v10896_v3 }
0x112d   : > { %8386 = vmatprep.subr.mxu0 %v8751_v0  ;;  %v5402_v7 = vpop.permute.xlu0 %5401  ;;  %v5396_v8 = vpop.permute.xlu1 %5395  ;;  %v5449_v9 = vld [vmem:[#allocation3 + $0x30] sm:$0xff]  ;;  %v5448_v12 = vld [vmem:[#allocation3 + $0x28] sm:$0xff] }
0x112e   : > { %5404 = vst.msk [vmem:[#allocation3 + $0x10] sm:$0xff] %vm230_vm2, %v5402_v7  ;;  %5398 = vst.msk [vmem:[#allocation3 + $0x8] sm:$0xff] %vm230_vm2, %v5396_v8  ;;  %8387 = vmatpush3.msra.mxu0 %v10896_v3  ;;  %v10912_v14 = vand.u32 4294901760, %v5449_v9  ;;  %v10914_v15 = vand.u32 4294901760, %v5448_v12  ;;  %v5563_v16 = vand.u32 4294901760, %v10900_v4  ;;  %v5570_v17 = vand.u32 4294901760, %v10903_v5 }
0x112f   : > { %8388 = vmatprep.subr.mxu0 %v8751_v0 }
0x1130   : > { %8389 = vmatpush3.msra.mxu0 %v10912_v14  ;;  %v10921_v19 = vsub.f32 %v5449_v9, %v10912_v14  ;;  %v10924_v20 = vsub.f32 %v5448_v12, %v10914_v15  ;;  %v5564_v6 = vsub.f32 %v10900_v4, %v5563_v16  ;;  %v5571_v22 = vsub.f32 %v10903_v5, %v5570_v17 }
0x1131   : > { %8390 = vmatprep.subr.mxu0 %v8751_v0  ;;  %v5447_v24 = vld [vmem:[#allocation3 + $0x20] sm:$0xff]  ;;  %v5446_v25 = vld [vmem:[#allocation3 + $0x18] sm:$0xff] }
0x1132   : > { %8391 = vmatpush3.msra.mxu0 %v10914_v15  ;;  %v10935_v28 = vand.u32 4294901760, %v5447_v24  ;;  %v5565_v18 = vand.u32 4294901760, %v5564_v6  ;;  %v10937_v29 = vand.u32 4294901760, %v5446_v25  ;;  %v5577_v30 = vand.u32 4294901760, %v10921_v19 }
0x1133   : > { %8392 = vmatprep.subr.mxu0 %v8751_v0  ;;  %v5584_v21 = vand.u32 4294901760, %v10924_v20  ;;  %v5572_v34 = vand.u32 4294901760, %v5571_v22 }
0x1134   : > { %8393 = vmatpush3.msra.mxu0 %v10935_v28  ;;  %v10946_v10 = vsub.f32 %v5447_v24, %v10935_v28  ;;  %8406 = vmatpush3.msra.mxu1 %v5565_v18  ;;  %v10949_v11 = vsub.f32 %v5446_v25, %v10937_v29  ;;  %v5578_v37 = vsub.f32 %v10921_v19, %v5577_v30  ;;  %v6771_v18 = vld [vmem:[%s11383_s1 + $0x48] sm:$0xff] }
0x1135   : > { %8394 = vmatprep.subr.mxu0 %v8751_v0  ;;  %8407 = vmatprep.subr.mxu1 %v8751_v0  ;;  %v5445_v36 = vld [vmem:[#allocation3 + $0x10] sm:$0xff]  ;;  %v5585_v38 = vsub.f32 %v10924_v20, %v5584_v21  ;;  %v5444_v39 = vld [vmem:[#allocation3 + $0x8] sm:$0xff] }
0x1136   : > { %8395 = vmatpush3.msra.mxu0 %v10937_v29  ;;  %8408 = vmatpush3.msra.mxu1 %v5572_v34  ;;  %v10963_v41 = vand.u32 4294901760, %v5445_v36  ;;  %v10965_v31 = vand.u32 4294901760, %v5444_v39  ;;  %v5591_v42 = vand.u32 4294901760, %v10946_v10  ;;  %v5598_v26 = vand.u32 4294901760, %v10949_v11 }
0x1137   : > { %8396 = vmatprep.subr.mxu0 %v8751_v0  ;;  %8409 = vmatprep.subr.mxu1 %v8751_v0  ;;  %v5579_v43 = vand.u32 4294901760, %v5578_v37  ;;  %v5586_v49 = vand.u32 4294901760, %v5585_v38 }
0x1138   : > { %8397 = vmatpush3.msra.mxu0 %v10963_v41  ;;  %v10976_v46 = vsub.f32 %v5445_v36, %v10963_v41  ;;  %v10979_v47 = vsub.f32 %v5444_v39, %v10965_v31  ;;  %v5592_v48 = vsub.f32 %v10946_v10, %v5591_v42  ;;  %v5599_v51 = vsub.f32 %v10949_v11, %v5598_v26 }
0x1139   : > { %8410 = vmatpush3.msra.mxu1 %v5579_v43  ;;  %8398 = vmatprep.subr.mxu0 %v8751_v0 }
0x113a   : > { %8411 = vmatprep.subr.mxu1 %v8751_v0  ;;  %8399 = vmatpush3.msra.mxu0 %v10965_v31  ;;  %v5593_v52 = vand.u32 4294901760, %v5592_v48  ;;  %v5605_v35 = vand.u32 4294901760, %v10976_v46  ;;  %v5612_v53 = vand.u32 4294901760, %v10979_v47  ;;  %v5600_v57 = vand.u32 4294901760, %v5599_v51  ;;  %v5457_v8 = vpop.permute.xlu0 %5456 }
0x113b   : > { %8412 = vmatpush3.msra.mxu1 %v5586_v49  ;;  %8400 = vmatprep.subr.mxu0 %v8751_v0 }
0x113c   : > { %8413 = vmatprep.subr.mxu1 %v8751_v0  ;;  %8401 = vmatpush3.msra.mxu0 %v10942_v33  ;;  %v5606_v32 = vsub.f32 %v10976_v46, %v5605_v35  ;;  %v5613_v58 = vsub.f32 %v10979_v47, %v5612_v53 }
0x113d   : > { %8414 = vmatpush3.msra.mxu1 %v5593_v52  ;;  %8403 = vmatmul.mubr.f32.vlgmr.msra.gmra.mxu0 %v5540_v50 }
0x113e   : > { %8415 = vmatprep.subr.mxu1 %v8751_v0  ;;  %8426 = vmatprep.subr.mxu0 %v8751_v0  ;;  %v5607_v59 = vand.u32 4294901760, %v5606_v32  ;;  %v5614_v61 = vand.u32 4294901760, %v5613_v58  ;;  %v6025_v23 = vpop.permute.xlu0 %6024 }
0x113f   : > { %8416 = vmatpush3.msra.mxu1 %v5600_v57  ;;  %8427 = vmatpush3.msra.mxu0 %v10900_v4 }
0x1140   : > { %8417 = vmatprep.subr.mxu1 %v8751_v0  ;;  %8428 = vmatprep.subr.mxu0 %v8751_v0 }
0x1141   : > { %8418 = vmatpush3.msra.mxu1 %v5607_v59  ;;  %8429 = vmatpush3.msra.mxu0 %v10903_v5 }
0x1142   : > { %8419 = vmatprep.subr.mxu1 %v8751_v0  ;;  %8430 = vmatprep.subr.mxu0 %v8751_v0 }
0x1143   : > { %8420 = vmatpush3.msra.mxu1 %v5614_v61  ;;  %8431 = vmatpush3.msra.mxu0 %v10921_v19 }
0x1144   : > { %8421 = vmatprep.subr.mxu1 %v8751_v0  ;;  %8432 = vmatprep.subr.mxu0 %v8751_v0 }
0x1145   : > { %8422 = vmatpush3.msra.mxu1 %v5621_v62  ;;  %8433 = vmatpush3.msra.mxu0 %v10924_v20  ;;  %v6017_v20 = vpop.permute.xlu1 %6016 }
0x1146   : > { %8424 = vmatmul.mubr.f32.vlgmr.msra.gmra.mxu1 %v10890_v55  ;;  %8434 = vmatprep.subr.mxu0 %v8751_v0 }
0x1147   : > { %8447 = vmatprep.subr.mxu1 %v8751_v0  ;;  %8435 = vmatpush3.msra.mxu0 %v10946_v10 }
0x1148   : > { %8448 = vmatpush3.msra.mxu1 %v10894_v56  ;;  %8436 = vmatprep.subr.mxu0 %v8751_v0 }
0x1149   : > { %8449 = vmatprep.subr.mxu1 %v8751_v0  ;;  %8437 = vmatpush3.msra.mxu0 %v10949_v11 }
0x114a   : > { %8450 = vmatpush3.msra.mxu1 %v10896_v3  ;;  %8438 = vmatprep.subr.mxu0 %v8751_v0 }
0x114b   : > { %8451 = vmatprep.subr.mxu1 %v8751_v0  ;;  %8439 = vmatpush3.msra.mxu0 %v10976_v46 }
0x114c   : > { %8452 = vmatpush3.msra.mxu1 %v10912_v14  ;;  %8440 = vmatprep.subr.mxu0 %v8751_v0 }
0x114d   : > { %8453 = vmatprep.subr.mxu1 %v8751_v0  ;;  %8441 = vmatpush3.msra.mxu0 %v10979_v47 }
0x114e   : > { %8454 = vmatpush3.msra.mxu1 %v10914_v15  ;;  %8442 = vmatprep.subr.mxu0 %v8751_v0 }
0x114f   : > { %8455 = vmatprep.subr.mxu1 %v8751_v0  ;;  %8443 = vmatpush3.msra.mxu0 %v10972_v44 }
0x1150   : > { %8444 = vmatprep.mubr.msk.f32.mxu0 %vm8761_vm3, %v8751_v0  ;;  %8456 = vmatpush3.msra.mxu1 %v10935_v28 }
0x1151   : > { %8445 = vmatmul.mubr.f32.vlgmr.msra.gmra.mxu0 %v10907_v13  ;;  %8457 = vmatprep.subr.mxu1 %v8751_v0 }
0x1152   : > { %8468 = vmatprep.subr.mxu0 %v8751_v0  ;;  %8458 = vmatpush3.msra.mxu1 %v10937_v29 }
0x1153   : > { %8469 = vmatpush3.msra.mxu0 %v5563_v16  ;;  %8459 = vmatprep.subr.mxu1 %v8751_v0 }
0x1154   : > { %8470 = vmatprep.subr.mxu0 %v8751_v0  ;;  %8460 = vmatpush3.msra.mxu1 %v10963_v41 }
0x1155   : > { %8471 = vmatpush3.msra.mxu0 %v5570_v17  ;;  %8461 = vmatprep.subr.mxu1 %v8751_v0 }
0x1156   : > { %8472 = vmatprep.subr.mxu0 %v8751_v0  ;;  %8462 = vmatpush3.msra.mxu1 %v10965_v31 }
0x1157   : > { %8473 = vmatpush3.msra.mxu0 %v5577_v30  ;;  %8463 = vmatprep.subr.mxu1 %v8751_v0 }
0x1158   : > { %8474 = vmatprep.subr.mxu0 %v8751_v0  ;;  %8464 = vmatpush3.msra.mxu1 %v10942_v33 }
0x1159   : > { %8465 = vmatprep.mubr.msk.f32.mxu1 %vm8761_vm3, %v8751_v0  ;;  %8475 = vmatpush3.msra.mxu0 %v5584_v21  ;;  %v6770_v21 = vld [vmem:[%s11382_s0 + $0x48] sm:$0xff] }
0x115a   : > { %8466 = vmatmul.mubr.f32.vlgmr.msra.gmra.mxu1 %v5538_v27  ;;  %8476 = vmatprep.subr.mxu0 %v8751_v0  ;;  %v6103_v11 = vsel %vm296_vm4, %v6770_v21, 0 }
0x115b   : > { %8489 = vmatprep.subr.mxu1 %v8751_v0  ;;  %8477 = vmatpush3.msra.mxu0 %v5591_v42  ;;  %v11132_v39 = vand.u32 4294901760, %v6103_v11 }
0x115c   : > { %8490 = vmatpush3.msra.mxu1 %v10894_v56  ;;  %8478 = vmatprep.subr.mxu0 %v8751_v0 }
0x115d   : > { %8491 = vmatprep.subr.mxu1 %v8751_v0  ;;  %8479 = vmatpush3.msra.mxu0 %v5598_v26  ;;  %v11149_v47 = vsub.f32 %v6103_v11, %v11132_v39 }
0x115e   : > { %8492 = vmatpush3.msra.mxu1 %v10896_v3  ;;  %8480 = vmatprep.subr.mxu0 %v8751_v0 }
0x115f   : > { %8493 = vmatprep.subr.mxu1 %v8751_v0  ;;  %8481 = vmatpush3.msra.mxu0 %v5605_v35  ;;  %v6181_v59 = vand.u32 4294901760, %v11149_v47 }
0x1160   : > { %8494 = vmatpush3.msra.mxu1 %v10912_v14  ;;  %8482 = vmatprep.subr.mxu0 %v8751_v0 }
0x1161   : > { %8495 = vmatprep.subr.mxu1 %v8751_v0  ;;  %8483 = vmatpush3.msra.mxu0 %v5612_v53 }
0x1162   : > { %8496 = vmatpush3.msra.mxu1 %v10914_v15  ;;  %8484 = vmatprep.subr.mxu0 %v8751_v0 }
0x1163   : > { %8497 = vmatprep.subr.mxu1 %v8751_v0  ;;  %8485 = vmatpush3.msra.mxu0 %v5619_v54 }
0x1164   : > { %8486 = vmatprep.mubr.msk.f32.mxu0 %vm8761_vm3, %v8751_v0  ;;  %8498 = vmatpush3.msra.mxu1 %v10935_v28 }
0x1165   : > { %8487 = vmatmul.mubr.f32.vlgmr.msra.gmra.mxu0 %v10890_v55  ;;  %8499 = vmatprep.subr.mxu1 %v8751_v0 }
0x1166   : > { %8500 = vmatpush3.msra.mxu1 %v10937_v29  ;;  %8507 = vmatprep.mubr.msk.f32.mxu1 %vm8761_vm3, %v8751_v0 }
0x1167   : > { %8501 = vmatprep.subr.mxu1 %v8751_v0  ;;  %8510 = vmatprep.subr.mxu0 %v8751_v0 }
0x1168   : > { %8502 = vmatpush3.msra.mxu1 %v10963_v41  ;;  %8528 = vmatprep.mubr.msk.f32.mxu0 %vm8761_vm3, %v8751_v0 }
0x1169   : > { %8503 = vmatprep.subr.mxu1 %v8751_v0 }
0x116a   : > { %8504 = vmatpush3.msra.mxu1 %v10965_v31 }
0x116b   : > { %8505 = vmatprep.subr.mxu1 %v8751_v0 }
0x116c   : > { %8506 = vmatpush3.msra.mxu1 %v10942_v33 }
0x116d   : > { %8508 = vmatmul.mubr.f32.vlgmr.msra.gmra.mxu1 %v10890_v55  ;;  %8531 = vmatprep.subr.mxu1 %v8751_v0 }
0x116e   : > { %8549 = vmatprep.mubr.msk.f32.mxu1 %vm8761_vm3, %v8751_v0 }
0x11fd   : > { %v5542_v63 = vpop.f32.mrf.mxu0 }
0x11fe   : > { %v5543_v9 = vadd.f32 %v5542_v63, %v5457_v8 }
0x11ff   : > { %v8404_v1 = vpop.f32.mrf.mxu0 }
0x1206   : > { %v5658_v2 = vpop.f32.mrf.mxu1 }
0x1207   : > { %v5659_v13 = vadd.f32 %v5658_v2, %v5543_v9 }
0x1208   : > { %v8425_v56 = vpop.f32.mrf.mxu1 }
0x1211   : > { %v5748_v3 = vpop.f32.mrf.mxu0 }
0x1212   : > { %v5749_v15 = vadd.f32 %v5748_v3, %v5659_v13 }
0x1213   : > { %v8446_v4 = vpop.f32.mrf.mxu0 }
0x121a   : > { %v5830_v5 = vpop.f32.mrf.mxu1 }
0x121b   : > { %v5831_v55 = vadd.f32 %v5830_v5, %v5749_v15 }
0x121c   : > { %v8467_v7 = vpop.f32.mrf.mxu1 }
0x1225   : > { %v5928_v12 = vpop.f32.mrf.mxu0 }
0x1226   : > { %v5929_v16 = vadd.f32 %v5928_v12, %v5831_v55  ;;  %v6182_v12 = vsub.f32 %v11149_v47, %v6181_v59 }
0x1227   : > { %v8488_v14 = vpop.f32.mrf.mxu0 }
0x122d   : > { %v6008_v17 = vpop.f32.mrf.mxu1 }
0x122e   : > { %v6009_v19 = vadd.f32 %v6008_v17, %v5929_v16 }
0x122f   : > { %v8509_v6 = vpop.f32.mrf.mxu1 }
0x1230   : > { %v6019_v22 = vmul.f32 %v6017_v20, %v6009_v19 }
0x1232   : > { %v6027_v24 = vadd.f32 %v6025_v23, %v6019_v22  ;;  %v6183_v23 = vand.u32 4294901760, %v6182_v12 }
0x1234   : > { %v6028_v25 = vmax.f32 %v6027_v24, 0.0 }
0x1236   : > { %6030 = vrot.lane.b32.xlu1 %v6028_v25, %s8752_s10 }
0x12a8   : > { %v6031_v27 = vpop.permute.xlu1 %6030 }
0x12a9   : > { %6033 = vst.msk [vmem:[#allocation2] sm:$0xff] %vm227_vm1, %v6031_v27 }
0x12b0   : > { %v6078_v28 = vld [vmem:[#allocation2] sm:$0xff] }
0x12b1   : > { %6080 = vrot.lane.b32.xlu0 %v6078_v28, %s8753_s11  ;;  %6074 = vrot.lane.b32.xlu1 %v6078_v28, %s8754_s12  ;;  %6035 = vst.msk [vmem:[#allocation3] sm:$0xff] %vm230_vm2, %v6078_v28 }
0x12b5   : > { %6068 = vrot.lane.b32.xlu0 %v6078_v28, %s8755_s13  ;;  %6062 = vrot.lane.b32.xlu1 %v6078_v28, %s8756_s14  ;;  %s213_s13 = sand.u32 1, %s8741_s19  }
0x12b6   : > { %s6734_s14 = sshll.u32 %s213_s13, 3  ;;  %s6658_s9 = scalar_lea.sflag [#allocation5], %s213_s13 }
0x12b8   : > { %v6086_v32 = vld [vmem:[#allocation3] sm:$0xff] }
0x12b9   : > { %6056 = vrot.lane.b32.xlu0 %v6078_v28, %s8757_s15  ;;  %6050 = vrot.lane.b32.xlu1 %v6078_v28, %s11396_s16  ;;  %v11184_v2 = vand.u32 4294901760, %v6086_v32  ;;  %s6773_s15 = sshll.u32 %s8815_s22, 7  ;;  %s215_s16 = scalar_lea.vmem [#allocation4], %s6734_s14 }
0x12ba   : > { %s6669_s8 = scalar_lea.hbm %s11387_s5, %s6773_s15  ;;  %s8763_s22 = smov [#allocation4]  }
0x12bb   : > { %v11214_v17 = vsub.f32 %v6086_v32, %v11184_v2  ;;  %s8693_s26 = sshll.u32 %s8763_s22, 4  ;;  %s8694_s26 = int_to_ptr.vmem [resolvable:$false] %s8693_s26 }
0x12bc   : > { %s8695_s30 = scalar_lea.vmem %s8694_s26, 256 }
0x12bd   : > { %6044 = vrot.lane.b32.xlu0 %v6078_v28, %s11397_s17  ;;  %6038 = vrot.lane.b32.xlu1 %v6078_v28, %s11398_s23  ;;  %s6671_s17 = sshll.u32 %s215_s16, 4  ;;  %s6672_s17 = int_to_ptr.vmem [resolvable:$true] %s6671_s17 }
0x12be   : > { %s8689_s25 = scalar_lea.vmem %s6672_s17, 128  ;;  %p8696_p0 = scmp.lt.s32.totalorder %s6672_s17, %s8694_s26 }
0x12bf   : > { %p8690_p11 = scmp.ne.s32.totalorder %s6672_s17, %s8689_s25  ;;  %p8697_p1 = scmp.lt.s32.totalorder %s8695_s30, %s8689_s25 }
0x12c1   : > { %6099 = vperm.xlu0 %8688, %v6771_v18   ;;  %v6262_v18 = vand.u32 4294901760, %v11214_v17  ;;  %p8691_p12 = pnand %p8690_p11, %p8832_p5  ;;  %p8698_p2 = por %p8697_p1, %p8696_p0 }
0x12c3   : > { %p8692_p13 = pneg %p8691_p12 }
0x12c5   : > { %p8699_p3 = pnand %p8698_p2, %p8692_p13 }
0x1323   : > { %v6081_v29 = vpop.permute.xlu0 %6080  ;;  %v6075_v30 = vpop.permute.xlu1 %6074 }
0x1324   : > { %6083 = vst.msk [vmem:[#allocation3 + $0x40] sm:$0xff] %vm230_vm2, %v6081_v29  ;;  %6077 = vst.msk [vmem:[#allocation3 + $0x38] sm:$0xff] %vm230_vm2, %v6075_v30 }
0x1327   : > { %v6069_v33 = vpop.permute.xlu0 %6068  ;;  %v6063_v10 = vpop.permute.xlu1 %6062 }
0x1328   : > { %6071 = vst.msk [vmem:[#allocation3 + $0x30] sm:$0xff] %vm230_vm2, %v6069_v33  ;;  %6065 = vst.msk [vmem:[#allocation3 + $0x28] sm:$0xff] %vm230_vm2, %v6063_v10  ;;  %v6263_v10 = vsub.f32 %v11214_v17, %v6262_v18 }
0x132b   : > { %v6057_v34 = vpop.permute.xlu0 %6056  ;;  %v6051_v36 = vpop.permute.xlu1 %6050  ;;  %v6094_v37 = vld [vmem:[#allocation3 + $0x40] sm:$0xff]  ;;  %v6093_v38 = vld [vmem:[#allocation3 + $0x38] sm:$0xff] }
0x132c   : > { %6059 = vst.msk [vmem:[#allocation3 + $0x20] sm:$0xff] %vm230_vm2, %v6057_v34  ;;  %6053 = vst.msk [vmem:[#allocation3 + $0x18] sm:$0xff] %vm230_vm2, %v6051_v36  ;;  %v11136_v40 = vand.u32 4294901760, %v6094_v37  ;;  %v11138_v41 = vand.u32 4294901760, %v6093_v38  ;;  %v6264_v34 = vand.u32 4294901760, %v6263_v10 }
0x132e   : > { %8511 = vmatpush3.msra.mxu0 %v11136_v40  ;;  %v11142_v31 = vsub.f32 %v6094_v37, %v11136_v40  ;;  %v11145_v42 = vsub.f32 %v6093_v38, %v11138_v41 }
0x132f   : > { %8512 = vmatprep.subr.mxu0 %v8751_v0  ;;  %v6045_v26 = vpop.permute.xlu0 %6044  ;;  %v6039_v43 = vpop.permute.xlu1 %6038  ;;  %v6092_v44 = vld [vmem:[#allocation3 + $0x30] sm:$0xff]  ;;  %v6091_v46 = vld [vmem:[#allocation3 + $0x28] sm:$0xff] }
0x1330   : > { %6047 = vst.msk [vmem:[#allocation3 + $0x10] sm:$0xff] %vm230_vm2, %v6045_v26  ;;  %6041 = vst.msk [vmem:[#allocation3 + $0x8] sm:$0xff] %vm230_vm2, %v6039_v43  ;;  %8513 = vmatpush3.msra.mxu0 %v11138_v41  ;;  %v11154_v48 = vand.u32 4294901760, %v6092_v44  ;;  %v11156_v49 = vand.u32 4294901760, %v6091_v46  ;;  %v6206_v50 = vand.u32 4294901760, %v11142_v31  ;;  %v6213_v51 = vand.u32 4294901760, %v11145_v42 }
0x1331   : > { %8514 = vmatprep.subr.mxu0 %v8751_v0 }
0x1332   : > { %8515 = vmatpush3.msra.mxu0 %v11154_v48  ;;  %v11163_v52 = vsub.f32 %v6092_v44, %v11154_v48  ;;  %v11166_v35 = vsub.f32 %v6091_v46, %v11156_v49  ;;  %v6207_v53 = vsub.f32 %v11142_v31, %v6206_v50  ;;  %v6214_v54 = vsub.f32 %v11145_v42, %v6213_v51 }
0x1333   : > { %8516 = vmatprep.subr.mxu0 %v8751_v0  ;;  %v6090_v57 = vld [vmem:[#allocation3 + $0x20] sm:$0xff]  ;;  %v6089_v58 = vld [vmem:[#allocation3 + $0x18] sm:$0xff] }
0x1334   : > { %8517 = vmatpush3.msra.mxu0 %v11156_v49  ;;  %v11177_v60 = vand.u32 4294901760, %v6090_v57  ;;  %v6208_v61 = vand.u32 4294901760, %v6207_v53  ;;  %v11179_v62 = vand.u32 4294901760, %v6089_v58  ;;  %v6220_v63 = vand.u32 4294901760, %v11163_v52 }
0x1335   : > { %8518 = vmatprep.subr.mxu0 %v8751_v0  ;;  %v6227_v1 = vand.u32 4294901760, %v11166_v35  ;;  %v6215_v4 = vand.u32 4294901760, %v6214_v54 }
0x1336   : > { %8519 = vmatpush3.msra.mxu0 %v11177_v60  ;;  %v11188_v56 = vsub.f32 %v6090_v57, %v11177_v60  ;;  %8532 = vmatpush3.msra.mxu1 %v6208_v61  ;;  %v11191_v3 = vsub.f32 %v6089_v58, %v11179_v62  ;;  %v6221_v7 = vsub.f32 %v11163_v52, %v6220_v63 }
0x1337   : > { %8520 = vmatprep.subr.mxu0 %v8751_v0  ;;  %8533 = vmatprep.subr.mxu1 %v8751_v0  ;;  %v6088_v5 = vld [vmem:[#allocation3 + $0x10] sm:$0xff]  ;;  %v6228_v8 = vsub.f32 %v11166_v35, %v6227_v1  ;;  %v6087_v9 = vld [vmem:[#allocation3 + $0x8] sm:$0xff] }
0x1338   : > { %8521 = vmatpush3.msra.mxu0 %v11179_v62  ;;  %8534 = vmatpush3.msra.mxu1 %v6215_v4  ;;  %v11205_v13 = vand.u32 4294901760, %v6088_v5  ;;  %v11207_v14 = vand.u32 4294901760, %v6087_v9  ;;  %v6234_v15 = vand.u32 4294901760, %v11188_v56  ;;  %v6241_v55 = vand.u32 4294901760, %v11191_v3 }
0x1339   : > { %8522 = vmatprep.subr.mxu0 %v8751_v0  ;;  %8535 = vmatprep.subr.mxu1 %v8751_v0  ;;  %v6222_v16 = vand.u32 4294901760, %v6221_v7  ;;  %v6229_v22 = vand.u32 4294901760, %v6228_v8 }
0x133a   : > { %8523 = vmatpush3.msra.mxu0 %v11205_v13  ;;  %v11218_v19 = vsub.f32 %v6088_v5, %v11205_v13  ;;  %v11221_v20 = vsub.f32 %v6087_v9, %v11207_v14  ;;  %v6235_v6 = vsub.f32 %v11188_v56, %v6234_v15  ;;  %v6242_v24 = vsub.f32 %v11191_v3, %v6241_v55 }
0x133b   : > { %8536 = vmatpush3.msra.mxu1 %v6222_v16  ;;  %8524 = vmatprep.subr.mxu0 %v8751_v0 }
0x133c   : > { %8537 = vmatprep.subr.mxu1 %v8751_v0  ;;  %8525 = vmatpush3.msra.mxu0 %v11207_v14  ;;  %v6236_v25 = vand.u32 4294901760, %v6235_v6  ;;  %v6248_v27 = vand.u32 4294901760, %v11218_v19  ;;  %v6255_v28 = vand.u32 4294901760, %v11221_v20  ;;  %v6243_v30 = vand.u32 4294901760, %v6242_v24  ;;  %v6100_v43 = vpop.permute.xlu0 %6099 }
0x133d   : > { %8538 = vmatpush3.msra.mxu1 %v6229_v22  ;;  %8526 = vmatprep.subr.mxu0 %v8751_v0 }
0x133e   : > { %8539 = vmatprep.subr.mxu1 %v8751_v0  ;;  %8527 = vmatpush3.msra.mxu0 %v11184_v2  ;;  %v6249_v29 = vsub.f32 %v11218_v19, %v6248_v27  ;;  %v6256_v21 = vsub.f32 %v11221_v20, %v6255_v28 }
0x133f   : > { %8540 = vmatpush3.msra.mxu1 %v6236_v25  ;;  %8529 = vmatmul.mubr.f32.vlgmr.msra.gmra.mxu0 %v6183_v23 }
0x1340   : > { %8541 = vmatprep.subr.mxu1 %v8751_v0  ;;  %8552 = vmatprep.subr.mxu0 %v8751_v0  ;;  %v6250_v33 = vand.u32 4294901760, %v6249_v29  ;;  %v6257_v11 = vand.u32 4294901760, %v6256_v21 }
0x1341   : > { %8542 = vmatpush3.msra.mxu1 %v6243_v30  ;;  %8553 = vmatpush3.msra.mxu0 %v11142_v31 }
0x1342   : > { %8543 = vmatprep.subr.mxu1 %v8751_v0  ;;  %8554 = vmatprep.subr.mxu0 %v8751_v0 }
0x1343   : > { %8544 = vmatpush3.msra.mxu1 %v6250_v33  ;;  %8555 = vmatpush3.msra.mxu0 %v11145_v42 }
0x1344   : > { %8545 = vmatprep.subr.mxu1 %v8751_v0  ;;  %8556 = vmatprep.subr.mxu0 %v8751_v0 }
0x1345   : > { %8546 = vmatpush3.msra.mxu1 %v6257_v11  ;;  %8557 = vmatpush3.msra.mxu0 %v11163_v52 }
0x1346   : > { %8547 = vmatprep.subr.mxu1 %v8751_v0  ;;  %8558 = vmatprep.subr.mxu0 %v8751_v0 }
0x1347   : > { %8548 = vmatpush3.msra.mxu1 %v6264_v34  ;;  %8559 = vmatpush3.msra.mxu0 %v11166_v35 }
0x1348   : > { %8550 = vmatmul.mubr.f32.vlgmr.msra.gmra.mxu1 %v11132_v39  ;;  %8560 = vmatprep.subr.mxu0 %v8751_v0 }
0x1349   : > { %8573 = vmatprep.subr.mxu1 %v8751_v0  ;;  %8561 = vmatpush3.msra.mxu0 %v11188_v56 }
0x134a   : > { %8574 = vmatpush3.msra.mxu1 %v11136_v40  ;;  %8562 = vmatprep.subr.mxu0 %v8751_v0 }
0x134b   : > { %8575 = vmatprep.subr.mxu1 %v8751_v0  ;;  %8563 = vmatpush3.msra.mxu0 %v11191_v3 }
0x134c   : > { %8576 = vmatpush3.msra.mxu1 %v11138_v41  ;;  %8564 = vmatprep.subr.mxu0 %v8751_v0 }
0x134d   : > { %8577 = vmatprep.subr.mxu1 %v8751_v0  ;;  %8565 = vmatpush3.msra.mxu0 %v11218_v19 }
0x134e   : > { %8578 = vmatpush3.msra.mxu1 %v11154_v48  ;;  %8566 = vmatprep.subr.mxu0 %v8751_v0 }
0x134f   : > { %8579 = vmatprep.subr.mxu1 %v8751_v0  ;;  %8567 = vmatpush3.msra.mxu0 %v11221_v20 }
0x1350   : > { %8580 = vmatpush3.msra.mxu1 %v11156_v49  ;;  %8568 = vmatprep.subr.mxu0 %v8751_v0 }
0x1351   : > { %8581 = vmatprep.subr.mxu1 %v8751_v0  ;;  %8569 = vmatpush3.msra.mxu0 %v11214_v17 }
0x1352   : > { %8570 = vmatprep.mubr.msk.f32.mxu0 %vm8761_vm3, %v8751_v0  ;;  %8582 = vmatpush3.msra.mxu1 %v11177_v60 }
0x1353   : > { %8571 = vmatmul.mubr.f32.vlgmr.msra.gmra.mxu0 %v11149_v47  ;;  %8583 = vmatprep.subr.mxu1 %v8751_v0 }
0x1354   : > { %8594 = vmatprep.subr.mxu0 %v8751_v0  ;;  %8584 = vmatpush3.msra.mxu1 %v11179_v62 }
0x1355   : > { %8595 = vmatpush3.msra.mxu0 %v6206_v50  ;;  %8585 = vmatprep.subr.mxu1 %v8751_v0 }
0x1356   : > { %8596 = vmatprep.subr.mxu0 %v8751_v0  ;;  %8586 = vmatpush3.msra.mxu1 %v11205_v13 }
0x1357   : > { %8597 = vmatpush3.msra.mxu0 %v6213_v51  ;;  %8587 = vmatprep.subr.mxu1 %v8751_v0 }
0x1358   : > { %8598 = vmatprep.subr.mxu0 %v8751_v0  ;;  %8588 = vmatpush3.msra.mxu1 %v11207_v14 }
0x1359   : > { %8599 = vmatpush3.msra.mxu0 %v6220_v63  ;;  %8589 = vmatprep.subr.mxu1 %v8751_v0 }
0x135a   : > { %8600 = vmatprep.subr.mxu0 %v8751_v0  ;;  %8590 = vmatpush3.msra.mxu1 %v11184_v2 }
0x135b   : > { %8591 = vmatprep.mubr.msk.f32.mxu1 %vm8761_vm3, %v8751_v0  ;;  %8601 = vmatpush3.msra.mxu0 %v6227_v1 }
0x135c   : > { %8592 = vmatmul.mubr.f32.vlgmr.msra.gmra.mxu1 %v6181_v59  ;;  %8602 = vmatprep.subr.mxu0 %v8751_v0 }
0x135d   : > { %8615 = vmatprep.subr.mxu1 %v8751_v0  ;;  %8603 = vmatpush3.msra.mxu0 %v6234_v15 }
0x135e   : > { %8616 = vmatpush3.msra.mxu1 %v11136_v40  ;;  %8604 = vmatprep.subr.mxu0 %v8751_v0 }
0x135f   : > { %8617 = vmatprep.subr.mxu1 %v8751_v0  ;;  %8605 = vmatpush3.msra.mxu0 %v6241_v55 }
0x1360   : > { %8618 = vmatpush3.msra.mxu1 %v11138_v41  ;;  %8606 = vmatprep.subr.mxu0 %v8751_v0 }
0x1361   : > { %8619 = vmatprep.subr.mxu1 %v8751_v0  ;;  %8607 = vmatpush3.msra.mxu0 %v6248_v27 }
0x1362   : > { %8620 = vmatpush3.msra.mxu1 %v11154_v48  ;;  %8608 = vmatprep.subr.mxu0 %v8751_v0 }
0x1363   : > { %8621 = vmatprep.subr.mxu1 %v8751_v0  ;;  %8609 = vmatpush3.msra.mxu0 %v6255_v28 }
0x1364   : > { %8622 = vmatpush3.msra.mxu1 %v11156_v49  ;;  %8610 = vmatprep.subr.mxu0 %v8751_v0 }
0x1365   : > { %8623 = vmatprep.subr.mxu1 %v8751_v0  ;;  %8611 = vmatpush3.msra.mxu0 %v6262_v18 }
0x1366   : > { %8612 = vmatprep.mubr.msk.f32.mxu0 %vm8761_vm3, %v8751_v0  ;;  %8624 = vmatpush3.msra.mxu1 %v11177_v60 }
0x1367   : > { %8613 = vmatmul.mubr.f32.vlgmr.msra.gmra.mxu0 %v11132_v39  ;;  %8625 = vmatprep.subr.mxu1 %v8751_v0 }
0x1368   : > { %8626 = vmatpush3.msra.mxu1 %v11179_v62  ;;  %8633 = vmatprep.mubr.msk.f32.mxu1 %vm8761_vm3, %v8751_v0 }
0x1369   : > { %8627 = vmatprep.subr.mxu1 %v8751_v0 }
0x136a   : > { %8628 = vmatpush3.msra.mxu1 %v11205_v13 }
0x136b   : > { %8629 = vmatprep.subr.mxu1 %v8751_v0 }
0x136c   : > { %8630 = vmatpush3.msra.mxu1 %v11207_v14 }
0x136d   : > { %8631 = vmatprep.subr.mxu1 %v8751_v0 }
0x136e   : > { %8632 = vmatpush3.msra.mxu1 %v11184_v2 }
0x136f   : > { %8634 = vmatmul.mubr.f32.vlgmr.msra.gmra.mxu1 %v11132_v39 }
0x13ff   : > { %v6185_v36 = vpop.f32.mrf.mxu0 }
0x1400   : > { %v6186_v44 = vadd.f32 %v6185_v36, %v6100_v43 }
0x1401   : > { %v8530_v37 = vpop.f32.mrf.mxu0 }
0x1408   : > { %v6301_v38 = vpop.f32.mrf.mxu1 }
0x1409   : > { %v6302_v47 = vadd.f32 %v6301_v38, %v6186_v44 }
0x140a   : > { %v8551_v40 = vpop.f32.mrf.mxu1 }
0x1413   : > { %v6391_v41 = vpop.f32.mrf.mxu0 }
0x1414   : > { %v6392_v0 = vadd.f32 %v6391_v41, %v6302_v47 }
0x1415   : > { %v8572_v31 = vpop.f32.mrf.mxu0 }
0x141c   : > { %v6473_v42 = vpop.f32.mrf.mxu1 }
0x141d   : > { %v6474_v49 = vadd.f32 %v6473_v42, %v6392_v0 }
0x141e   : > { %v8593_v26 = vpop.f32.mrf.mxu1 }
0x1427   : > { %v6571_v46 = vpop.f32.mrf.mxu0 }
0x1428   : > { %v6572_v39 = vadd.f32 %v6571_v46, %v6474_v49 }
0x1429   : > { %v8614_v48 = vpop.f32.mrf.mxu0 }
0x142f   : > { %v6651_v50 = vpop.f32.mrf.mxu1 }
0x1430   : > { %v6652_v51 = vadd.f32 %v6651_v50, %v6572_v39 }
0x1431   : > { %v8635_v52 = vpop.f32.mrf.mxu1 }
0x1432   : > { %v6655_v35 = vadd.f32 %v6652_v51, %v10859_v45 }
0x1434   : > { %6656 = vst.msk [vmem:[%s215_s16] sm:$0xff] %vm230_vm2, %v6655_v35 }
0x1435   : > { %8702 = shalt.err (!%p8699_p3)
}
0x1436   : > { %s8703_s10 = scalar_lea.hbm %s6669_s8, 128  ;;  %s8707_s12 = scalar_lea.hbm %s11387_s5, 256 }
0x1437   : > { %p8704_p4 = scmp.ne.s32.totalorder %s6669_s8, %s8703_s10  ;;  %p8708_p9 = scmp.lt.s32.totalorder %s6669_s8, %s11387_s5 }
0x1438   : > { %p8709_p10 = scmp.lt.s32.totalorder %s8707_s12, %s8703_s10 }
0x1439   : > { %p8705_p7 = pnand %p8704_p4, %p8832_p5 }
0x143a   : > { %p8710_p11 = por %p8709_p10, %p8708_p9 }
0x143b   : > { %p8706_p8 = pneg %p8705_p7 }
0x143d   : > { %p8711_p12 = pnand %p8710_p11, %p8706_p8 }
0x143f   : > { %8714 = shalt.err (!%p8711_p12)
}
0x1440   : > { %8636 = dma.vmem_to_hbm [thread:$0]  (%p8832_p5), %s6672_s17, 128, %s6669_s8, %s6658_s9  }
0x1441 PF: > { %p8642_p13 = scmp.ge.s32.totalorder %s8749_s21, 2  ;;  %s6683_s15 = sand.u32 1, %s8737_s18  }
0x1442   : > { %s6684_s16 = scalar_lea.sflag [#allocation5], %s6683_s15 }
0x1443   : > { %p8639_p0 = pnand %p8642_p13, %p8836_p6 }
0x1445   : > { %p8640_p1 = pneg %p8639_p0 }
0x1447   : > { %8732 = dma.done.wait (%p8640_p1), %s6684_s16, 128  }
0x1448   : > { %8734 = vsyncadd (%p8640_p1), %s6684_s16, 4294967168  ;;  %p15_p2 = scmp.ge.s32.totalorder %s8819_s24, 4   ;;  %s11399_s18 = smov %s8741_s19 }
0x1449   : > { %s11400_s19 = smov %s8745_s20  ;;  %s11401_s20 = smov %s8830_s27 }
0x144a   : > { %s11402_s21 = smov %s8819_s24  ;;  %17 = sbr.rel (!%p15_p2) target bundleno = 3 (0x3), region = 111 }
0x144f   :  { %6689 = vsyncpa [#allocation5], 1 }
0x1450   :  { %6691 = vsyncpa [#allocation5 + $0x1], 1 }

</bundles_post_ra>
